<compile_context>
chip_gen: v7x
topology: tpu7x:2x2x1
jax: 0.10.0
libtpu: 0.0.40
codegen_flags: <defaults>
</compile_context>

<pallas_src>
import functools

import numpy as np
import jax
import jax.numpy as jnp
from jax import lax
from jax.experimental import pallas as pl
from jax.experimental.pallas import tpu as pltpu

RMS_EPS = 1.1920928955078125e-07  # torch.finfo(torch.float32).eps (F.rms_norm default)
NEG_INF = -1e30
BF16 = jnp.bfloat16


# ----------------------------- shared kernel math -----------------------------
def _rms(x):
    ms = jnp.mean(x * x, axis=-1, keepdims=True)
    return x * lax.rsqrt(ms + RMS_EPS)


# --------------------------- in-kernel building blocks -------------------------
def _cross_out(x_nb, wv, wp, sel):
    """CrossAttention output for the degenerate mask kv_idx == q_idx // lf.

    Each query attends to exactly one key -> softmax is identically 1, so the
    output is independent of Q/K (their projections, RMSNorm and RoPE are dead):
      y = sel @ (rms(x_kv) @ Wv @ Wp)
    `sel` is a precomputed block-diagonal one-hot (rows_q, rows_t) bf16 matrix
    (selection of 0/1 rows is exact; the selected rows pick up one bf16
    rounding of y relative to f32, well inside tolerance).
    """
    v = jnp.dot(x_nb, wv, preferred_element_type=jnp.float32)
    y = jnp.dot(v.astype(BF16), wp, preferred_element_type=jnp.float32)
    return jnp.dot(sel, y.astype(BF16), preferred_element_type=jnp.float32)


def _causal_self_attn(z_nb, wqkv, wp, cos, sin, bias, n_head):
    """CausalSelfAttention on a pre-RMSNormed, pre-bf16-cast (rows, C) slab.

    rows = bb * seq (bb batch elements flattened); `bias` is a precomputed
    (rows, rows) additive mask (0 inside the same batch element & causal,
    -1e30 elsewhere), so batch flattening stays exact.
    """
    rows, c = z_nb.shape
    dh = c // n_head
    dh2 = dh // 2
    scale = 1.0 / float(np.sqrt(dh))

    qkv = jnp.dot(z_nb, wqkv, preferred_element_type=jnp.float32)       # (rows, 3C)
    v_all = qkv[:, 2 * c:].astype(BF16)                                 # cast V once

    outs = []
    for h in range(n_head):
        lo = h * dh
        q = _rms(qkv[:, lo:lo + dh]) * scale      # fold 1/sqrt(dh) into q
        k = _rms(qkv[:, c + lo:c + lo + dh])
        q1, q2 = q[:, :dh2], q[:, dh2:]
        k1, k2 = k[:, :dh2], k[:, dh2:]
        # Assemble rotated q/k at full head width -> ONE dh-wide contraction
        # per score matmul (half the MXU pushes of the split-halves form).
        q_rot = jnp.concatenate([q1 * cos + q2 * sin,
                                 q2 * cos - q1 * sin], axis=-1).astype(BF16)
        k_rot = jnp.concatenate([k1 * cos + k2 * sin,
                                 k2 * cos - k1 * sin], axis=-1).astype(BF16)
        s = lax.dot_general(q_rot, k_rot, (((1,), (1,)), ((), ())),
                            preferred_element_type=jnp.float32)         # (rows, rows)
        s = s + bias
        s = s - jnp.max(s, axis=-1, keepdims=True)
        p = jnp.exp(s)
        p = p * pl.reciprocal(jnp.sum(p, axis=-1, keepdims=True), approx=True)
        outs.append(jnp.dot(p.astype(BF16), v_all[:, lo:lo + dh],
                            preferred_element_type=jnp.float32))        # (rows, dh)
    # TODO(synk): at realistic n_head write per-head outputs into a (rows, C)
    # VMEM scratch instead of a lane-concatenate to bound vreg pressure.
    o = outs[0] if n_head == 1 else jnp.concatenate(outs, axis=-1)      # (rows, C)
    return jnp.dot(o.astype(BF16), wp, preferred_element_type=jnp.float32)


# ----------------------------- fused forward kernel ----------------------------
def _t2d_kernel(x_ref, sel_ref, bias_t_ref, bias_d_ref,
                cwv_ref, cwp_ref, twqkv_ref, twp_ref, dwqkv_ref, dwp_ref,
                cosk_ref, sink_ref, cosq_ref, sinq_ref,
                xd_ref, *, n_head, n_layers):
    bb, t, c = x_ref.shape
    tq = xd_ref.shape[1]
    rows_t = bb * t
    rows_q = bb * tq

    x = x_ref[...].reshape(rows_t, c)           # (bb*T, C) token stream
    sel = sel_ref[...]                          # (rows_q, rows_t) bf16 one-hot
    bias_t = bias_t_ref[...]                    # (rows_t, rows_t) additive mask
    bias_d = bias_d_ref[...]                    # (rows_q, rows_q) additive mask
    cos_k = cosk_ref[...]; sin_k = sink_ref[...]
    cos_q = cosq_ref[...]; sin_q = sinq_ref[...]

    xd = jnp.full((rows_q, c), 13.0, jnp.float32)

    # Layer loop unrolled at trace time: weights live in VMEM once, x/xd are
    # plain values (no per-layer HBM traffic, no discarded x output).
    for i in range(n_layers - 1):
        x_nb = _rms(x).astype(BF16)             # shared by cross kv-path & token attn
        xd = xd + _cross_out(x_nb, cwv_ref[i], cwp_ref[i], sel)
        x = x + _causal_self_attn(x_nb, twqkv_ref[i], twp_ref[i],
                                  cos_k, sin_k, bias_t, n_head)
        xd = xd + _causal_self_attn(_rms(xd).astype(BF16), dwqkv_ref[i], dwp_ref[i],
                                    cos_q, sin_q, bias_d, n_head)
    xd = xd + _cross_out(_rms(x).astype(BF16),
                         cwv_ref[n_layers - 1], cwp_ref[n_layers - 1], sel)

    xd_ref[...] = xd.reshape(bb, tq, c)


# ----------------------------- parameters / tables -----------------------------
def rope_tables(seq_len, dim, base=10000.0):
    inv_freq = 1.0 / (base ** (np.arange(0, dim, 2, dtype=np.float32) / dim))
    t = np.arange(seq_len, dtype=np.float32)
    freqs = np.outer(t, inv_freq)
    # torch's Rotary caches cos/sin in bfloat16; math then promotes back to f32.
    cos = jnp.asarray(np.cos(freqs)).astype(jnp.bfloat16).astype(jnp.float32)
    sin = jnp.asarray(np.sin(freqs)).astype(jnp.bfloat16).astype(jnp.float32)
    return cos, sin


def init_attn_params(key, c, scale=0.05):
    # nn.Linear(C, C, bias=False) x 4 -> store W.T as (C_in, C_out).
    # TODO(synk): original CausalSelfAttention zero-inits c_proj; random init is
    # used here so the kernels do nonzero work (zero init gives output == 13).
    ks = jax.random.split(key, 4)
    names = ("wqT", "wkT", "wvT", "wpT")
    return {n: jax.random.normal(k, (c, c), jnp.float32) * scale
            for n, k in zip(names, ks)}


def init_params(key, c, n_layer_output):
    keys = jax.random.split(key, 3 * n_layer_output)
    return {
        "cross": [init_attn_params(keys[i], c) for i in range(n_layer_output)],
        "token": [init_attn_params(keys[n_layer_output + i], c)
                  for i in range(n_layer_output - 1)],
        "digit": [init_attn_params(keys[2 * n_layer_output + i], c)
                  for i in range(n_layer_output - 1)],
    }


def _pick_bb(B, T, target_rows=256):
    """Batch elements per grid step: fill ~256 MXU sublane rows, but keep at
    least 2 grid blocks when possible so the 'parallel' batch axis feeds both
    v7x TensorCores."""
    bb = max(1, min(B, target_rows // max(T, 1)))
    while B % bb:
        bb -= 1
    while bb > 1 and B // bb < 2:
        bb -= 1
        while B % bb:
            bb -= 1
    return bb


# ----------------------------- full forward (Pallas) ---------------------------
def tokens_to_digits_forward(x, params, *, n_head, lf, bb=None):
    B, T, C = x.shape
    assert C % n_head == 0 and (C // n_head) % 2 == 0
    Dh = C // n_head
    Tq = T * lf
    nc = len(params["cross"])
    assert nc >= 1
    if bb is None:
        bb = _pick_bb(B, T)
    assert B % bb == 0
    rows_t, rows_q = bb * T, bb * Tq

    # RoPE tables, tiled to the flattened (bb*seq, Dh/2) row layout.
    cos_k, sin_k = rope_tables(T, Dh)
    cos_q, sin_q = rope_tables(Tq, Dh)
    cos_k = jnp.tile(cos_k, (bb, 1)); sin_k = jnp.tile(sin_k, (bb, 1))
    cos_q = jnp.tile(cos_q, (bb, 1)); sin_q = jnp.tile(sin_q, (bb, 1))

    # Constant masks, built once on the host (no per-step iota/compare/select):
    #   sel: block-diagonal one-hot implementing kv_idx == q_idx // lf (k_gt_q=False)
    #   bias_*: additive causal masks restricted to the same batch element.
    qi = np.arange(rows_q); ki = np.arange(rows_t)
    sel_np = ((qi[:, None] // Tq == ki[None, :] // T) &
              ((ki[None, :] % T) == (qi[:, None] % Tq) // lf))
    sel = jnp.asarray(sel_np.astype(np.float32)).astype(BF16)

    def causal_bias(rows, seq):
        b = np.arange(rows) // seq
        p = np.arange(rows) % seq
        ok = (b[:, None] == b[None, :]) & (p[None, :] <= p[:, None])
        return jnp.asarray(np.where(ok, 0.0, NEG_INF).astype(np.float32))

    bias_t = causal_bias(rows_t, T)
    bias_d = causal_bias(rows_q, Tq)

    # Stack per-layer weights (layer-major), fuse q/k/v, store bf16.
    # Cross-attention Wq/Wk are mathematically dead (one-hot mask) -> not passed.
    def _qkv(p):
        return jnp.concatenate([p["wqT"], p["wkT"], p["wvT"]], axis=-1)

    cwv = jnp.stack([p["wvT"] for p in params["cross"]]).astype(BF16)   # (nc,C,C)
    cwp = jnp.stack([p["wpT"] for p in params["cross"]]).astype(BF16)   # (nc,C,C)
    if nc > 1:
        twqkv = jnp.stack([_qkv(p) for p in params["token"]]).astype(BF16)
        twp = jnp.stack([p["wpT"] for p in params["token"]]).astype(BF16)
        dwqkv = jnp.stack([_qkv(p) for p in params["digit"]]).astype(BF16)
        dwp = jnp.stack([p["wpT"] for p in params["digit"]]).astype(BF16)
    else:  # n_layer_output == 1: dummy (never read) single-layer stacks
        twqkv = jnp.zeros((1, C, 3 * C), BF16); twp = jnp.zeros((1, C, C), BF16)
        dwqkv = jnp.zeros((1, C, 3 * C), BF16); dwp = jnp.zeros((1, C, C), BF16)

    kernel = functools.partial(_t2d_kernel, n_head=n_head, n_layers=nc)

    bmap3 = lambda i: (i, 0, 0)                  # per-batch-block activations
    full2 = lambda i: (0, 0)                     # grid-invariant 2-D constants
    full3 = lambda i: (0, 0, 0)                  # grid-invariant stacked weights
    spec2 = lambda a: pl.BlockSpec(tuple(a.shape), full2)
    spec3 = lambda a: pl.BlockSpec(tuple(a.shape), full3)

    xd = pl.pallas_call(
        kernel,
        out_shape=jax.ShapeDtypeStruct((B, Tq, C), jnp.float32),
        grid=(B // bb,),
        in_specs=[
            pl.BlockSpec((bb, T, C), bmap3),     # x (input tokens)
            spec2(sel), spec2(bias_t), spec2(bias_d),
            spec3(cwv), spec3(cwp),              # cross Wv, Wproj
            spec3(twqkv), spec3(twp),            # token fused Wqkv, Wproj
            spec3(dwqkv), spec3(dwp),            # digit fused Wqkv, Wproj
            spec2(cos_k), spec2(sin_k),          # rope (token stream)
            spec2(cos_q), spec2(sin_q),          # rope (digit stream)
        ],
        out_specs=pl.BlockSpec((bb, Tq, C), bmap3),
        compiler_params=pltpu.CompilerParams(
            dimension_semantics=("parallel",),
            vmem_limit_bytes=32 * 1024 * 1024),
    )(x, sel, bias_t, bias_d, cwv, cwp, twqkv, twp, dwqkv, dwp,
      cos_k, sin_k, cos_q, sin_q)
    return xd


# ----------------------------- pure-JAX reference ------------------------------
# Full-fidelity semantics (real masked softmax for the cross path, full Q/K
# projections + RMSNorm + RoPE), with bf16 matmul inputs / f32 accumulation to
# mirror the kernel's MXU numerics.
def _ref_rope4d(x, cos, sin):
    d = x.shape[-1] // 2
    x1, x2 = x[..., :d], x[..., d:]
    c = cos[None, :, None, :]
    s = sin[None, :, None, :]
    return jnp.concatenate([x1 * c + x2 * s, -x1 * s + x2 * c], axis=-1)


def _ref_attend(xq_n, xkv_n, p, cos_q, sin_q, cos_k, sin_k, mask, n_head):
    B, Tq, C = xq_n.shape
    Tk = xkv_n.shape[1]
    Dh = C // n_head
    proj = lambda a, w: jnp.dot(a.astype(BF16), w.astype(BF16),
                                preferred_element_type=jnp.float32)
    q = proj(xq_n, p["wqT"]).reshape(B, Tq, n_head, Dh)
    k = proj(xkv_n, p["wkT"]).reshape(B, Tk, n_head, Dh)
    v = proj(xkv_n, p["wvT"]).reshape(B, Tk, n_head, Dh)
    q = _ref_rope4d(_rms(q), cos_q, sin_q)
    k = _ref_rope4d(_rms(k), cos_k, sin_k)
    s = jnp.einsum("bqhd,bkhd->bhqk", q.astype(BF16), k.astype(BF16),
                   preferred_element_type=jnp.float32) / np.sqrt(Dh)
    s = jnp.where(mask[None, None], s, NEG_INF)
    s = s - s.max(-1, keepdims=True)
    a = jnp.exp(s)
    a = a / a.sum(-1, keepdims=True)
    o = jnp.einsum("bhqk,bkhd->bqhd", a.astype(BF16), v.astype(BF16),
                   preferred_element_type=jnp.float32).reshape(B, Tq, C)
    return proj(o, p["wpT"])


def ref_forward(x, params, *, n_head, lf):
    B, T, C = x.shape
    Dh = C // n_head
    Tq = T * lf
    cos_q, sin_q = rope_tables(Tq, Dh)
    cos_k, sin_k = rope_tables(T, Dh)
    cross_mask = jnp.asarray(np.arange(T)[None, :] == (np.arange(Tq)[:, None] // lf))
    causal_q = jnp.asarray(np.tril(np.ones((Tq, Tq), bool)))
    causal_k = jnp.asarray(np.tril(np.ones((T, T), bool)))

    xd = jnp.full((B, Tq, C), 13.0, jnp.float32)
    nc = len(params["cross"])
    for i in range(nc - 1):
        xd = xd + _ref_attend(_rms(xd), _rms(x), params["cross"][i],
                              cos_q, sin_q, cos_k, sin_k, cross_mask, n_head)
        x = x + _ref_attend(_rms(x), _rms(x), params["token"][i],
                            cos_k, sin_k, cos_k, sin_k, causal_k, n_head)
        xd = xd + _ref_attend(_rms(xd), _rms(xd), params["digit"][i],
                              cos_q, sin_q, cos_q, sin_q, causal_q, n_head)
    xd = xd + _ref_attend(_rms(xd), _rms(x), params["cross"][-1],
                          cos_q, sin_q, cos_k, sin_k, cross_mask, n_head)
    return xd


# ----------------------------------- main --------------------------------------
if __name__ == "__main__":
    # Small config: n_embd=32, n_head=2 (head_dim=16), T=8 tokens,
    # length_factor=3 (-> 24 digit positions), n_layer_output=2, batch=4
    # (-> bb=2 batch elements per grid step, 2 'parallel' grid blocks).
    B, T, C = 4, 8, 32
    N_HEAD = 2
    LF = 3
    N_LAYER_OUTPUT = 2

    key = jax.random.PRNGKey(0)
    k_params, k_x = jax.random.split(key)
    params = init_params(k_params, C, N_LAYER_OUTPUT)
    x = jax.random.normal(k_x, (B, T, C), jnp.float32)

    fwd = jax.jit(functools.partial(tokens_to_digits_forward, n_head=N_HEAD, lf=LF))
    out = jax.block_until_ready(fwd(x, params))

    ref = jax.block_until_ready(ref_forward(x, params, n_head=N_HEAD, lf=LF))
    np.testing.assert_allclose(np.asarray(out), np.asarray(ref), rtol=1e-2, atol=1e-2)

    print("KERNEL_OK")
</pallas_src>

<mosaic_0001>
module attributes {stable_mosaic.version = 11 : i64} {
  func.func @_t2d_kernel(%arg0: i32, %arg1: memref<2x8x32xf32, #tpu.memory_space<vmem>>, %arg2: memref<48x16xbf16, #tpu.memory_space<vmem>>, %arg3: memref<16x16xf32, #tpu.memory_space<vmem>>, %arg4: memref<48x48xf32, #tpu.memory_space<vmem>>, %arg5: memref<2x32x32xbf16, #tpu.memory_space<vmem>>, %arg6: memref<2x32x32xbf16, #tpu.memory_space<vmem>>, %arg7: memref<1x32x96xbf16, #tpu.memory_space<vmem>>, %arg8: memref<1x32x32xbf16, #tpu.memory_space<vmem>>, %arg9: memref<1x32x96xbf16, #tpu.memory_space<vmem>>, %arg10: memref<1x32x32xbf16, #tpu.memory_space<vmem>>, %arg11: memref<16x8xf32, #tpu.memory_space<vmem>>, %arg12: memref<16x8xf32, #tpu.memory_space<vmem>>, %arg13: memref<48x8xf32, #tpu.memory_space<vmem>>, %arg14: memref<48x8xf32, #tpu.memory_space<vmem>>, %arg15: memref<2x24x32xf32, #tpu.memory_space<vmem>>) attributes {dimension_semantics = [#tpu.dimension_semantics<parallel>], iteration_bounds = array<i64: 2>, scalar_prefetch = 0 : i64, scratch_operands = 0 : i64, tpu.core_type = #tpu.core_type<tc>, window_params = [{transform_indices = @transform_0, window_bounds = array<i64: 2, 8, 32>}, {pipeline_mode = #tpu.pipeline_mode<synchronous>, transform_indices = @transform_1, window_bounds = array<i64: 48, 16>}, {pipeline_mode = #tpu.pipeline_mode<synchronous>, transform_indices = @transform_2, window_bounds = array<i64: 16, 16>}, {pipeline_mode = #tpu.pipeline_mode<synchronous>, transform_indices = @transform_3, window_bounds = array<i64: 48, 48>}, {pipeline_mode = #tpu.pipeline_mode<synchronous>, transform_indices = @transform_4, window_bounds = array<i64: 2, 32, 32>}, {pipeline_mode = #tpu.pipeline_mode<synchronous>, transform_indices = @transform_5, window_bounds = array<i64: 2, 32, 32>}, {pipeline_mode = #tpu.pipeline_mode<synchronous>, transform_indices = @transform_6, window_bounds = array<i64: 1, 32, 96>}, {pipeline_mode = #tpu.pipeline_mode<synchronous>, transform_indices = @transform_7, window_bounds = array<i64: 1, 32, 32>}, {pipeline_mode = #tpu.pipeline_mode<synchronous>, transform_indices = @transform_8, window_bounds = array<i64: 1, 32, 96>}, {pipeline_mode = #tpu.pipeline_mode<synchronous>, transform_indices = @transform_9, window_bounds = array<i64: 1, 32, 32>}, {pipeline_mode = #tpu.pipeline_mode<synchronous>, transform_indices = @transform_10, window_bounds = array<i64: 16, 8>}, {pipeline_mode = #tpu.pipeline_mode<synchronous>, transform_indices = @transform_11, window_bounds = array<i64: 16, 8>}, {pipeline_mode = #tpu.pipeline_mode<synchronous>, transform_indices = @transform_12, window_bounds = array<i64: 48, 8>}, {pipeline_mode = #tpu.pipeline_mode<synchronous>, transform_indices = @transform_13, window_bounds = array<i64: 48, 8>}, {transform_indices = @transform_14, window_bounds = array<i64: 2, 24, 32>}]} {
    %c0 = arith.constant 0 : index
    %c0_0 = arith.constant 0 : index
    %c0_1 = arith.constant 0 : index
    %0 = vector.load %arg1[%c0, %c0_0, %c0_1] : memref<2x8x32xf32, #tpu.memory_space<vmem>>, vector<2x8x32xf32>
    %1 = vector.shape_cast %0 : vector<2x8x32xf32> to vector<16x32xf32>
    %c0_2 = arith.constant 0 : index
    %c0_3 = arith.constant 0 : index
    %2 = vector.load %arg2[%c0_2, %c0_3] : memref<48x16xbf16, #tpu.memory_space<vmem>>, vector<48x16xbf16>
    %c0_4 = arith.constant 0 : index
    %c0_5 = arith.constant 0 : index
    %3 = vector.load %arg3[%c0_4, %c0_5] : memref<16x16xf32, #tpu.memory_space<vmem>>, vector<16x16xf32>
    %c0_6 = arith.constant 0 : index
    %c0_7 = arith.constant 0 : index
    %4 = vector.load %arg4[%c0_6, %c0_7] : memref<48x48xf32, #tpu.memory_space<vmem>>, vector<48x48xf32>
    %c0_8 = arith.constant 0 : index
    %c0_9 = arith.constant 0 : index
    %5 = vector.load %arg11[%c0_8, %c0_9] : memref<16x8xf32, #tpu.memory_space<vmem>>, vector<16x8xf32>
    %c0_10 = arith.constant 0 : index
    %c0_11 = arith.constant 0 : index
    %6 = vector.load %arg12[%c0_10, %c0_11] : memref<16x8xf32, #tpu.memory_space<vmem>>, vector<16x8xf32>
    %c0_12 = arith.constant 0 : index
    %c0_13 = arith.constant 0 : index
    %7 = vector.load %arg13[%c0_12, %c0_13] : memref<48x8xf32, #tpu.memory_space<vmem>>, vector<48x8xf32>
    %c0_14 = arith.constant 0 : index
    %c0_15 = arith.constant 0 : index
    %8 = vector.load %arg14[%c0_14, %c0_15] : memref<48x8xf32, #tpu.memory_space<vmem>>, vector<48x8xf32>
    %cst = arith.constant 1.300000e+01 : f32
    %9 = vector.broadcast %cst : f32 to vector<48x32xf32>
    %10 = arith.mulf %1, %1 : vector<16x32xf32>
    %cst_16 = arith.constant dense<0.000000e+00> : vector<16xf32>
    %11 = vector.multi_reduction <add>, %10, %cst_16 [1] : vector<16x32xf32> to vector<16xf32>
    %12 = vector.shape_cast %11 : vector<16xf32> to vector<16x1xf32>
    %cst_17 = arith.constant 3.200000e+01 : f32
    %13 = vector.broadcast %cst_17 : f32 to vector<16x1xf32>
    %14 = arith.divf %12, %13 : vector<16x1xf32>
    %cst_18 = arith.constant 1.1920929E-7 : f32
    %15 = vector.broadcast %cst_18 : f32 to vector<16x1xf32>
    %16 = arith.addf %14, %15 : vector<16x1xf32>
    %17 = math.rsqrt %16 : vector<16x1xf32>
    %18 = vector.broadcast %17 : vector<16x1xf32> to vector<16x32xf32>
    %19 = arith.mulf %1, %18 : vector<16x32xf32>
    %20 = arith.truncf %19 : vector<16x32xf32> to vector<16x32xbf16>
    %c0_19 = arith.constant 0 : index
    %c0_20 = arith.constant 0 : index
    %c0_21 = arith.constant 0 : index
    %21 = vector.load %arg5[%c0_19, %c0_20, %c0_21] : memref<2x32x32xbf16, #tpu.memory_space<vmem>>, vector<1x32x32xbf16>
    %22 = vector.shape_cast %21 : vector<1x32x32xbf16> to vector<32x32xbf16>
    %c0_22 = arith.constant 0 : index
    %c0_23 = arith.constant 0 : index
    %c0_24 = arith.constant 0 : index
    %23 = vector.load %arg6[%c0_22, %c0_23, %c0_24] : memref<2x32x32xbf16, #tpu.memory_space<vmem>>, vector<1x32x32xbf16>
    %24 = vector.shape_cast %23 : vector<1x32x32xbf16> to vector<32x32xbf16>
    %cst_25 = arith.constant dense<0.000000e+00> : vector<16x32xf32>
    %25 = tpu.matmul %20, %22, %cst_25 {dimension_numbers = #tpu.dot_dimension_numbers<[1], [0], [0], [1], [0, 0, 1, 1], [], []>} : vector<16x32xbf16>, vector<32x32xbf16>, vector<16x32xf32> -> vector<16x32xf32>
    %26 = arith.truncf %25 : vector<16x32xf32> to vector<16x32xbf16>
    %cst_26 = arith.constant dense<0.000000e+00> : vector<16x32xf32>
    %27 = tpu.matmul %26, %24, %cst_26 {dimension_numbers = #tpu.dot_dimension_numbers<[1], [0], [0], [1], [0, 0, 1, 1], [], []>} : vector<16x32xbf16>, vector<32x32xbf16>, vector<16x32xf32> -> vector<16x32xf32>
    %28 = arith.truncf %27 : vector<16x32xf32> to vector<16x32xbf16>
    %cst_27 = arith.constant dense<0.000000e+00> : vector<48x32xf32>
    %29 = tpu.matmul %2, %28, %cst_27 {dimension_numbers = #tpu.dot_dimension_numbers<[1], [0], [0], [1], [0, 0, 1, 1], [], []>} : vector<48x16xbf16>, vector<16x32xbf16>, vector<48x32xf32> -> vector<48x32xf32>
    %30 = arith.addf %9, %29 : vector<48x32xf32>
    %c0_28 = arith.constant 0 : index
    %c0_29 = arith.constant 0 : index
    %c0_30 = arith.constant 0 : index
    %31 = vector.load %arg7[%c0_28, %c0_29, %c0_30] : memref<1x32x96xbf16, #tpu.memory_space<vmem>>, vector<1x32x96xbf16>
    %32 = vector.shape_cast %31 : vector<1x32x96xbf16> to vector<32x96xbf16>
    %c0_31 = arith.constant 0 : index
    %c0_32 = arith.constant 0 : index
    %c0_33 = arith.constant 0 : index
    %33 = vector.load %arg8[%c0_31, %c0_32, %c0_33] : memref<1x32x32xbf16, #tpu.memory_space<vmem>>, vector<1x32x32xbf16>
    %34 = vector.shape_cast %33 : vector<1x32x32xbf16> to vector<32x32xbf16>
    %cst_34 = arith.constant dense<0.000000e+00> : vector<16x96xf32>
    %35 = tpu.matmul %20, %32, %cst_34 {dimension_numbers = #tpu.dot_dimension_numbers<[1], [0], [0], [1], [0, 0, 1, 1], [], []>} : vector<16x32xbf16>, vector<32x96xbf16>, vector<16x96xf32> -> vector<16x96xf32>
    %36 = vector.extract_strided_slice %35 {offsets = [0, 64], sizes = [16, 32], strides = [1, 1]} : vector<16x96xf32> to vector<16x32xf32>
    %37 = arith.truncf %36 : vector<16x32xf32> to vector<16x32xbf16>
    %38 = vector.extract_strided_slice %35 {offsets = [0, 0], sizes = [16, 16], strides = [1, 1]} : vector<16x96xf32> to vector<16x16xf32>
    %39 = arith.mulf %38, %38 : vector<16x16xf32>
    %cst_35 = arith.constant dense<0.000000e+00> : vector<16xf32>
    %40 = vector.multi_reduction <add>, %39, %cst_35 [1] : vector<16x16xf32> to vector<16xf32>
    %41 = vector.shape_cast %40 : vector<16xf32> to vector<16x1xf32>
    %cst_36 = arith.constant 1.600000e+01 : f32
    %42 = vector.broadcast %cst_36 : f32 to vector<16x1xf32>
    %43 = arith.divf %41, %42 : vector<16x1xf32>
    %cst_37 = arith.constant 1.1920929E-7 : f32
    %44 = vector.broadcast %cst_37 : f32 to vector<16x1xf32>
    %45 = arith.addf %43, %44 : vector<16x1xf32>
    %46 = math.rsqrt %45 : vector<16x1xf32>
    %47 = vector.broadcast %46 : vector<16x1xf32> to vector<16x16xf32>
    %48 = arith.mulf %38, %47 : vector<16x16xf32>
    %cst_38 = arith.constant 2.500000e-01 : f32
    %49 = vector.broadcast %cst_38 : f32 to vector<16x16xf32>
    %50 = arith.mulf %48, %49 : vector<16x16xf32>
    %51 = vector.extract_strided_slice %35 {offsets = [0, 32], sizes = [16, 16], strides = [1, 1]} : vector<16x96xf32> to vector<16x16xf32>
    %52 = arith.mulf %51, %51 : vector<16x16xf32>
    %cst_39 = arith.constant dense<0.000000e+00> : vector<16xf32>
    %53 = vector.multi_reduction <add>, %52, %cst_39 [1] : vector<16x16xf32> to vector<16xf32>
    %54 = vector.shape_cast %53 : vector<16xf32> to vector<16x1xf32>
    %cst_40 = arith.constant 1.600000e+01 : f32
    %55 = vector.broadcast %cst_40 : f32 to vector<16x1xf32>
    %56 = arith.divf %54, %55 : vector<16x1xf32>
    %cst_41 = arith.constant 1.1920929E-7 : f32
    %57 = vector.broadcast %cst_41 : f32 to vector<16x1xf32>
    %58 = arith.addf %56, %57 : vector<16x1xf32>
    %59 = math.rsqrt %58 : vector<16x1xf32>
    %60 = vector.broadcast %59 : vector<16x1xf32> to vector<16x16xf32>
    %61 = arith.mulf %51, %60 : vector<16x16xf32>
    %62 = vector.extract_strided_slice %50 {offsets = [0, 0], sizes = [16, 8], strides = [1, 1]} : vector<16x16xf32> to vector<16x8xf32>
    %63 = vector.extract_strided_slice %50 {offsets = [0, 8], sizes = [16, 8], strides = [1, 1]} : vector<16x16xf32> to vector<16x8xf32>
    %64 = vector.extract_strided_slice %61 {offsets = [0, 0], sizes = [16, 8], strides = [1, 1]} : vector<16x16xf32> to vector<16x8xf32>
    %65 = vector.extract_strided_slice %61 {offsets = [0, 8], sizes = [16, 8], strides = [1, 1]} : vector<16x16xf32> to vector<16x8xf32>
    %66 = arith.mulf %62, %5 : vector<16x8xf32>
    %67 = arith.mulf %63, %6 : vector<16x8xf32>
    %68 = arith.addf %66, %67 : vector<16x8xf32>
    %69 = arith.mulf %63, %5 : vector<16x8xf32>
    %70 = arith.mulf %62, %6 : vector<16x8xf32>
    %71 = arith.subf %69, %70 : vector<16x8xf32>
    %72 = tpu.concatenate %68, %71 in 1 : vector<16x8xf32>, vector<16x8xf32> -> vector<16x16xf32>
    %73 = arith.truncf %72 : vector<16x16xf32> to vector<16x16xbf16>
    %74 = arith.mulf %64, %5 : vector<16x8xf32>
    %75 = arith.mulf %65, %6 : vector<16x8xf32>
    %76 = arith.addf %74, %75 : vector<16x8xf32>
    %77 = arith.mulf %65, %5 : vector<16x8xf32>
    %78 = arith.mulf %64, %6 : vector<16x8xf32>
    %79 = arith.subf %77, %78 : vector<16x8xf32>
    %80 = tpu.concatenate %76, %79 in 1 : vector<16x8xf32>, vector<16x8xf32> -> vector<16x16xf32>
    %81 = arith.truncf %80 : vector<16x16xf32> to vector<16x16xbf16>
    %cst_42 = arith.constant dense<0.000000e+00> : vector<16x16xf32>
    %82 = tpu.matmul %73, %81, %cst_42 {dimension_numbers = #tpu.dot_dimension_numbers<[1], [1], [0], [0], [0, 0, 1, 0], [], []>} : vector<16x16xbf16>, vector<16x16xbf16>, vector<16x16xf32> -> vector<16x16xf32>
    %83 = arith.addf %82, %3 : vector<16x16xf32>
    %cst_43 = arith.constant dense<0xFF800000> : vector<16xf32>
    %84 = vector.multi_reduction <maximumf>, %83, %cst_43 [1] : vector<16x16xf32> to vector<16xf32>
    %85 = vector.shape_cast %84 : vector<16xf32> to vector<16x1xf32>
    %86 = vector.broadcast %85 : vector<16x1xf32> to vector<16x16xf32>
    %87 = arith.subf %83, %86 : vector<16x16xf32>
    %88 = math.exp %87 : vector<16x16xf32>
    %cst_44 = arith.constant dense<0.000000e+00> : vector<16xf32>
    %89 = vector.multi_reduction <add>, %88, %cst_44 [1] : vector<16x16xf32> to vector<16xf32>
    %90 = vector.shape_cast %89 : vector<16xf32> to vector<16x1xf32>
    %91 = tpu.reciprocal %90 {approx = true} : vector<16x1xf32> -> vector<16x1xf32>
    %92 = vector.broadcast %91 : vector<16x1xf32> to vector<16x16xf32>
    %93 = arith.mulf %88, %92 : vector<16x16xf32>
    %94 = arith.truncf %93 : vector<16x16xf32> to vector<16x16xbf16>
    %95 = vector.extract_strided_slice %37 {offsets = [0, 0], sizes = [16, 16], strides = [1, 1]} : vector<16x32xbf16> to vector<16x16xbf16>
    %cst_45 = arith.constant dense<0.000000e+00> : vector<16x16xf32>
    %96 = tpu.matmul %94, %95, %cst_45 {dimension_numbers = #tpu.dot_dimension_numbers<[1], [0], [0], [1], [0, 0, 1, 1], [], []>} : vector<16x16xbf16>, vector<16x16xbf16>, vector<16x16xf32> -> vector<16x16xf32>
    %97 = vector.extract_strided_slice %35 {offsets = [0, 16], sizes = [16, 16], strides = [1, 1]} : vector<16x96xf32> to vector<16x16xf32>
    %98 = arith.mulf %97, %97 : vector<16x16xf32>
    %cst_46 = arith.constant dense<0.000000e+00> : vector<16xf32>
    %99 = vector.multi_reduction <add>, %98, %cst_46 [1] : vector<16x16xf32> to vector<16xf32>
    %100 = vector.shape_cast %99 : vector<16xf32> to vector<16x1xf32>
    %cst_47 = arith.constant 1.600000e+01 : f32
    %101 = vector.broadcast %cst_47 : f32 to vector<16x1xf32>
    %102 = arith.divf %100, %101 : vector<16x1xf32>
    %cst_48 = arith.constant 1.1920929E-7 : f32
    %103 = vector.broadcast %cst_48 : f32 to vector<16x1xf32>
    %104 = arith.addf %102, %103 : vector<16x1xf32>
    %105 = math.rsqrt %104 : vector<16x1xf32>
    %106 = vector.broadcast %105 : vector<16x1xf32> to vector<16x16xf32>
    %107 = arith.mulf %97, %106 : vector<16x16xf32>
    %cst_49 = arith.constant 2.500000e-01 : f32
    %108 = vector.broadcast %cst_49 : f32 to vector<16x16xf32>
    %109 = arith.mulf %107, %108 : vector<16x16xf32>
    %110 = vector.extract_strided_slice %35 {offsets = [0, 48], sizes = [16, 16], strides = [1, 1]} : vector<16x96xf32> to vector<16x16xf32>
    %111 = arith.mulf %110, %110 : vector<16x16xf32>
    %cst_50 = arith.constant dense<0.000000e+00> : vector<16xf32>
    %112 = vector.multi_reduction <add>, %111, %cst_50 [1] : vector<16x16xf32> to vector<16xf32>
    %113 = vector.shape_cast %112 : vector<16xf32> to vector<16x1xf32>
    %cst_51 = arith.constant 1.600000e+01 : f32
    %114 = vector.broadcast %cst_51 : f32 to vector<16x1xf32>
    %115 = arith.divf %113, %114 : vector<16x1xf32>
    %cst_52 = arith.constant 1.1920929E-7 : f32
    %116 = vector.broadcast %cst_52 : f32 to vector<16x1xf32>
    %117 = arith.addf %115, %116 : vector<16x1xf32>
    %118 = math.rsqrt %117 : vector<16x1xf32>
    %119 = vector.broadcast %118 : vector<16x1xf32> to vector<16x16xf32>
    %120 = arith.mulf %110, %119 : vector<16x16xf32>
    %121 = vector.extract_strided_slice %109 {offsets = [0, 0], sizes = [16, 8], strides = [1, 1]} : vector<16x16xf32> to vector<16x8xf32>
    %122 = vector.extract_strided_slice %109 {offsets = [0, 8], sizes = [16, 8], strides = [1, 1]} : vector<16x16xf32> to vector<16x8xf32>
    %123 = vector.extract_strided_slice %120 {offsets = [0, 0], sizes = [16, 8], strides = [1, 1]} : vector<16x16xf32> to vector<16x8xf32>
    %124 = vector.extract_strided_slice %120 {offsets = [0, 8], sizes = [16, 8], strides = [1, 1]} : vector<16x16xf32> to vector<16x8xf32>
    %125 = arith.mulf %121, %5 : vector<16x8xf32>
    %126 = arith.mulf %122, %6 : vector<16x8xf32>
    %127 = arith.addf %125, %126 : vector<16x8xf32>
    %128 = arith.mulf %122, %5 : vector<16x8xf32>
    %129 = arith.mulf %121, %6 : vector<16x8xf32>
    %130 = arith.subf %128, %129 : vector<16x8xf32>
    %131 = tpu.concatenate %127, %130 in 1 : vector<16x8xf32>, vector<16x8xf32> -> vector<16x16xf32>
    %132 = arith.truncf %131 : vector<16x16xf32> to vector<16x16xbf16>
    %133 = arith.mulf %123, %5 : vector<16x8xf32>
    %134 = arith.mulf %124, %6 : vector<16x8xf32>
    %135 = arith.addf %133, %134 : vector<16x8xf32>
    %136 = arith.mulf %124, %5 : vector<16x8xf32>
    %137 = arith.mulf %123, %6 : vector<16x8xf32>
    %138 = arith.subf %136, %137 : vector<16x8xf32>
    %139 = tpu.concatenate %135, %138 in 1 : vector<16x8xf32>, vector<16x8xf32> -> vector<16x16xf32>
    %140 = arith.truncf %139 : vector<16x16xf32> to vector<16x16xbf16>
    %cst_53 = arith.constant dense<0.000000e+00> : vector<16x16xf32>
    %141 = tpu.matmul %132, %140, %cst_53 {dimension_numbers = #tpu.dot_dimension_numbers<[1], [1], [0], [0], [0, 0, 1, 0], [], []>} : vector<16x16xbf16>, vector<16x16xbf16>, vector<16x16xf32> -> vector<16x16xf32>
    %142 = arith.addf %141, %3 : vector<16x16xf32>
    %cst_54 = arith.constant dense<0xFF800000> : vector<16xf32>
    %143 = vector.multi_reduction <maximumf>, %142, %cst_54 [1] : vector<16x16xf32> to vector<16xf32>
    %144 = vector.shape_cast %143 : vector<16xf32> to vector<16x1xf32>
    %145 = vector.broadcast %144 : vector<16x1xf32> to vector<16x16xf32>
    %146 = arith.subf %142, %145 : vector<16x16xf32>
    %147 = math.exp %146 : vector<16x16xf32>
    %cst_55 = arith.constant dense<0.000000e+00> : vector<16xf32>
    %148 = vector.multi_reduction <add>, %147, %cst_55 [1] : vector<16x16xf32> to vector<16xf32>
    %149 = vector.shape_cast %148 : vector<16xf32> to vector<16x1xf32>
    %150 = tpu.reciprocal %149 {approx = true} : vector<16x1xf32> -> vector<16x1xf32>
    %151 = vector.broadcast %150 : vector<16x1xf32> to vector<16x16xf32>
    %152 = arith.mulf %147, %151 : vector<16x16xf32>
    %153 = arith.truncf %152 : vector<16x16xf32> to vector<16x16xbf16>
    %154 = vector.extract_strided_slice %37 {offsets = [0, 16], sizes = [16, 16], strides = [1, 1]} : vector<16x32xbf16> to vector<16x16xbf16>
    %cst_56 = arith.constant dense<0.000000e+00> : vector<16x16xf32>
    %155 = tpu.matmul %153, %154, %cst_56 {dimension_numbers = #tpu.dot_dimension_numbers<[1], [0], [0], [1], [0, 0, 1, 1], [], []>} : vector<16x16xbf16>, vector<16x16xbf16>, vector<16x16xf32> -> vector<16x16xf32>
    %156 = tpu.concatenate %96, %155 in 1 : vector<16x16xf32>, vector<16x16xf32> -> vector<16x32xf32>
    %157 = arith.truncf %156 : vector<16x32xf32> to vector<16x32xbf16>
    %cst_57 = arith.constant dense<0.000000e+00> : vector<16x32xf32>
    %158 = tpu.matmul %157, %34, %cst_57 {dimension_numbers = #tpu.dot_dimension_numbers<[1], [0], [0], [1], [0, 0, 1, 1], [], []>} : vector<16x32xbf16>, vector<32x32xbf16>, vector<16x32xf32> -> vector<16x32xf32>
    %159 = arith.addf %1, %158 : vector<16x32xf32>
    %160 = arith.mulf %30, %30 : vector<48x32xf32>
    %cst_58 = arith.constant dense<0.000000e+00> : vector<48xf32>
    %161 = vector.multi_reduction <add>, %160, %cst_58 [1] : vector<48x32xf32> to vector<48xf32>
    %162 = vector.shape_cast %161 : vector<48xf32> to vector<48x1xf32>
    %cst_59 = arith.constant 3.200000e+01 : f32
    %163 = vector.broadcast %cst_59 : f32 to vector<48x1xf32>
    %164 = arith.divf %162, %163 : vector<48x1xf32>
    %cst_60 = arith.constant 1.1920929E-7 : f32
    %165 = vector.broadcast %cst_60 : f32 to vector<48x1xf32>
    %166 = arith.addf %164, %165 : vector<48x1xf32>
    %167 = math.rsqrt %166 : vector<48x1xf32>
    %168 = vector.broadcast %167 : vector<48x1xf32> to vector<48x32xf32>
    %169 = arith.mulf %30, %168 : vector<48x32xf32>
    %170 = arith.truncf %169 : vector<48x32xf32> to vector<48x32xbf16>
    %c0_61 = arith.constant 0 : index
    %c0_62 = arith.constant 0 : index
    %c0_63 = arith.constant 0 : index
    %171 = vector.load %arg9[%c0_61, %c0_62, %c0_63] : memref<1x32x96xbf16, #tpu.memory_space<vmem>>, vector<1x32x96xbf16>
    %172 = vector.shape_cast %171 : vector<1x32x96xbf16> to vector<32x96xbf16>
    %c0_64 = arith.constant 0 : index
    %c0_65 = arith.constant 0 : index
    %c0_66 = arith.constant 0 : index
    %173 = vector.load %arg10[%c0_64, %c0_65, %c0_66] : memref<1x32x32xbf16, #tpu.memory_space<vmem>>, vector<1x32x32xbf16>
    %174 = vector.shape_cast %173 : vector<1x32x32xbf16> to vector<32x32xbf16>
    %cst_67 = arith.constant dense<0.000000e+00> : vector<48x96xf32>
    %175 = tpu.matmul %170, %172, %cst_67 {dimension_numbers = #tpu.dot_dimension_numbers<[1], [0], [0], [1], [0, 0, 1, 1], [], []>} : vector<48x32xbf16>, vector<32x96xbf16>, vector<48x96xf32> -> vector<48x96xf32>
    %176 = vector.extract_strided_slice %175 {offsets = [0, 64], sizes = [48, 32], strides = [1, 1]} : vector<48x96xf32> to vector<48x32xf32>
    %177 = arith.truncf %176 : vector<48x32xf32> to vector<48x32xbf16>
    %178 = vector.extract_strided_slice %175 {offsets = [0, 0], sizes = [48, 16], strides = [1, 1]} : vector<48x96xf32> to vector<48x16xf32>
    %179 = arith.mulf %178, %178 : vector<48x16xf32>
    %cst_68 = arith.constant dense<0.000000e+00> : vector<48xf32>
    %180 = vector.multi_reduction <add>, %179, %cst_68 [1] : vector<48x16xf32> to vector<48xf32>
    %181 = vector.shape_cast %180 : vector<48xf32> to vector<48x1xf32>
    %cst_69 = arith.constant 1.600000e+01 : f32
    %182 = vector.broadcast %cst_69 : f32 to vector<48x1xf32>
    %183 = arith.divf %181, %182 : vector<48x1xf32>
    %cst_70 = arith.constant 1.1920929E-7 : f32
    %184 = vector.broadcast %cst_70 : f32 to vector<48x1xf32>
    %185 = arith.addf %183, %184 : vector<48x1xf32>
    %186 = math.rsqrt %185 : vector<48x1xf32>
    %187 = vector.broadcast %186 : vector<48x1xf32> to vector<48x16xf32>
    %188 = arith.mulf %178, %187 : vector<48x16xf32>
    %cst_71 = arith.constant 2.500000e-01 : f32
    %189 = vector.broadcast %cst_71 : f32 to vector<48x16xf32>
    %190 = arith.mulf %188, %189 : vector<48x16xf32>
    %191 = vector.extract_strided_slice %175 {offsets = [0, 32], sizes = [48, 16], strides = [1, 1]} : vector<48x96xf32> to vector<48x16xf32>
    %192 = arith.mulf %191, %191 : vector<48x16xf32>
    %cst_72 = arith.constant dense<0.000000e+00> : vector<48xf32>
    %193 = vector.multi_reduction <add>, %192, %cst_72 [1] : vector<48x16xf32> to vector<48xf32>
    %194 = vector.shape_cast %193 : vector<48xf32> to vector<48x1xf32>
    %cst_73 = arith.constant 1.600000e+01 : f32
    %195 = vector.broadcast %cst_73 : f32 to vector<48x1xf32>
    %196 = arith.divf %194, %195 : vector<48x1xf32>
    %cst_74 = arith.constant 1.1920929E-7 : f32
    %197 = vector.broadcast %cst_74 : f32 to vector<48x1xf32>
    %198 = arith.addf %196, %197 : vector<48x1xf32>
    %199 = math.rsqrt %198 : vector<48x1xf32>
    %200 = vector.broadcast %199 : vector<48x1xf32> to vector<48x16xf32>
    %201 = arith.mulf %191, %200 : vector<48x16xf32>
    %202 = vector.extract_strided_slice %190 {offsets = [0, 0], sizes = [48, 8], strides = [1, 1]} : vector<48x16xf32> to vector<48x8xf32>
    %203 = vector.extract_strided_slice %190 {offsets = [0, 8], sizes = [48, 8], strides = [1, 1]} : vector<48x16xf32> to vector<48x8xf32>
    %204 = vector.extract_strided_slice %201 {offsets = [0, 0], sizes = [48, 8], strides = [1, 1]} : vector<48x16xf32> to vector<48x8xf32>
    %205 = vector.extract_strided_slice %201 {offsets = [0, 8], sizes = [48, 8], strides = [1, 1]} : vector<48x16xf32> to vector<48x8xf32>
    %206 = arith.mulf %202, %7 : vector<48x8xf32>
    %207 = arith.mulf %203, %8 : vector<48x8xf32>
    %208 = arith.addf %206, %207 : vector<48x8xf32>
    %209 = arith.mulf %203, %7 : vector<48x8xf32>
    %210 = arith.mulf %202, %8 : vector<48x8xf32>
    %211 = arith.subf %209, %210 : vector<48x8xf32>
    %212 = tpu.concatenate %208, %211 in 1 : vector<48x8xf32>, vector<48x8xf32> -> vector<48x16xf32>
    %213 = arith.truncf %212 : vector<48x16xf32> to vector<48x16xbf16>
    %214 = arith.mulf %204, %7 : vector<48x8xf32>
    %215 = arith.mulf %205, %8 : vector<48x8xf32>
    %216 = arith.addf %214, %215 : vector<48x8xf32>
    %217 = arith.mulf %205, %7 : vector<48x8xf32>
    %218 = arith.mulf %204, %8 : vector<48x8xf32>
    %219 = arith.subf %217, %218 : vector<48x8xf32>
    %220 = tpu.concatenate %216, %219 in 1 : vector<48x8xf32>, vector<48x8xf32> -> vector<48x16xf32>
    %221 = arith.truncf %220 : vector<48x16xf32> to vector<48x16xbf16>
    %cst_75 = arith.constant dense<0.000000e+00> : vector<48x48xf32>
    %222 = tpu.matmul %213, %221, %cst_75 {dimension_numbers = #tpu.dot_dimension_numbers<[1], [1], [0], [0], [0, 0, 1, 0], [], []>} : vector<48x16xbf16>, vector<48x16xbf16>, vector<48x48xf32> -> vector<48x48xf32>
    %223 = arith.addf %222, %4 : vector<48x48xf32>
    %cst_76 = arith.constant dense<0xFF800000> : vector<48xf32>
    %224 = vector.multi_reduction <maximumf>, %223, %cst_76 [1] : vector<48x48xf32> to vector<48xf32>
    %225 = vector.shape_cast %224 : vector<48xf32> to vector<48x1xf32>
    %226 = vector.broadcast %225 : vector<48x1xf32> to vector<48x48xf32>
    %227 = arith.subf %223, %226 : vector<48x48xf32>
    %228 = math.exp %227 : vector<48x48xf32>
    %cst_77 = arith.constant dense<0.000000e+00> : vector<48xf32>
    %229 = vector.multi_reduction <add>, %228, %cst_77 [1] : vector<48x48xf32> to vector<48xf32>
    %230 = vector.shape_cast %229 : vector<48xf32> to vector<48x1xf32>
    %231 = tpu.reciprocal %230 {approx = true} : vector<48x1xf32> -> vector<48x1xf32>
    %232 = vector.broadcast %231 : vector<48x1xf32> to vector<48x48xf32>
    %233 = arith.mulf %228, %232 : vector<48x48xf32>
    %234 = arith.truncf %233 : vector<48x48xf32> to vector<48x48xbf16>
    %235 = vector.extract_strided_slice %177 {offsets = [0, 0], sizes = [48, 16], strides = [1, 1]} : vector<48x32xbf16> to vector<48x16xbf16>
    %cst_78 = arith.constant dense<0.000000e+00> : vector<48x16xf32>
    %236 = tpu.matmul %234, %235, %cst_78 {dimension_numbers = #tpu.dot_dimension_numbers<[1], [0], [0], [1], [0, 0, 1, 1], [], []>} : vector<48x48xbf16>, vector<48x16xbf16>, vector<48x16xf32> -> vector<48x16xf32>
    %237 = vector.extract_strided_slice %175 {offsets = [0, 16], sizes = [48, 16], strides = [1, 1]} : vector<48x96xf32> to vector<48x16xf32>
    %238 = arith.mulf %237, %237 : vector<48x16xf32>
    %cst_79 = arith.constant dense<0.000000e+00> : vector<48xf32>
    %239 = vector.multi_reduction <add>, %238, %cst_79 [1] : vector<48x16xf32> to vector<48xf32>
    %240 = vector.shape_cast %239 : vector<48xf32> to vector<48x1xf32>
    %cst_80 = arith.constant 1.600000e+01 : f32
    %241 = vector.broadcast %cst_80 : f32 to vector<48x1xf32>
    %242 = arith.divf %240, %241 : vector<48x1xf32>
    %cst_81 = arith.constant 1.1920929E-7 : f32
    %243 = vector.broadcast %cst_81 : f32 to vector<48x1xf32>
    %244 = arith.addf %242, %243 : vector<48x1xf32>
    %245 = math.rsqrt %244 : vector<48x1xf32>
    %246 = vector.broadcast %245 : vector<48x1xf32> to vector<48x16xf32>
    %247 = arith.mulf %237, %246 : vector<48x16xf32>
    %cst_82 = arith.constant 2.500000e-01 : f32
    %248 = vector.broadcast %cst_82 : f32 to vector<48x16xf32>
    %249 = arith.mulf %247, %248 : vector<48x16xf32>
    %250 = vector.extract_strided_slice %175 {offsets = [0, 48], sizes = [48, 16], strides = [1, 1]} : vector<48x96xf32> to vector<48x16xf32>
    %251 = arith.mulf %250, %250 : vector<48x16xf32>
    %cst_83 = arith.constant dense<0.000000e+00> : vector<48xf32>
    %252 = vector.multi_reduction <add>, %251, %cst_83 [1] : vector<48x16xf32> to vector<48xf32>
    %253 = vector.shape_cast %252 : vector<48xf32> to vector<48x1xf32>
    %cst_84 = arith.constant 1.600000e+01 : f32
    %254 = vector.broadcast %cst_84 : f32 to vector<48x1xf32>
    %255 = arith.divf %253, %254 : vector<48x1xf32>
    %cst_85 = arith.constant 1.1920929E-7 : f32
    %256 = vector.broadcast %cst_85 : f32 to vector<48x1xf32>
    %257 = arith.addf %255, %256 : vector<48x1xf32>
    %258 = math.rsqrt %257 : vector<48x1xf32>
    %259 = vector.broadcast %258 : vector<48x1xf32> to vector<48x16xf32>
    %260 = arith.mulf %250, %259 : vector<48x16xf32>
    %261 = vector.extract_strided_slice %249 {offsets = [0, 0], sizes = [48, 8], strides = [1, 1]} : vector<48x16xf32> to vector<48x8xf32>
    %262 = vector.extract_strided_slice %249 {offsets = [0, 8], sizes = [48, 8], strides = [1, 1]} : vector<48x16xf32> to vector<48x8xf32>
    %263 = vector.extract_strided_slice %260 {offsets = [0, 0], sizes = [48, 8], strides = [1, 1]} : vector<48x16xf32> to vector<48x8xf32>
    %264 = vector.extract_strided_slice %260 {offsets = [0, 8], sizes = [48, 8], strides = [1, 1]} : vector<48x16xf32> to vector<48x8xf32>
    %265 = arith.mulf %261, %7 : vector<48x8xf32>
    %266 = arith.mulf %262, %8 : vector<48x8xf32>
    %267 = arith.addf %265, %266 : vector<48x8xf32>
    %268 = arith.mulf %262, %7 : vector<48x8xf32>
    %269 = arith.mulf %261, %8 : vector<48x8xf32>
    %270 = arith.subf %268, %269 : vector<48x8xf32>
    %271 = tpu.concatenate %267, %270 in 1 : vector<48x8xf32>, vector<48x8xf32> -> vector<48x16xf32>
    %272 = arith.truncf %271 : vector<48x16xf32> to vector<48x16xbf16>
    %273 = arith.mulf %263, %7 : vector<48x8xf32>
    %274 = arith.mulf %264, %8 : vector<48x8xf32>
    %275 = arith.addf %273, %274 : vector<48x8xf32>
    %276 = arith.mulf %264, %7 : vector<48x8xf32>
    %277 = arith.mulf %263, %8 : vector<48x8xf32>
    %278 = arith.subf %276, %277 : vector<48x8xf32>
    %279 = tpu.concatenate %275, %278 in 1 : vector<48x8xf32>, vector<48x8xf32> -> vector<48x16xf32>
    %280 = arith.truncf %279 : vector<48x16xf32> to vector<48x16xbf16>
    %cst_86 = arith.constant dense<0.000000e+00> : vector<48x48xf32>
    %281 = tpu.matmul %272, %280, %cst_86 {dimension_numbers = #tpu.dot_dimension_numbers<[1], [1], [0], [0], [0, 0, 1, 0], [], []>} : vector<48x16xbf16>, vector<48x16xbf16>, vector<48x48xf32> -> vector<48x48xf32>
    %282 = arith.addf %281, %4 : vector<48x48xf32>
    %cst_87 = arith.constant dense<0xFF800000> : vector<48xf32>
    %283 = vector.multi_reduction <maximumf>, %282, %cst_87 [1] : vector<48x48xf32> to vector<48xf32>
    %284 = vector.shape_cast %283 : vector<48xf32> to vector<48x1xf32>
    %285 = vector.broadcast %284 : vector<48x1xf32> to vector<48x48xf32>
    %286 = arith.subf %282, %285 : vector<48x48xf32>
    %287 = math.exp %286 : vector<48x48xf32>
    %cst_88 = arith.constant dense<0.000000e+00> : vector<48xf32>
    %288 = vector.multi_reduction <add>, %287, %cst_88 [1] : vector<48x48xf32> to vector<48xf32>
    %289 = vector.shape_cast %288 : vector<48xf32> to vector<48x1xf32>
    %290 = tpu.reciprocal %289 {approx = true} : vector<48x1xf32> -> vector<48x1xf32>
    %291 = vector.broadcast %290 : vector<48x1xf32> to vector<48x48xf32>
    %292 = arith.mulf %287, %291 : vector<48x48xf32>
    %293 = arith.truncf %292 : vector<48x48xf32> to vector<48x48xbf16>
    %294 = vector.extract_strided_slice %177 {offsets = [0, 16], sizes = [48, 16], strides = [1, 1]} : vector<48x32xbf16> to vector<48x16xbf16>
    %cst_89 = arith.constant dense<0.000000e+00> : vector<48x16xf32>
    %295 = tpu.matmul %293, %294, %cst_89 {dimension_numbers = #tpu.dot_dimension_numbers<[1], [0], [0], [1], [0, 0, 1, 1], [], []>} : vector<48x48xbf16>, vector<48x16xbf16>, vector<48x16xf32> -> vector<48x16xf32>
    %296 = tpu.concatenate %236, %295 in 1 : vector<48x16xf32>, vector<48x16xf32> -> vector<48x32xf32>
    %297 = arith.truncf %296 : vector<48x32xf32> to vector<48x32xbf16>
    %cst_90 = arith.constant dense<0.000000e+00> : vector<48x32xf32>
    %298 = tpu.matmul %297, %174, %cst_90 {dimension_numbers = #tpu.dot_dimension_numbers<[1], [0], [0], [1], [0, 0, 1, 1], [], []>} : vector<48x32xbf16>, vector<32x32xbf16>, vector<48x32xf32> -> vector<48x32xf32>
    %299 = arith.addf %30, %298 : vector<48x32xf32>
    %300 = arith.mulf %159, %159 : vector<16x32xf32>
    %cst_91 = arith.constant dense<0.000000e+00> : vector<16xf32>
    %301 = vector.multi_reduction <add>, %300, %cst_91 [1] : vector<16x32xf32> to vector<16xf32>
    %302 = vector.shape_cast %301 : vector<16xf32> to vector<16x1xf32>
    %cst_92 = arith.constant 3.200000e+01 : f32
    %303 = vector.broadcast %cst_92 : f32 to vector<16x1xf32>
    %304 = arith.divf %302, %303 : vector<16x1xf32>
    %cst_93 = arith.constant 1.1920929E-7 : f32
    %305 = vector.broadcast %cst_93 : f32 to vector<16x1xf32>
    %306 = arith.addf %304, %305 : vector<16x1xf32>
    %307 = math.rsqrt %306 : vector<16x1xf32>
    %308 = vector.broadcast %307 : vector<16x1xf32> to vector<16x32xf32>
    %309 = arith.mulf %159, %308 : vector<16x32xf32>
    %310 = arith.truncf %309 : vector<16x32xf32> to vector<16x32xbf16>
    %c1 = arith.constant 1 : index
    %c0_94 = arith.constant 0 : index
    %c0_95 = arith.constant 0 : index
    %311 = vector.load %arg5[%c1, %c0_94, %c0_95] : memref<2x32x32xbf16, #tpu.memory_space<vmem>>, vector<1x32x32xbf16>
    %312 = vector.shape_cast %311 : vector<1x32x32xbf16> to vector<32x32xbf16>
    %c1_96 = arith.constant 1 : index
    %c0_97 = arith.constant 0 : index
    %c0_98 = arith.constant 0 : index
    %313 = vector.load %arg6[%c1_96, %c0_97, %c0_98] : memref<2x32x32xbf16, #tpu.memory_space<vmem>>, vector<1x32x32xbf16>
    %314 = vector.shape_cast %313 : vector<1x32x32xbf16> to vector<32x32xbf16>
    %cst_99 = arith.constant dense<0.000000e+00> : vector<16x32xf32>
    %315 = tpu.matmul %310, %312, %cst_99 {dimension_numbers = #tpu.dot_dimension_numbers<[1], [0], [0], [1], [0, 0, 1, 1], [], []>} : vector<16x32xbf16>, vector<32x32xbf16>, vector<16x32xf32> -> vector<16x32xf32>
    %316 = arith.truncf %315 : vector<16x32xf32> to vector<16x32xbf16>
    %cst_100 = arith.constant dense<0.000000e+00> : vector<16x32xf32>
    %317 = tpu.matmul %316, %314, %cst_100 {dimension_numbers = #tpu.dot_dimension_numbers<[1], [0], [0], [1], [0, 0, 1, 1], [], []>} : vector<16x32xbf16>, vector<32x32xbf16>, vector<16x32xf32> -> vector<16x32xf32>
    %318 = arith.truncf %317 : vector<16x32xf32> to vector<16x32xbf16>
    %cst_101 = arith.constant dense<0.000000e+00> : vector<48x32xf32>
    %319 = tpu.matmul %2, %318, %cst_101 {dimension_numbers = #tpu.dot_dimension_numbers<[1], [0], [0], [1], [0, 0, 1, 1], [], []>} : vector<48x16xbf16>, vector<16x32xbf16>, vector<48x32xf32> -> vector<48x32xf32>
    %320 = arith.addf %299, %319 : vector<48x32xf32>
    %321 = vector.shape_cast %320 : vector<48x32xf32> to vector<2x24x32xf32>
    %c0_102 = arith.constant 0 : index
    %c0_103 = arith.constant 0 : index
    %c0_104 = arith.constant 0 : index
    %322 = vector.load %arg15[%c0_102, %c0_103, %c0_104] : memref<2x24x32xf32, #tpu.memory_space<vmem>>, vector<2x24x32xf32>
    tpu.vector_store %arg15[%c0_102, %c0_103, %c0_104], %321 {strides = array<i32>} : memref<2x24x32xf32, #tpu.memory_space<vmem>>, vector<2x24x32xf32>,
    return
  }
  func.func @transform_0(%arg0: i32) -> (i32, i32, i32) {
    %c0_i32 = arith.constant 0 : i32
    %c0_i32_0 = arith.constant 0 : i32
    %c0_i32_1 = arith.constant 0 : i32
    return %arg0, %c0_i32, %c0_i32_0 : i32, i32, i32
  }
  func.func @transform_1(%arg0: i32) -> (i32, i32) {
    %c0_i32 = arith.constant 0 : i32
    %c0_i32_0 = arith.constant 0 : i32
    %c0_i32_1 = arith.constant 0 : i32
    return %c0_i32, %c0_i32_0 : i32, i32
  }
  func.func @transform_2(%arg0: i32) -> (i32, i32) {
    %c0_i32 = arith.constant 0 : i32
    %c0_i32_0 = arith.constant 0 : i32
    %c0_i32_1 = arith.constant 0 : i32
    return %c0_i32, %c0_i32_0 : i32, i32
  }
  func.func @transform_3(%arg0: i32) -> (i32, i32) {
    %c0_i32 = arith.constant 0 : i32
    %c0_i32_0 = arith.constant 0 : i32
    %c0_i32_1 = arith.constant 0 : i32
    return %c0_i32, %c0_i32_0 : i32, i32
  }
  func.func @transform_4(%arg0: i32) -> (i32, i32, i32) {
    %c0_i32 = arith.constant 0 : i32
    %c0_i32_0 = arith.constant 0 : i32
    %c0_i32_1 = arith.constant 0 : i32
    %c0_i32_2 = arith.constant 0 : i32
    return %c0_i32, %c0_i32_0, %c0_i32_1 : i32, i32, i32
  }
  func.func @transform_5(%arg0: i32) -> (i32, i32, i32) {
    %c0_i32 = arith.constant 0 : i32
    %c0_i32_0 = arith.constant 0 : i32
    %c0_i32_1 = arith.constant 0 : i32
    %c0_i32_2 = arith.constant 0 : i32
    return %c0_i32, %c0_i32_0, %c0_i32_1 : i32, i32, i32
  }
  func.func @transform_6(%arg0: i32) -> (i32, i32, i32) {
    %c0_i32 = arith.constant 0 : i32
    %c0_i32_0 = arith.constant 0 : i32
    %c0_i32_1 = arith.constant 0 : i32
    %c0_i32_2 = arith.constant 0 : i32
    return %c0_i32, %c0_i32_0, %c0_i32_1 : i32, i32, i32
  }
  func.func @transform_7(%arg0: i32) -> (i32, i32, i32) {
    %c0_i32 = arith.constant 0 : i32
    %c0_i32_0 = arith.constant 0 : i32
    %c0_i32_1 = arith.constant 0 : i32
    %c0_i32_2 = arith.constant 0 : i32
    return %c0_i32, %c0_i32_0, %c0_i32_1 : i32, i32, i32
  }
  func.func @transform_8(%arg0: i32) -> (i32, i32, i32) {
    %c0_i32 = arith.constant 0 : i32
    %c0_i32_0 = arith.constant 0 : i32
    %c0_i32_1 = arith.constant 0 : i32
    %c0_i32_2 = arith.constant 0 : i32
    return %c0_i32, %c0_i32_0, %c0_i32_1 : i32, i32, i32
  }
  func.func @transform_9(%arg0: i32) -> (i32, i32, i32) {
    %c0_i32 = arith.constant 0 : i32
    %c0_i32_0 = arith.constant 0 : i32
    %c0_i32_1 = arith.constant 0 : i32
    %c0_i32_2 = arith.constant 0 : i32
    return %c0_i32, %c0_i32_0, %c0_i32_1 : i32, i32, i32
  }
  func.func @transform_10(%arg0: i32) -> (i32, i32) {
    %c0_i32 = arith.constant 0 : i32
    %c0_i32_0 = arith.constant 0 : i32
    %c0_i32_1 = arith.constant 0 : i32
    return %c0_i32, %c0_i32_0 : i32, i32
  }
  func.func @transform_11(%arg0: i32) -> (i32, i32) {
    %c0_i32 = arith.constant 0 : i32
    %c0_i32_0 = arith.constant 0 : i32
    %c0_i32_1 = arith.constant 0 : i32
    return %c0_i32, %c0_i32_0 : i32, i32
  }
  func.func @transform_12(%arg0: i32) -> (i32, i32) {
    %c0_i32 = arith.constant 0 : i32
    %c0_i32_0 = arith.constant 0 : i32
    %c0_i32_1 = arith.constant 0 : i32
    return %c0_i32, %c0_i32_0 : i32, i32
  }
  func.func @transform_13(%arg0: i32) -> (i32, i32) {
    %c0_i32 = arith.constant 0 : i32
    %c0_i32_0 = arith.constant 0 : i32
    %c0_i32_1 = arith.constant 0 : i32
    return %c0_i32, %c0_i32_0 : i32, i32
  }
  func.func @transform_14(%arg0: i32) -> (i32, i32, i32) {
    %c0_i32 = arith.constant 0 : i32
    %c0_i32_0 = arith.constant 0 : i32
    %c0_i32_1 = arith.constant 0 : i32
    return %arg0, %c0_i32, %c0_i32_0 : i32, i32, i32
  }
}

</mosaic_0001>

<bundles_post_ra>
// kernel: tokens_to_digits_forward.1
= control target key start
LH: loop header
LB: loop body
LE: loop exit
PB: predicated region body
PF: predicated region fallthrough
CT: control target
= control target key end

     0   :  { %s6092_s0 = inlined_call_operand.vmem [shape: f32[4,8,32], index: 0, kind: input, shape index: {}]   ;;  %s6093_s1 = inlined_call_operand.vmem [shape: bf16[48,16], index: 1, kind: input, shape index: {}]   ;;  %s6094_s2 = inlined_call_operand.vmem [shape: f32[16,16], index: 2, kind: input, shape index: {}]   ;;  %s6095_s3 = inlined_call_operand.vmem [shape: f32[48,48], index: 3, kind: input, shape index: {}]   ;;  %s6096_s4 = inlined_call_operand.vmem [shape: bf16[2,32,32], index: 4, kind: input, shape index: {}]   ;;  %s6097_s5 = inlined_call_operand.vmem [shape: bf16[2,32,32], index: 5, kind: input, shape index: {}]   ;;  %s6098_s6 = inlined_call_operand.vmem [shape: bf16[1,32,96], index: 6, kind: input, shape index: {}]   ;;  %s6099_s7 = inlined_call_operand.vmem [shape: bf16[1,32,32], index: 7, kind: input, shape index: {}]   ;;  %s6100_s8 = inlined_call_operand.vmem [shape: bf16[1,32,96], index: 8, kind: input, shape index: {}]   ;;  %s6101_s9 = inlined_call_operand.vmem [shape: bf16[1,32,32], index: 9, kind: input, shape index: {}]   ;;  %s6102_s10 = inlined_call_operand.vmem [shape: f32[16,8], index: 10, kind: input, shape index: {}]   ;;  %s6103_s11 = inlined_call_operand.vmem [shape: f32[16,8], index: 11, kind: input, shape index: {}]   ;;  %s6104_s12 = inlined_call_operand.vmem [shape: f32[48,8], index: 12, kind: input, shape index: {}]   ;;  %s6105_s13 = inlined_call_operand.vmem [shape: f32[48,8], index: 13, kind: input, shape index: {}]   ;;  %s6106_s14 = inlined_call_operand.hbm [shape: f32[4,24,32], index: 14, kind: output, shape index: {}]  }
   0x1   :  { %6148 = sst [smem:[#allocation67_spill]] %s6092_s0 }
   0x2   :  { %6149 = sst [smem:[#allocation68_spill]] %s6094_s2 }
   0x3   :  { %6150 = sst [smem:[#allocation69_spill]] %s6098_s6 }
   0x4   :  { %6151 = sst [smem:[#allocation70_spill]] %s6102_s10 }
   0x5   :  { %6152 = sst [smem:[#allocation71_spill]] %s6103_s11 }
   0x6   :  { %19 = vsyncpa [#allocation3], 0 }
   0x7   :  { %21 = vsyncpa [#allocation3 + $0x1], 0  ;;  %s4346_s29 = smov 0   ;;  %s4348_s30 = smov 0  }
   0x8   :  { %s4350_s15 = smov 0   ;;  %s4352_s16 = smov 0  }
   0x9 LB: > { %6153 = sst [smem:[#allocation5_spill]] %s4241_s29  ;;  %s4367_s17 = sadd.s32 4294967295, %s4253_s16   ;;  %s4253_s16 = sphi %s4352_s16, %s6294_s16   ;;  %s4249_s15 = sphi %s4350_s15, %s6296_s15   ;;  %s4245_s30 = sphi %s4348_s30, %s6298_s30   ;;  %s4241_s29 = sphi %s4346_s29, %s6297_s29  }
   0xa   : > { %6154 = sst [smem:[#allocation6_spill]] %s4249_s15  ;;  %s3447_s18 = sadd.s32 4294967294, %s4253_s16  }
   0xb   : > { %s4371_s19 = sadd.s32 1, %s4253_s16   ;;  %s333_s20 = sadd.s32 1, %s4249_s15 }
   0xc   : > { %6155 = sst [smem:[#allocation7_spill]] %s4371_s19  ;;  %s330_s21 = ssub.s32 %s4253_s16, %s4371_s19 }
   0xd   : > { %p343_p0 = scmp.ne.s32.totalorder %s4249_s15, %s4245_s30  ;;  %p331_p1 = scmp.eq.s32.totalorder %s330_s21, 0 }
   0xe   : > { %p344_p2 = scmp.eq.s32.totalorder %s4367_s17, 1  ;;  %p349_p3 = scmp.ne.s32.totalorder %s4245_s30, %s4241_s29 }
   0xf   : > { %p350_p4 = scmp.eq.s32.totalorder %s3447_s18, 1  ;;  %p3450_p7 = scmp.ge.s32.totalorder %s4253_s16, 1 }
  0x10   : > { %s4382_s22 = scalar_select %p331_p1, %s4249_s15, %s333_s20  }
  0x11   : > { %p4384_p5 = por %p344_p2, %p343_p0  ;;  %p4388_p6 = por %p350_p4, %p349_p3 }
  0x12   : > { %6156 = sst [smem:[#allocation8_spill]] %s4382_s22  ;;  %p416_p8 = scmp.lt.s32.totalorder %s4253_s16, 3 }
  0x13   : > { %s6158_s24 = scalar_select %p4388_p6, 1, 0 }
  0x14   : > { %p417_p9 = pnand %p3450_p7, %p416_p8 }
  0x15   : > { %6159 = sst [smem:[#allocation9_spill]] %s6158_s24 }
  0x16   : > { %420 = sbr.rel (%p417_p9) target bundleno = 4202 (0x106a), region = 76 }
  0x1d   : > { %s3451_s25 = sshll.u32 %s4367_s17, 1  ;;  %s6160_s0 = sld [smem:[#allocation67_spill]]  ;;  %vm504_vm0 = vcmask 261120   ;;  %v4007_v6 = vld [vmem:[%s6096_s4] sm:$0xff]   ;;  %v6134_v7 = vmov 0.0   ;;  %vm4256_vm1 = vmmov 0  }
  0x1e   : > { %p463_p10 = scmp.lt.s32.totalorder %s3451_s25, 3  ;;  %3587 = vmatprep.subr.bf16.mxu0 %v6134_v7  ;;  %3591 = vmatprep.mubr.msk.bf16.mxu0 %vm4256_vm1, %v6134_v7  ;;  %v4008_v8 = vld [vmem:[%s6096_s4 + $0x8] sm:$0xff]   ;;  %v4009_v9 = vld [vmem:[%s6097_s5] sm:$0xff]   ;;  %s6161_s11 = sld [smem:[#allocation71_spill]]  ;;  %vm658_vm2 = vcmask 130048   ;;  %v4012_v37 = vld [vmem:[%s6093_s1 + $0x10] sm:$0xff]  }
  0x1f   : > { %3588 = vmatpush3.bf16.msra.mxu0 %v4007_v6  ;;  %3595 = vmatprep.subr.bf16.mxu1 %v6134_v7  ;;  %v4010_v21 = vld [vmem:[%s6097_s5 + $0x8] sm:$0xff]   ;;  %s6107_s20 = smov 40   ;;  %s6162_s6 = sld [smem:[#allocation69_spill]]  ;;  %vm872_vm3 = vcmask 64512   ;;  %vm2124_vm4 = vcmask 392192  }
  0x20   : > { %s6300_s25 = smov (!%p463_p10, %s3451_s25), 3  ;;  %3589 = vmatprep.subr.bf16.mxu0 %v6134_v7  ;;  %3599 = vmatprep.mubr.msk.bf16.mxu1 %vm4256_vm1, %v6134_v7  ;;  %v4011_v34 = vld [vmem:[%s6093_s1 + $0x8] sm:$0xff]   ;;  %s6119_s27 = smov 48  }
  0x21   : > { %s3452_s26 = sshll.u32 %s6300_s25, 3  ;;  %3596 = vmatpush3.bf16.msra.mxu1 %v4009_v9  ;;  %s6109_s28 = smov 24  }
  0x22   : > { %3597 = vmatprep.subr.bf16.mxu1 %v6134_v7  ;;  %s6113_s21 = smov 80   ;;  %s6115_s25 = smov 96  }
  0x23   : > { %s4398_s18 = scalar_lea.vmem %s6160_s0, %s3452_s26  ;;  %3590 = vmatpush3.bf16.msra.mxu0 %v4008_v8  ;;  %s6123_s26 = smov 32  }
  0x24   : > { %v470_v0 = vld [vmem:[%s4398_s18] sm:$0xff]  ;;  %v471_v1 = vld [vmem:[%s4398_s18 + $0x8] sm:$0xff]  ;;  %3603 = vmatprep.subr.bf16.mxu0 %v6134_v7  ;;  %s6163_s10 = sld [smem:[#allocation70_spill]]  ;;  %s6169_s0 = smov 8  }
  0x25   : > { %v502_v2 = vmul.f32 %v470_v0, %v470_v0  ;;  %v503_v3 = vmul.f32 %v471_v1, %v471_v1  ;;  %3598 = vmatpush3.bf16.msra.mxu1 %v4010_v21  ;;  %v4435_v27 = vld [vmem:[%s6161_s11 + $0x8] sm:$0xff]  ;;  %v4440_v28 = vld [vmem:[%s6161_s11] sm:$0xff]  ;;  %s6174_s2 = sld [smem:[#allocation68_spill]]  ;;  %s4268_s19 = smov 64  }
  0x26   : > { %3791 = vmatprep.subr.bf16.mxu1 %v6134_v7  ;;  %886 = vrot.lane.b32.xlu1 %v4435_v27, %s6107_s20  ;;  %v4013_v35 = vld [vmem:[%s6162_s6] sm:$0xff]   ;;  %v4014_v36 = vld [vmem:[%s6162_s6 + $0x8] sm:$0xff]   ;;  %s6171_s6 = smov 80   ;;  %s6234_s24 = smov 120  }
  0x27   : > { %v505_v4 = vsel %vm504_vm0, %v502_v2, 0.0  ;;  %v508_v5 = vsel %vm504_vm0, %v503_v3, 0.0 }
  0x28   : > { %506 = vadd.xlane.f32.xlu0 %v505_v4 }
  0x2a   : > { %910 = vrot.lane.b32.xlu1 %v4440_v28, %s6123_s26 }
  0x2c   : > { %509 = vadd.xlane.f32.xlu0 %v508_v5 }
  0x42   : > { %884 = vrot.lane.b32.xlu0 %v4440_v28, %s6107_s20  ;;  %s6117_s20 = smov 56  }
  0x43   : > { %1186 = vrot.lane.b32.xlu1 %v4440_v28, %s6117_s20 }
  0x46   : > { %912 = vrot.lane.b32.xlu0 %v4435_v27, %s6123_s26 }
  0x47   : > { %1212 = vrot.lane.b32.xlu1 %v4440_v28, %s6119_s27 }
  0x4a   : > { %1188 = vrot.lane.b32.xlu0 %v4435_v27, %s6117_s20  ;;  %s6166_s20 = smov 56  }
  0x4b   : > { %1115 = vrot.lane.b32.xlu1 %v4440_v28, %s6109_s28 }
  0x4e   : > { %1214 = vrot.lane.b32.xlu0 %v4435_v27, %s6119_s27  ;;  %s6167_s27 = smov 16  }
  0x52   : > { %1117 = vrot.lane.b32.xlu0 %v4435_v27, %s6109_s28  ;;  %s6111_s28 = smov 112  }
  0x98   : > { %v4513_v53 = vpop.permute.xlu1 %886 }
  0x9c   : > { %v4517_v55 = vpop.permute.xlu1 %910 }
  0xb5   : > { %v507_v10 = vpop.xlane.xlu0 %506  ;;  %v4521_v57 = vpop.permute.xlu1 %1186 }
  0xb6   : > { %v512_v11 = vmul.f32 0.03125, %v507_v10 }
  0xb8   : > { %v514_v12 = vadd.f32 1.1920929e-07, %v512_v11 }
  0xb9   : > { %v510_v13 = vpop.xlane.xlu0 %509  ;;  %v4525_v59 = vpop.permute.xlu1 %1212 }
  0xba   : > { %v513_v14 = vmul.f32 0.03125, %v510_v13  ;;  %4026 = vrsqrt.f32 %v514_v12 }
  0xbc   : > { %v515_v15 = vadd.f32 1.1920929e-07, %v513_v14  ;;  %v4548_v14 = vld [vmem:[%s6163_s10] sm:$0xff] }
  0xbd   : > { %v4515_v54 = vpop.permute.xlu0 %884  ;;  %v4529_v61 = vpop.permute.xlu1 %1115 }
  0xbe   : > { %4028 = vrsqrt.f32 %v515_v15  ;;  %v4555_v15 = vld [vmem:[%s6163_s10 + $0x8] sm:$0xff]  ;;  %s6172_s10 = smov 112  }
  0xc1   : > { %v4519_v56 = vpop.permute.xlu0 %912 }
  0xc4   : > { %v4027_v16 = vpop.eup %4026 }
  0xc5   : > { %v518_v18 = vmul.f32 %v4027_v16, %v470_v0  ;;  %v4523_v58 = vpop.permute.xlu0 %1188 }
  0xc8   : > { %v4029_v17 = vpop.eup %4028 }
  0xc9   : > { %v519_v19 = vmul.f32 %v4029_v17, %v471_v1  ;;  %v4527_v60 = vpop.permute.xlu0 %1214 }
  0xcb   : > { %v520_v20 = vpack.c.bf16 %v519_v19, %v518_v18 }
  0xcd   : > { %3592 = vmatmul.mubr.msk.bf16.vlgmr.msra.gmra.mrb[0].mxu0 %vm504_vm0, %v520_v20  ;;  %v4531_v62 = vpop.permute.xlu0 %1117 }
  0xce   : > { %3605 = vmatprep.mubr.msk.bf16.mxu0 %vm4256_vm1, %v6134_v7 }
 0x1a0   : > { %v578_v22 = vpop.f32.mrb[0].mxu0 }
 0x1a1   : > { %v3593_v23 = vpop.f32.mrb[1].mxu0 }
 0x1a2   : > { %v581_v24 = vpop.f32.mrb[2].mxu0 }
 0x1a3   : > { %v585_v25 = vpack.c.bf16 %v581_v24, %v578_v22  ;;  %v3594_v26 = vpop.f32.mrb[3].mxu0 }
 0x1a5   : > { %3600 = vmatmul.mubr.msk.bf16.vlgmr.msra.gmra.mrb[0].mxu1 %vm504_vm0, %v585_v25 }
 0x1a6   : > { %3609 = vmatprep.mubr.msk.bf16.mxu1 %vm4256_vm1, %v6134_v7 }
 0x278   : > { %v635_v29 = vpop.f32.mrb[0].mxu1 }
 0x279   : > { %v3601_v30 = vpop.f32.mrb[1].mxu1 }
 0x27a   : > { %v638_v31 = vpop.f32.mrb[2].mxu1 }
 0x27b   : > { %v642_v32 = vpack.c.bf16 %v638_v31, %v635_v29  ;;  %v3602_v33 = vpop.f32.mrb[3].mxu1 }
 0x27d   : > { %3604 = vmatpush3.bf16.msra.mxu0 %v642_v32  ;;  %3792 = vmatpush3.bf16.msra.mxu1 %v642_v32 }
 0x27e   : > { %3617 = vmatprep.subr.bf16.mxu1 %v6134_v7  ;;  %3637 = vmatprep.subr.bf16.mxu0 %v6134_v7 }
 0x280   : > { %3610 = vmatmul.mubr.msk.bf16.vlgmr.msra.gmra.mrb[4].mxu1 %vm658_vm2, %v4011_v34 }
 0x281   : > { %3613 = vmatprep.mubr.msk.bf16.mxu1 %vm4256_vm1, %v6134_v7  ;;  %3618 = vmatpush3.bf16.msra.mxu1 %v4013_v35 }
 0x282   : > { %3619 = vmatprep.subr.bf16.mxu1 %v6134_v7 }
 0x285   : > { %3620 = vmatpush3.bf16.msra.mxu1 %v4014_v36 }
 0x286   : > { %3625 = vmatprep.subr.bf16.mxu1 %v6134_v7 }
 0x288   : > { %3614 = vmatmul.mubr.msk.bf16.gmra.mrb[8].mxu1 %vm658_vm2, %v4012_v37 }
 0x289   : > { %3621 = vmatprep.mubr.msk.bf16.mxu1 %vm4256_vm1, %v6134_v7 }
 0x290   : > { %3622 = vmatmul.mubr.msk.bf16.vlgmr.msra.gmra.mrb[12].mxu1 %vm504_vm0, %v520_v20 }
 0x291   : > { %3627 = vmatprep.mubr.msk.bf16.mxu1 %vm4256_vm1, %v6134_v7 }
 0x353   : > { %v4487_v38 = vpop.f32.mrb[4].mxu1 }
 0x354   : > { %v3611_v39 = vpop.f32.mrb[5].mxu1 }
 0x355   : > { %v4489_v40 = vpop.f32.mrb[6].mxu1 }
 0x356   : > { %v3612_v41 = vpop.f32.mrb[7].mxu1 }
 0x35b   : > { %v4491_v42 = vpop.f32.mrb[8].mxu1 }
 0x35c   : > { %v3615_v43 = vpop.f32.mrb[9].mxu1 }
 0x35d   : > { %v4493_v44 = vpop.f32.mrb[10].mxu1 }
 0x35e   : > { %v3616_v45 = vpop.f32.mrb[11].mxu1 }
 0x363   : > { %v4495_v46 = vpop.f32.mrb[12].mxu1 }
 0x364   : > { %v3623_v47 = vpop.f32.mrb[13].mxu1  ;;  %v787_v48 = vmul.f32 %v4495_v46, %v4495_v46 }
 0x365   : > { %v4499_v49 = vpop.f32.mrb[14].mxu1 }
 0x366   : > { %1087 = vrot.lane.b32.xlu0 %v787_v48, %s6113_s21  ;;  %808 = vrot.lane.b32.xlu1 %v787_v48, %s6115_s25  ;;  %v3624_v50 = vpop.f32.mrb[15].mxu1  ;;  %v4505_v51 = vpack.c.bf16 %v4499_v49, %v4495_v46  ;;  %v788_v52 = vmul.f32 %v4499_v49, %v4499_v49  ;;  %v789_v13 = vsel %vm658_vm2, %v787_v48, 0.0 }
 0x368   : > { %v792_v12 = vsel %vm658_vm2, %v788_v52, 0.0 }
 0x36a   : > { %1065 = vrot.lane.b32.xlu1 %v787_v48, %s6111_s28 }
 0x36e   : > { %810 = vrot.lane.b32.xlu1 %v788_v52, %s6115_s25  ;;  %s6165_s25 = smov 48  }
 0x372   : > { %1089 = vrot.lane.b32.xlu1 %v788_v52, %s6113_s21  ;;  %s6125_s21 = smov 8  }
 0x376   : > { %1067 = vrot.lane.b32.xlu1 %v788_v52, %s6111_s28  ;;  %s6121_s28 = smov 16  }
 0x3d8   : > { %v809_v63 = vpop.permute.xlu1 %808  ;;  %v1088_v1 = vpop.permute.xlu0 %1087 }
 0x3d9   : > { %v814_v0 = vsel %vm658_vm2, %v809_v63, 0.0  ;;  %v1093_v4 = vsel %vm658_vm2, %v1088_v1, 0.0 }
 0x3da   : > { %815 = vadd.xlane.f32.xlu1 %v814_v0 }
 0x3dc   : > { %v1066_v2 = vpop.permute.xlu1 %1065 }
 0x3dd   : > { %v1071_v3 = vsel %vm658_vm2, %v1066_v2, 0.0 }
 0x3de   : > { %1072 = vadd.xlane.f32.xlu0 %v1071_v3  ;;  %1094 = vadd.xlane.f32.xlu1 %v1093_v4 }
 0x3e0   : > { %v811_v5 = vpop.permute.xlu1 %810 }
 0x3e1   : > { %v817_v6 = vsel %vm658_vm2, %v811_v5, 0.0 }
 0x3e2   : > { %818 = vadd.xlane.f32.xlu0 %v817_v6 }
 0x3e4   : > { %v1090_v8 = vpop.permute.xlu1 %1089 }
 0x3e5   : > { %v1096_v9 = vsel %vm658_vm2, %v1090_v8, 0.0 }
 0x3e6   : > { %1097 = vadd.xlane.f32.xlu1 %v1096_v9 }
 0x3e8   : > { %v1068_v10 = vpop.permute.xlu1 %1067 }
 0x3e9   : > { %v1074_v11 = vsel %vm658_vm2, %v1068_v10, 0.0 }
 0x3ea   : > { %1075 = vadd.xlane.f32.xlu1 %v1074_v11 }
 0x3f8   : > { %1143 = vrot.lane.b32.xlu0 %v4435_v27, %s6121_s28 }
 0x3fb   : > { %1141 = vrot.lane.b32.xlu1 %v4440_v28, %s6121_s28  ;;  %s6164_s28 = smov 40  }
 0x417   : > { %793 = vadd.xlane.f32.xlu0 %v792_v12 }
 0x41f   : > { %790 = vadd.xlane.f32.xlu1 %v789_v13 }
 0x42d   : > { %876 = vrot.lane.b32.xlu0 %v4548_v14, %s6123_s26 }
 0x430   : > { %878 = vrot.lane.b32.xlu1 %v4555_v15, %s6123_s26  ;;  %s6168_s26 = smov 24  }
 0x431   : > { %904 = vrot.lane.b32.xlu0 %v4555_v15, %s6164_s28 }
 0x434   : > { %902 = vrot.lane.b32.xlu1 %v4548_v14, %s6164_s28 }
 0x435   : > { %834 = vrot.lane.b32.xlu0 %v4435_v27, %s6125_s21 }
 0x438   : > { %832 = vrot.lane.b32.xlu1 %v4440_v28, %s6125_s21  ;;  %s6127_s21 = smov 120  }
 0x439   : > { %1180 = vrot.lane.b32.xlu0 %v4555_v15, %s6165_s25 }
 0x43c   : > { %1178 = vrot.lane.b32.xlu1 %v4548_v14, %s6165_s25 }
 0x43d   : > { %1206 = vrot.lane.b32.xlu0 %v4555_v15, %s6166_s20 }
 0x440   : > { %1204 = vrot.lane.b32.xlu1 %v4548_v14, %s6166_s20 }
 0x441   : > { %1109 = vrot.lane.b32.xlu0 %v4555_v15, %s6167_s27 }
 0x444   : > { %1107 = vrot.lane.b32.xlu1 %v4548_v14, %s6167_s27 }
 0x445   : > { %1135 = vrot.lane.b32.xlu0 %v4555_v15, %s6168_s26 }
 0x448   : > { %1133 = vrot.lane.b32.xlu1 %v4548_v14, %s6168_s26 }
 0x467   : > { %v816_v16 = vpop.xlane.xlu1 %815 }
 0x468   : > { %v820_v17 = vmul.f32 0.0625, %v816_v16 }
 0x46a   : > { %v822_v18 = vadd.f32 1.1920929e-07, %v820_v17 }
 0x46b   : > { %v1095_v19 = vpop.xlane.xlu1 %1094  ;;  %v1073_v20 = vpop.xlane.xlu0 %1072 }
 0x46c   : > { %4030 = vrsqrt.f32 %v822_v18  ;;  %v1099_v21 = vmul.f32 0.0625, %v1095_v19  ;;  %v1077_v22 = vmul.f32 0.0625, %v1073_v20 }
 0x46e   : > { %v1101_v23 = vadd.f32 1.1920929e-07, %v1099_v21  ;;  %v1079_v24 = vadd.f32 1.1920929e-07, %v1077_v22 }
 0x46f   : > { %v819_v25 = vpop.xlane.xlu0 %818 }
 0x470   : > { %4032 = vrsqrt.f32 %v1101_v23  ;;  %v821_v26 = vmul.f32 0.0625, %v819_v25 }
 0x471   : > { %4034 = vrsqrt.f32 %v1079_v24 }
 0x472   : > { %v823_v29 = vadd.f32 1.1920929e-07, %v821_v26 }
 0x473   : > { %v1098_v30 = vpop.xlane.xlu1 %1097 }
 0x474   : > { %4036 = vrsqrt.f32 %v823_v29  ;;  %v1100_v31 = vmul.f32 0.0625, %v1098_v30 }
 0x476   : > { %v4031_v32 = vpop.eup %4030  ;;  %v1102_v33 = vadd.f32 1.1920929e-07, %v1100_v31 }
 0x477   : > { %v1076_v34 = vpop.xlane.xlu1 %1075  ;;  %v4584_v35 = vmul.f32 %v4031_v32, %v4495_v46 }
 0x478   : > { %4038 = vrsqrt.f32 %v1102_v33  ;;  %v1078_v36 = vmul.f32 0.0625, %v1076_v34 }
 0x479   : > { %v890_v37 = vmul.f32 %v4515_v54, %v4584_v35  ;;  %v916_v45 = vmul.f32 %v4517_v55, %v4584_v35 }
 0x47a   : > { %v4033_v39 = vpop.eup %4032  ;;  %v1080_v41 = vadd.f32 1.1920929e-07, %v1078_v36 }
 0x47b   : > { %894 = vrot.lane.b32.xlu1 %v890_v37, %s6127_s21  ;;  %v4035_v43 = vpop.eup %4034  ;;  %v4592_v47 = vmul.f32 %v4033_v39, %v4495_v46 }
 0x47c   : > { %4040 = vrsqrt.f32 %v1080_v41  ;;  %v1083_v52 = vmul.f32 %v4035_v43, %v4495_v46 }
 0x47d   : > { %v1192_v54 = vmul.f32 %v4521_v57, %v4592_v47  ;;  %v1218_v1 = vmul.f32 %v4525_v59, %v4592_v47  ;;  %v1142_v59 = vpop.permute.xlu1 %1141 }
 0x47e   : > { %v4037_v48 = vpop.eup %4036  ;;  %v4605_v55 = vmul.f32 0.25, %v1083_v52 }
 0x47f   : > { %920 = vrot.lane.b32.xlu1 %v916_v45, %s6169_s0  ;;  %v4596_v50 = vmul.f32 %v4037_v48, %v4499_v49 }
 0x480   : > { %v1121_v4 = vmul.f32 %v4529_v61, %v4605_v55 }
 0x481   : > { %v891_v63 = vmul.f32 %v4513_v53, %v4596_v50  ;;  %v917_v2 = vmul.f32 %v4519_v56, %v4596_v50  ;;  %v1147_v56 = vmul.f32 %v1142_v59, %v4605_v55 }
 0x482   : > { %v4039_v0 = vpop.eup %4038 }
 0x483   : > { %1196 = vrot.lane.b32.xlu1 %v1192_v54, %s6127_s21  ;;  %896 = vrot.lane.b32.xlu0 %v891_v63, %s6127_s21  ;;  %v4612_v3 = vmul.f32 %v4039_v0, %v4499_v49 }
 0x485   : > { %v1193_v5 = vmul.f32 %v4523_v58, %v4612_v3  ;;  %v1219_v8 = vmul.f32 %v4527_v60, %v4612_v3  ;;  %v1144_v58 = vpop.permute.xlu0 %1143 }
 0x486   : > { %v4041_v57 = vpop.eup %4040 }
 0x487   : > { %1222 = vrot.lane.b32.xlu1 %v1218_v1, %s6169_s0  ;;  %922 = vrot.lane.b32.xlu0 %v917_v2, %s6169_s0  ;;  %v1084_v53 = vmul.f32 %v4041_v57, %v4499_v49 }
 0x489   : > { %v4624_v6 = vmul.f32 0.25, %v1084_v53 }
 0x48b   : > { %1125 = vrot.lane.b32.xlu1 %v1121_v4, %s6127_s21  ;;  %1198 = vrot.lane.b32.xlu0 %v1193_v5, %s6127_s21  ;;  %v1122_v61 = vmul.f32 %v4531_v62, %v4624_v6  ;;  %v1148_v9 = vmul.f32 %v1144_v58, %v4624_v6 }
 0x48f   : > { %1151 = vrot.lane.b32.xlu1 %v1147_v56, %s6169_s0  ;;  %1224 = vrot.lane.b32.xlu0 %v1219_v8, %s6169_s0 }
 0x493   : > { %852 = vrot.lane.b32.xlu1 %v4548_v14, %s6169_s0  ;;  %1127 = vrot.lane.b32.xlu0 %v1122_v61, %s6127_s21 }
 0x497   : > { %1153 = vrot.lane.b32.xlu0 %v1148_v9, %s6169_s0 }
 0x49b   : > { %854 = vrot.lane.b32.xlu0 %v4555_v15, %s6169_s0 }
 0x4a4   : > { %v794_v60 = vpop.xlane.xlu0 %793 }
 0x4a5   : > { %v797_v10 = vmul.f32 0.0625, %v794_v60 }
 0x4a7   : > { %v799_v11 = vadd.f32 1.1920929e-07, %v797_v10 }
 0x4a8   : > { %v877_v12 = vpop.permute.xlu0 %876 }
 0x4a9   : > { %4042 = vrsqrt.f32 %v799_v11  ;;  %v882_v48 = vmul.f32 %v877_v12, %v4584_v35 }
 0x4ac   : > { %v791_v13 = vpop.xlane.xlu1 %790  ;;  %v905_v17 = vpop.permute.xlu0 %904 }
 0x4ad   : > { %v796_v62 = vmul.f32 0.0625, %v791_v13  ;;  %v909_v1 = vmul.f32 %v905_v17, %v4596_v50 }
 0x4af   : > { %v798_v16 = vadd.f32 1.1920929e-07, %v796_v62 }
 0x4b0   : > { %v879_v19 = vpop.permute.xlu1 %878  ;;  %v835_v22 = vpop.permute.xlu0 %834 }
 0x4b1   : > { %4044 = vrsqrt.f32 %v798_v16 }
 0x4b3   : > { %v4043_v18 = vpop.eup %4042 }
 0x4b4   : > { %v803_v20 = vmul.f32 %v4043_v18, %v4499_v49  ;;  %v903_v24 = vpop.permute.xlu1 %902  ;;  %v1181_v33 = vpop.permute.xlu0 %1180 }
 0x4b5   : > { %v908_v2 = vmul.f32 %v903_v24, %v4584_v35  ;;  %v1185_v56 = vmul.f32 %v1181_v33, %v4612_v3  ;;  %v4015_v35 = vld [vmem:[%s6093_s1] sm:$0xff]  }
 0x4b6   : > { %v4640_v21 = vmul.f32 0.25, %v803_v20  ;;  %3606 = vmatmul.mubr.msk.bf16.vlgmr.msra.gmra.mrb[4].mxu0 %vm658_vm2, %v4015_v35 }
 0x4b7   : > { %3639 = vmatprep.mubr.msk.bf16.mxu0 %vm4256_vm1, %v6134_v7 }
 0x4b8   : > { %v839_v23 = vmul.f32 %v835_v22, %v4640_v21  ;;  %v833_v30 = vpop.permute.xlu1 %832  ;;  %v1207_v36 = vpop.permute.xlu0 %1206 }
 0x4b9   : > { %v1211_v10 = vmul.f32 %v1207_v36, %v4612_v3 }
 0x4ba   : > { %844 = vrot.lane.b32.xlu0 %v839_v23, %s6127_s21 }
 0x4bb   : > { %v4045_v25 = vpop.eup %4044 }
 0x4bc   : > { %v802_v26 = vmul.f32 %v4045_v25, %v4495_v46  ;;  %v1179_v32 = vpop.permute.xlu1 %1178  ;;  %v1110_v39 = vpop.permute.xlu0 %1109  ;;  %v883_v46 = vmul.f32 %v879_v19, %v4596_v50 }
 0x4bd   : > { %v1184_v8 = vmul.f32 %v1179_v32, %v4592_v47  ;;  %v1114_v18 = vmul.f32 %v1110_v39, %v4624_v6 }
 0x4be   : > { %v4645_v29 = vmul.f32 0.25, %v802_v26 }
 0x4c0   : > { %v838_v31 = vmul.f32 %v833_v30, %v4645_v29  ;;  %v1205_v49 = vpop.permute.xlu1 %1204  ;;  %v1136_v43 = vpop.permute.xlu0 %1135  ;;  %v860_v58 = vmul.f32 %v4645_v29, %v4440_v28  ;;  %v861_v28 = vmul.f32 %v4640_v21, %v4435_v27 }
 0x4c1   : > { %v1210_v11 = vmul.f32 %v1205_v49, %v4592_v47  ;;  %v1140_v23 = vmul.f32 %v1136_v43, %v4624_v6 }
 0x4c2   : > { %842 = vrot.lane.b32.xlu1 %v838_v31, %s6127_s21  ;;  %s6170_s21 = smov 96  }
 0x4c4   : > { %v1108_v34 = vpop.permute.xlu1 %1107 }
 0x4c5   : > { %v1113_v3 = vmul.f32 %v1108_v34, %v4605_v55 }
 0x4c8   : > { %v1134_v37 = vpop.permute.xlu1 %1133 }
 0x4c9   : > { %v1139_v24 = vmul.f32 %v1134_v37, %v4605_v55 }
 0x4ed   : > { %v895_v41 = vpop.permute.xlu1 %894 }
 0x4ee   : > { %v900_v63 = vadd.f32 %v895_v41, %v882_v48 }
 0x4f1   : > { %v921_v45 = vpop.permute.xlu1 %920 }
 0x4f2   : > { %v926_v4 = vsub.f32 %v908_v2, %v921_v45 }
 0x4f5   : > { %v1197_v52 = vpop.permute.xlu1 %1196  ;;  %v897_v54 = vpop.permute.xlu0 %896 }
 0x4f6   : > { %v901_v0 = vadd.f32 %v897_v54, %v883_v46  ;;  %v1202_v50 = vadd.f32 %v1197_v52, %v1184_v8 }
 0x4f8   : > { %v3867_v57 = vpack.i.bf16 %v901_v0, %v900_v63 }
 0x4f9   : > { %v923_v53 = vpop.permute.xlu0 %922  ;;  %v1223_v59 = vpop.permute.xlu1 %1222 }
 0x4fa   : > { %v927_v5 = vsub.f32 %v909_v1, %v923_v53  ;;  %3868 = vrot.lane.b32.xlu1 %v3867_v57, %s6170_s21  ;;  %v1228_v16 = vsub.f32 %v1210_v11, %v1223_v59  ;;  %v829_v1 = vmul.f32 %v4640_v21, %v4555_v15  ;;  %v828_v53 = vmul.f32 %v4645_v29, %v4548_v14 }
 0x4fc   : > { %v3872_v61 = vpack.i.bf16 %v927_v5, %v926_v4 }
 0x4fd   : > { %v1199_v9 = vpop.permute.xlu0 %1198  ;;  %v1126_v13 = vpop.permute.xlu1 %1125 }
 0x4fe   : > { %v1203_v60 = vadd.f32 %v1199_v9, %v1185_v56  ;;  %864 = vrot.lane.b32.xlu1 %v860_v58, %s6169_s0  ;;  %3873 = vrot.lane.b32.xlu0 %v3872_v61, %s6170_s21  ;;  %v1131_v20 = vadd.f32 %v1126_v13, %v1113_v3 }
 0x500   : > { %v3877_v12 = vpack.i.bf16 %v1203_v60, %v1202_v50 }
 0x501   : > { %v1225_v62 = vpop.permute.xlu0 %1224  ;;  %v1152_v27 = vpop.permute.xlu1 %1151 }
 0x502   : > { %v1229_v17 = vsub.f32 %v1211_v10, %v1225_v62  ;;  %866 = vrot.lane.b32.xlu0 %v861_v28, %s6169_s0  ;;  %3878 = vrot.lane.b32.xlu1 %v3877_v12, %s6171_s6  ;;  %v1157_v30 = vsub.f32 %v1139_v24, %v1152_v27 }
 0x504   : > { %v3882_v47 = vpack.i.bf16 %v1229_v17, %v1228_v16 }
 0x505   : > { %v1128_v19 = vpop.permute.xlu0 %1127  ;;  %v853_v49 = vpop.permute.xlu1 %852 }
 0x506   : > { %v1132_v22 = vadd.f32 %v1128_v19, %v1114_v18  ;;  %3883 = vrot.lane.b32.xlu0 %v3882_v47, %s6171_s6  ;;  %v858_v0 = vmul.f32 %v853_v49, %v4645_v29  ;;  %v4714_v49 = vadd.f32 13.0, %v4489_v40 }
 0x508   : > { %v3887_v25 = vpack.i.bf16 %v1132_v22, %v1131_v20  ;;  %6175 = vst [vmem:[#allocation11_spill] sm:$0xff] %v4714_v49 }
 0x509   : > { %v1154_v26 = vpop.permute.xlu0 %1153 }
 0x50a   : > { %v1158_v31 = vsub.f32 %v1140_v23, %v1154_v26  ;;  %3888 = vrot.lane.b32.xlu1 %v3887_v25, %s6172_s10  ;;  %v478_v23 = vld [vmem:[%s6174_s2] sm:$0xff]  ;;  %v479_v25 = vld [vmem:[%s6174_s2 + $0x8] sm:$0xff]  ;;  %s6180_s2 = smov 32  }
 0x50c   : > { %v3892_v32 = vpack.i.bf16 %v1158_v31, %v1157_v30 }
 0x50d   : > { %v855_v33 = vpop.permute.xlu0 %854 }
 0x50e   : > { %3893 = vrot.lane.b32.xlu0 %v3892_v32, %s6172_s10  ;;  %v859_v48 = vmul.f32 %v855_v33, %v4640_v21 }
 0x52c   : > { %v845_v36 = vpop.permute.xlu0 %844 }
 0x52d   : > { %v849_v5 = vadd.f32 %v845_v36, %v829_v1 }
 0x534   : > { %v843_v34 = vpop.permute.xlu1 %842 }
 0x535   : > { %v848_v56 = vadd.f32 %v843_v34, %v828_v53 }
 0x56c   : > { %v3869_v39 = vpop.permute.xlu1 %3868 }
 0x56d   : > { %v3871_v6 = vunpack.i.h.bf16 %v3869_v39  ;;  %v3870_v43 = vunpack.i.l.bf16 %v3869_v39 }
 0x570   : > { %v865_v41 = vpop.permute.xlu1 %864  ;;  %v3874_v45 = vpop.permute.xlu0 %3873 }
 0x571   : > { %v3876_v55 = vunpack.i.h.bf16 %v3874_v45  ;;  %v3875_v37 = vunpack.i.l.bf16 %v3874_v45  ;;  %v870_v59 = vsub.f32 %v858_v0, %v865_v41 }
 0x573   : > { %v944_v46 = vsel %vm872_vm3, %v3870_v43, %v3875_v37  ;;  %v945_v52 = vsel %vm872_vm3, %v3871_v6, %v3876_v55  ;;  %v873_v21 = vsel %vm872_vm3, %v848_v56, %v870_v59  ;;  %v1438_v6 = vmul.f32 %v4714_v49, %v4714_v49  ;;  %v4752_v56 = vld [vmem:[%s6105_s13 + $0x8] sm:$0xff] }
 0x574   : > { %v867_v54 = vpop.permute.xlu0 %866  ;;  %v946_v63 = vpack.c.bf16 %v945_v52, %v944_v46  ;;  %v3879_v2 = vpop.permute.xlu1 %3878  ;;  %v4729_v52 = vadd.f32 13.0, %v4491_v42 }
 0x575   : > { %v871_v57 = vsub.f32 %v859_v48, %v867_v54  ;;  %v3881_v8 = vunpack.i.h.bf16 %v3879_v2  ;;  %v3880_v58 = vunpack.i.l.bf16 %v3879_v2  ;;  %v4726_v48 = vadd.f32 13.0, %v4487_v38 }
 0x576   : > { %v951_v4 = vsel %vm658_vm2, %v946_v63, 0  ;;  %6178 = vst [vmem:[#allocation14_spill] sm:$0xff] %v4729_v52  ;;  %v1450_v0 = vsel %vm504_vm0, %v1438_v6, 0.0  ;;  %v1439_v53 = vmul.f32 %v4729_v52, %v4729_v52 }
 0x577   : > { %3626 = vmatpush3.bf16.xpose.msra.mxu1 %v951_v4  ;;  %v874_v9 = vsel %vm872_vm3, %v849_v5, %v871_v57  ;;  %6177 = vst [vmem:[#allocation13_spill] sm:$0xff] %v4726_v48  ;;  %v4735_v57 = vadd.f32 13.0, %v4493_v44  ;;  %v1437_v42 = vmul.f32 %v4726_v48, %v4726_v48 }
 0x578   : > { %v3884_v61 = vpop.permute.xlu0 %3883  ;;  %3631 = vmatprep.subr.bf16.mxu1 %v6134_v7  ;;  %v875_v29 = vpack.c.bf16 %v874_v9, %v873_v21  ;;  %v1453_v4 = vsel %vm504_vm0, %v1439_v53, 0.0 }
 0x579   : > { %v3886_v35 = vunpack.i.h.bf16 %v3884_v61  ;;  %v3885_v15 = vunpack.i.l.bf16 %v3884_v61  ;;  %6179 = vst [vmem:[#allocation15_spill] sm:$0xff] %v4735_v57  ;;  %v1447_v5 = vsel %vm504_vm0, %v1437_v42, 0.0  ;;  %v1440_v59 = vmul.f32 %v4735_v57, %v4735_v57  ;;  %v4766_v61 = vld [vmem:[%s6105_s13 + $0x18] sm:$0xff] }
 0x57b   : > { %v1246_v50 = vsel %vm872_vm3, %v3880_v58, %v3885_v15  ;;  %v1247_v14 = vsel %vm872_vm3, %v3881_v8, %v3886_v35  ;;  %v1456_v44 = vsel %vm504_vm0, %v1440_v59, 0.0  ;;  %v4759_v8 = vld [vmem:[%s6105_s13] sm:$0xff]  ;;  %v4773_v58 = vld [vmem:[%s6105_s13 + $0x10] sm:$0xff] }
 0x57c   : > { %v1248_v60 = vpack.c.bf16 %v1247_v14, %v1246_v50  ;;  %v3889_v10 = vpop.permute.xlu1 %3888 }
 0x57d   : > { %v3891_v28 = vunpack.i.h.bf16 %v3889_v10  ;;  %v3890_v13 = vunpack.i.l.bf16 %v3889_v10 }
 0x57e   : > { %3628 = vmatmul.mubr.msk.bf16.vlgmr.msra.gmra.mrb[16].mxu1 %vm658_vm2, %v875_v29  ;;  %v1253_v11 = vsel %vm658_vm2, %v1248_v60, 0 }
 0x57f   : > { %3638 = vmatpush3.bf16.xpose.msra.mxu0 %v1253_v11  ;;  %3633 = vmatprep.mubr.msk.bf16.mxu1 %vm4256_vm1, %v6134_v7 }
 0x580   : > { %v3894_v12 = vpop.permute.xlu0 %3893  ;;  %3649 = vmatprep.subr.bf16.mxu0 %v6134_v7 }
 0x581   : > { %v3896_v62 = vunpack.i.h.bf16 %v3894_v12  ;;  %v3895_v16 = vunpack.i.l.bf16 %v3894_v12 }
 0x583   : > { %v1176_v17 = vsel %vm872_vm3, %v3891_v28, %v3896_v62  ;;  %v1175_v18 = vsel %vm872_vm3, %v3890_v13, %v3895_v16 }
 0x584   : > { %v1177_v3 = vpack.c.bf16 %v1176_v17, %v1175_v18  ;;  %v4792_v17 = vld [vmem:[%s6105_s13 + $0x28] sm:$0xff] }
 0x586   : > { %3640 = vmatmul.mubr.msk.bf16.vlgmr.msra.gmra.mrb[8].mxu0 %vm658_vm2, %v1177_v3 }
 0x587   : > { %3653 = vmatprep.mubr.msk.bf16.mxu0 %vm4256_vm1, %v6134_v7 }
 0x589   : > { %v702_v47 = vpop.f32.mrb[4].mxu0 }
 0x58a   : > { %v3607_v19 = vpop.f32.mrb[5].mxu0  ;;  %v4717_v39 = vadd.f32 13.0, %v702_v47 }
 0x58b   : > { %v705_v20 = vpop.f32.mrb[6].mxu0 }
 0x58c   : > { %v3608_v22 = vpop.f32.mrb[7].mxu0  ;;  %v4703_v27 = vadd.f32 13.0, %v705_v20  ;;  %6176 = vst [vmem:[#allocation12_spill] sm:$0xff] %v4717_v39  ;;  %v1435_v37 = vmul.f32 %v4717_v39, %v4717_v39 }
 0x58e   : > { %6173 = vst [vmem:[#allocation10_spill] sm:$0xff] %v4703_v27  ;;  %v1436_v31 = vmul.f32 %v4703_v27, %v4703_v27  ;;  %v1441_v2 = vsel %vm504_vm0, %v1435_v37, 0.0 }
 0x590   : > { %v1444_v45 = vsel %vm504_vm0, %v1436_v31, 0.0 }
 0x651   : > { %v987_v24 = vpop.f32.mrb[16].mxu1 }
 0x652   : > { %v988_v26 = vadd.f32 %v987_v24, %v478_v23  ;;  %v3629_v30 = vpop.f32.mrb[17].mxu1  ;;  %v4819_v24 = vld [vmem:[%s6105_s13 + $0x20] sm:$0xff] }
 0x653   : > { %v990_v32 = vpop.f32.mrb[18].mxu1 }
 0x654   : > { %v991_v33 = vadd.f32 %v990_v32, %v479_v25  ;;  %v3630_v34 = vpop.f32.mrb[19].mxu1  ;;  %v994_v36 = vsel %vm658_vm2, %v988_v26, -inf }
 0x655   : > { %995 = vmax.xlane.f32.xlu1 %v994_v36 }
 0x656   : > { %v997_v41 = vsel %vm658_vm2, %v991_v33, -inf }
 0x657   : > { %998 = vmax.xlane.f32.xlu0 %v997_v41 }
 0x659   : > { %v1289_v43 = vpop.f32.mrb[8].mxu0  ;;  %1445 = vadd.xlane.f32.xlu1 %v1444_v45 }
 0x65a   : > { %v1290_v55 = vadd.f32 %v1289_v43, %v478_v23  ;;  %v3641_v40 = vpop.f32.mrb[9].mxu0  ;;  %v4878_v43 = vld [vmem:[%s6104_s12 + $0x8] sm:$0xff] }
 0x65b   : > { %v1292_v46 = vpop.f32.mrb[10].mxu0  ;;  %6181 = vst [vmem:[#allocation16_spill] sm:$0xff] %v4878_v43 }
 0x65c   : > { %v1293_v54 = vadd.f32 %v1292_v46, %v479_v25  ;;  %v3642_v63 = vpop.f32.mrb[11].mxu0  ;;  %v1296_v1 = vsel %vm658_vm2, %v1290_v55, -inf  ;;  %v4887_v46 = vld [vmem:[%s6104_s12] sm:$0xff] }
 0x65d   : > { %1451 = vadd.xlane.f32.xlu1 %v1450_v0  ;;  %1297 = vmax.xlane.f32.xlu0 %v1296_v1  ;;  %v4911_v1 = vld [vmem:[%s6104_s12 + $0x18] sm:$0xff] }
 0x65e   : > { %v1299_v38 = vsel %vm658_vm2, %v1293_v54, -inf  ;;  %6182 = vst [vmem:[#allocation17_spill] sm:$0xff] %v4911_v1 }
 0x661   : > { %1300 = vmax.xlane.f32.xlu1 %v1299_v38  ;;  %1442 = vadd.xlane.f32.xlu0 %v1441_v2 }
 0x665   : > { %1454 = vadd.xlane.f32.xlu1 %v1453_v4  ;;  %1448 = vadd.xlane.f32.xlu0 %v1447_v5 }
 0x669   : > { %1457 = vadd.xlane.f32.xlu1 %v1456_v44 }
 0x67a   : > { %1319 = vrot.lane.b32.xlu1 %v4505_v51, %s6165_s25 }
 0x67e   : > { %1862 = vrot.lane.b32.xlu1 %v4752_v56, %s6164_s28 }
 0x682   : > { %1938 = vrot.lane.b32.xlu1 %v4759_v8, %s6180_s2 }
 0x686   : > { %1866 = vrot.lane.b32.xlu1 %v4766_v61, %s6164_s28 }
 0x68a   : > { %1942 = vrot.lane.b32.xlu1 %v4773_v58, %s6180_s2 }
 0x6e2   : > { %v996_v9 = vpop.xlane.xlu1 %995 }
 0x6e3   : > { %v1000_v35 = vsub.f32 %v988_v26, %v996_v9 }
 0x6e4   : > { %v999_v15 = vpop.xlane.xlu0 %998 }
 0x6e5   : > { %v1002_v21 = vmul.f32 1.442695, %v1000_v35  ;;  %v1001_v50 = vsub.f32 %v991_v33, %v999_v15 }
 0x6e6   : > { %v4794_v18 = vpop.xlane.xlu1 %1445 }
 0x6e7   : > { %4046 = vpow2.f32 %v1002_v21  ;;  %v1004_v14 = vmul.f32 1.442695, %v1001_v50  ;;  %v1460_v53 = vmul.f32 0.03125, %v4794_v18 }
 0x6e9   : > { %4048 = vpow2.f32 %v1004_v14  ;;  %v1466_v5 = vadd.f32 1.1920929e-07, %v1460_v53 }
 0x6ea   : > { %v1298_v29 = vpop.xlane.xlu0 %1297  ;;  %v4798_v3 = vpop.xlane.xlu1 %1451 }
 0x6eb   : > { %v1302_v60 = vsub.f32 %v1290_v55, %v1298_v29  ;;  %v1462_v44 = vmul.f32 0.03125, %v4798_v3 }
 0x6ed   : > { %v1304_v10 = vmul.f32 1.442695, %v1302_v60  ;;  %v1468_v21 = vadd.f32 1.1920929e-07, %v1462_v44  ;;  %v4016_v60 = vld [vmem:[%s6100_s8] sm:$0xff]  }
 0x6ee   : > { %v1301_v47 = vpop.xlane.xlu1 %1300  ;;  %v1443_v32 = vpop.xlane.xlu0 %1442 }
 0x6ef   : > { %4050 = vpow2.f32 %v1304_v10  ;;  %v1303_v19 = vsub.f32 %v1293_v54, %v1301_v47  ;;  %v1459_v38 = vmul.f32 0.03125, %v1443_v32 }
 0x6f1   : > { %v4777_v11 = vpop.eup %4046  ;;  %v1306_v20 = vmul.f32 1.442695, %v1303_v19  ;;  %v1465_v4 = vadd.f32 1.1920929e-07, %v1459_v38 }
 0x6f2   : > { %v1006_v12 = vsel %vm658_vm2, %v4777_v11, 0.0  ;;  %v4814_v23 = vpop.xlane.xlu1 %1454  ;;  %v1449_v34 = vpop.xlane.xlu0 %1448 }
 0x6f3   : > { %v4781_v28 = vpop.eup %4048  ;;  %1007 = vadd.xlane.f32.xlu0 %v1006_v12  ;;  %4052 = vpow2.f32 %v1306_v20  ;;  %v1461_v59 = vmul.f32 0.03125, %v1449_v34  ;;  %v1463_v12 = vmul.f32 0.03125, %v4814_v23 }
 0x6f4   : > { %v1009_v13 = vsel %vm658_vm2, %v4781_v28, 0.0 }
 0x6f5   : > { %1010 = vadd.xlane.f32.xlu1 %v1009_v13  ;;  %v1467_v35 = vadd.f32 1.1920929e-07, %v1461_v59  ;;  %v1469_v18 = vadd.f32 1.1920929e-07, %v1463_v12 }
 0x6f6   : > { %v4825_v25 = vpop.xlane.xlu1 %1457 }
 0x6f7   : > { %v1464_v29 = vmul.f32 0.03125, %v4825_v25 }
 0x6f9   : > { %v4785_v62 = vpop.eup %4050  ;;  %v1470_v13 = vadd.f32 1.1920929e-07, %v1464_v29 }
 0x6fa   : > { %v1308_v16 = vsel %vm658_vm2, %v4785_v62, 0.0  ;;  %v1320_v26 = vpop.permute.xlu1 %1319 }
 0x6fb   : > { %1309 = vadd.xlane.f32.xlu0 %v1308_v16 }
 0x6fd   : > { %v4810_v22 = vpop.eup %4052 }
 0x6fe   : > { %v4835_v30 = vpop.permute.xlu1 %1862 }
 0x702   : > { %v4845_v31 = vpop.permute.xlu1 %1938 }
 0x706   : > { %1870 = vrot.lane.b32.xlu1 %v4792_v17, %s6164_s28  ;;  %v4851_v33 = vpop.permute.xlu1 %1866 }
 0x70a   : > { %v4861_v36 = vpop.permute.xlu1 %1942 }
 0x711   : > { %1018 = vrot.lane.b32.xlu0 %v4505_v51, %s4268_s19  ;;  %v1311_v51 = vsel %vm658_vm2, %v4810_v22, 0.0 }
 0x715   : > { %1860 = vrot.lane.b32.xlu0 %v4759_v8, %s6164_s28 }
 0x719   : > { %1940 = vrot.lane.b32.xlu0 %v4752_v56, %s6180_s2 }
 0x71d   : > { %1864 = vrot.lane.b32.xlu0 %v4773_v58, %s6164_s28 }
 0x721   : > { %1944 = vrot.lane.b32.xlu0 %v4766_v61, %s6180_s2 }
 0x725   : > { %1868 = vrot.lane.b32.xlu0 %v4819_v24, %s6164_s28 }
 0x729   : > { %1948 = vrot.lane.b32.xlu0 %v4792_v17, %s6180_s2 }
 0x72a   : > { %1312 = vadd.xlane.f32.xlu1 %v1311_v51 }
 0x72d   : > { %2635 = vrot.lane.b32.xlu0 %v4759_v8, %s6166_s20 }
 0x731   : > { %2715 = vrot.lane.b32.xlu0 %v4752_v56, %s6165_s25 }
 0x735   : > { %2639 = vrot.lane.b32.xlu0 %v4773_v58, %s6166_s20 }
 0x739   : > { %2719 = vrot.lane.b32.xlu0 %v4766_v61, %s6165_s25 }
 0x73b   : > { %1946 = vrot.lane.b32.xlu1 %v4819_v24, %s6180_s2 }
 0x73d   : > { %2645 = vrot.lane.b32.xlu0 %v4792_v17, %s6166_s20 }
 0x73f   : > { %2637 = vrot.lane.b32.xlu1 %v4752_v56, %s6166_s20 }
 0x741   : > { %2723 = vrot.lane.b32.xlu0 %v4792_v17, %s6165_s25 }
 0x743   : > { %2713 = vrot.lane.b32.xlu1 %v4759_v8, %s6165_s25 }
 0x745   : > { %2424 = vrot.lane.b32.xlu0 %v4752_v56, %s6168_s26 }
 0x747   : > { %2641 = vrot.lane.b32.xlu1 %v4766_v61, %s6166_s20 }
 0x749   : > { %2502 = vrot.lane.b32.xlu0 %v4752_v56, %s6167_s27 }
 0x74b   : > { %2717 = vrot.lane.b32.xlu1 %v4773_v58, %s6165_s25 }
 0x74d   : > { %2426 = vrot.lane.b32.xlu0 %v4773_v58, %s6168_s26 }
 0x74f   : > { %2643 = vrot.lane.b32.xlu1 %v4819_v24, %s6166_s20 }
 0x751   : > { %2506 = vrot.lane.b32.xlu0 %v4766_v61, %s6167_s27 }
 0x753   : > { %2721 = vrot.lane.b32.xlu1 %v4819_v24, %s6165_s25 }
 0x755   : > { %1836 = vrot.lane.b32.xlu0 %v4887_v46, %s6180_s2 }
 0x757   : > { %2422 = vrot.lane.b32.xlu1 %v4759_v8, %s6168_s26 }
 0x759   : > { %1916 = vrot.lane.b32.xlu0 %v4878_v43, %s6164_s28 }
 0x75b   : > { %2500 = vrot.lane.b32.xlu1 %v4759_v8, %s6167_s27 }
 0x75d   : > { %2432 = vrot.lane.b32.xlu0 %v4792_v17, %s6168_s26 }
 0x75f   : > { %2428 = vrot.lane.b32.xlu1 %v4766_v61, %s6168_s26 }
 0x761   : > { %2510 = vrot.lane.b32.xlu0 %v4792_v17, %s6167_s27 }
 0x763   : > { %2504 = vrot.lane.b32.xlu1 %v4773_v58, %s6167_s27 }
 0x767   : > { %1838 = vrot.lane.b32.xlu1 %v4878_v43, %s6180_s2 }
 0x76b   : > { %1914 = vrot.lane.b32.xlu1 %v4887_v46, %s6164_s28 }
 0x76f   : > { %2430 = vrot.lane.b32.xlu1 %v4819_v24, %s6168_s26 }
 0x773   : > { %2508 = vrot.lane.b32.xlu1 %v4819_v24, %s6167_s27 }
 0x777   : > { %1842 = vrot.lane.b32.xlu1 %v4911_v1, %s6180_s2 }
 0x780   : > { %v1008_v41 = vpop.xlane.xlu0 %1007 }
 0x781   : > { %4054 = vrcp.f32 %v1008_v41 }
 0x782   : > { %v1011_v45 = vpop.xlane.xlu1 %1010 }
 0x783   : > { %4056 = vrcp.f32 %v1011_v45  ;;  %v4954_v45 = vld [vmem:[%s6104_s12 + $0x10] sm:$0xff] }
 0x784   : > { %6183 = vst [vmem:[#allocation18_spill] sm:$0xff] %v4954_v45  ;;  %1918 = vrot.lane.b32.xlu1 %v4954_v45, %s6164_s28  ;;  %1840 = vrot.lane.b32.xlu0 %v4954_v45, %s6180_s2 }
 0x786   : > { %v4917_v2 = vpop.permute.xlu1 %1870 }
 0x788   : > { %v1310_v6 = vpop.xlane.xlu0 %1309  ;;  %1920 = vrot.lane.b32.xlu0 %v4911_v1, %s6164_s28 }
 0x789   : > { %4058 = vrcp.f32 %v1310_v6  ;;  %v4963_v6 = vld [vmem:[%s6104_s12 + $0x20] sm:$0xff] }
 0x78a   : > { %1844 = vrot.lane.b32.xlu1 %v4963_v6, %s6180_s2 }
 0x78b   : > { %v4055_v55 = vpop.eup %4054 }
 0x78c   : > { %v1019_v37 = vpop.permute.xlu0 %1018  ;;  %v1014_v54 = vmul.f32 %v4055_v55, %v4777_v11  ;;  %v4972_v55 = vld [vmem:[%s6104_s12 + $0x28] sm:$0xff] }
 0x78d   : > { %v4057_v40 = vpop.eup %4056  ;;  %3632 = vmatpush3.bf16.msra.mxu1 %v1019_v37  ;;  %1846 = vrot.lane.b32.xlu0 %v4972_v55, %s6180_s2 }
 0x78e   : > { %v1015_v63 = vmul.f32 %v4057_v40, %v4781_v28  ;;  %3643 = vmatprep.subr.bf16.mxu1 %v6134_v7  ;;  %1922 = vrot.lane.b32.xlu1 %v4963_v6, %s6164_s28 }
 0x790   : > { %v1016_v0 = vpack.c.bf16 %v1015_v63, %v1014_v54 }
 0x791   : > { %1924 = vrot.lane.b32.xlu0 %v4972_v55, %s6164_s28  ;;  %s3812_s28 = smul.u32 768, %s4367_s17 }
 0x792   : > { %3634 = vmatmul.mubr.msk.bf16.vlgmr.msra.gmra.mrb[20].mxu1 %vm658_vm2, %v1016_v0  ;;  %1707 = vrot.lane.b32.xlu1 %v4759_v8, %s6169_s0 }
 0x793   : > { %3644 = vmatpush3.bf16.msra.mxu1 %v1320_v26  ;;  %3645 = vmatprep.mubr.msk.bf16.mxu1 %vm4256_vm1, %v6134_v7  ;;  %v4059_v9 = vpop.eup %4058 }
 0x794   : > { %3657 = vmatprep.subr.bf16.mxu1 %v6134_v7  ;;  %v1316_v50 = vmul.f32 %v4059_v9, %v4785_v62  ;;  %v4017_v62 = vld [vmem:[%s6100_s8 + $0x8] sm:$0xff]  }
 0x795   : > { %1709 = vrot.lane.b32.xlu0 %v4752_v56, %s6169_s0 }
 0x796   : > { %2611 = vrot.lane.b32.xlu1 %v4887_v46, %s6165_s25 }
 0x799   : > { %2613 = vrot.lane.b32.xlu0 %v4878_v43, %s6165_s25 }
 0x79a   : > { %2689 = vrot.lane.b32.xlu1 %v4887_v46, %s6166_s20 }
 0x79d   : > { %2691 = vrot.lane.b32.xlu0 %v4878_v43, %s6166_s20 }
 0x79e   : > { %1711 = vrot.lane.b32.xlu1 %v4773_v58, %s6169_s0 }
 0x7a1   : > { %1713 = vrot.lane.b32.xlu0 %v4766_v61, %s6169_s0 }
 0x7a2   : > { %2615 = vrot.lane.b32.xlu1 %v4954_v45, %s6165_s25 }
 0x7a5   : > { %2617 = vrot.lane.b32.xlu0 %v4911_v1, %s6165_s25 }
 0x7a6   : > { %2693 = vrot.lane.b32.xlu1 %v4954_v45, %s6166_s20 }
 0x7a9   : > { %2695 = vrot.lane.b32.xlu0 %v4911_v1, %s6166_s20 }
 0x7aa   : > { %1715 = vrot.lane.b32.xlu1 %v4819_v24, %s6169_s0 }
 0x7ad   : > { %1717 = vrot.lane.b32.xlu0 %v4792_v17, %s6169_s0  ;;  %v5030_v17 = vpop.permute.xlu0 %1860 }
 0x7ae   : > { %2619 = vrot.lane.b32.xlu1 %v4963_v6, %s6165_s25 }
 0x7b1   : > { %2621 = vrot.lane.b32.xlu0 %v4972_v55, %s6165_s25  ;;  %v5032_v24 = vpop.permute.xlu0 %1940 }
 0x7b2   : > { %2697 = vrot.lane.b32.xlu1 %v4963_v6, %s6166_s20 }
 0x7b5   : > { %2699 = vrot.lane.b32.xlu0 %v4972_v55, %s6166_s20  ;;  %v5034_v40 = vpop.permute.xlu0 %1864 }
 0x7b6   : > { %2398 = vrot.lane.b32.xlu1 %v4887_v46, %s6167_s27 }
 0x7b7   : > { %v1313_v42 = vpop.xlane.xlu1 %1312 }
 0x7b8   : > { %4060 = vrcp.f32 %v1313_v42 }
 0x7b9   : > { %4062 = vrsqrt.f32 %v1465_v4  ;;  %2400 = vrot.lane.b32.xlu0 %v4878_v43, %s6167_s27  ;;  %v5036_v37 = vpop.permute.xlu0 %1944 }
 0x7ba   : > { %4064 = vrsqrt.f32 %v1466_v5  ;;  %2476 = vrot.lane.b32.xlu1 %v4887_v46, %s6168_s26 }
 0x7bb   : > { %4066 = vrsqrt.f32 %v1467_v35  ;;  %v5042_v0 = vpop.permute.xlu1 %1946 }
 0x7bc   : > { %4068 = vrsqrt.f32 %v1468_v21 }
 0x7bd   : > { %4070 = vrsqrt.f32 %v1470_v13  ;;  %2478 = vrot.lane.b32.xlu0 %v4878_v43, %s6168_s26  ;;  %v5038_v54 = vpop.permute.xlu0 %1868 }
 0x7be   : > { %4072 = vrsqrt.f32 %v1469_v18  ;;  %2402 = vrot.lane.b32.xlu1 %v4954_v45, %s6167_s27 }
 0x7bf   : > { %v5050_v5 = vpop.permute.xlu1 %2637 }
 0x7c1   : > { %v5040_v63 = vpop.permute.xlu0 %1948 }
 0x7c2   : > { %v4061_v15 = vpop.eup %4060 }
 0x7c3   : > { %v1317_v14 = vmul.f32 %v4061_v15, %v4810_v22  ;;  %v4063_v11 = vpop.eup %4062  ;;  %v5058_v15 = vpop.permute.xlu1 %2713 }
 0x7c4   : > { %v4065_v28 = vpop.eup %4064  ;;  %v1477_v16 = vmul.f32 %v4063_v11, %v4717_v39 }
 0x7c5   : > { %v1318_v10 = vpack.c.bf16 %v1317_v14, %v1316_v50  ;;  %v1478_v3 = vmul.f32 %v4065_v28, %v4703_v27  ;;  %v4067_v19 = vpop.eup %4066  ;;  %v5044_v38 = vpop.permute.xlu0 %2635 }
 0x7c6   : > { %v4069_v20 = vpop.eup %4068  ;;  %v1479_v22 = vmul.f32 %v4067_v19, %v4726_v48 }
 0x7c7   : > { %3646 = vmatmul.mubr.msk.bf16.vlgmr.msra.gmra.mrb[24].mxu1 %vm658_vm2, %v1318_v10  ;;  %v1483_v47 = vpack.c.bf16 %v1478_v3, %v1477_v16  ;;  %v1480_v51 = vmul.f32 %v4069_v20, %v4714_v49  ;;  %v4071_v25 = vpop.eup %4070  ;;  %v5074_v12 = vpop.permute.xlu1 %2641 }
 0x7c8   : > { %3658 = vmatpush3.bf16.msra.mxu1 %v4016_v60  ;;  %3661 = vmatprep.mubr.msk.bf16.mxu1 %vm4256_vm1, %v6134_v7  ;;  %v4073_v26 = vpop.eup %4072  ;;  %v1482_v32 = vmul.f32 %v4071_v25, %v4735_v57 }
 0x7c9   : > { %3659 = vmatprep.subr.bf16.mxu1 %v6134_v7  ;;  %v1484_v23 = vpack.c.bf16 %v1480_v51, %v1479_v22  ;;  %v1481_v34 = vmul.f32 %v4073_v26, %v4729_v52  ;;  %v5054_v9 = vpop.permute.xlu0 %2715 }
 0x7cb   : > { %v1485_v41 = vpack.c.bf16 %v1482_v32, %v1481_v34 }
 0x7cc   : > { %3660 = vmatpush3.bf16.msra.mxu1 %v4017_v62 }
 0x7cd   : > { %3691 = vmatprep.subr.bf16.mxu1 %v6134_v7  ;;  %v5066_v60 = vpop.permute.xlu0 %2639 }
 0x7cf   : > { %3662 = vmatmul.mubr.msk.bf16.vlgmr.msra.gmra.mrb[28].mxu1 %vm504_vm0, %v1483_v47  ;;  %v5089_v47 = vpop.permute.xlu1 %2717 }
 0x7d0   : > { %3665 = vmatprep.mubr.msk.bf16.mxu1 %vm4256_vm1, %v6134_v7 }
 0x7d1   : > { %v5080_v62 = vpop.permute.xlu0 %2719 }
 0x7d3   : > { %v5096_v51 = vpop.permute.xlu1 %2643 }
 0x7d5   : > { %v5092_v19 = vpop.permute.xlu0 %2645 }
 0x7d7   : > { %3666 = vmatmul.mubr.msk.bf16.gmra.mrb[32].mxu1 %vm504_vm0, %v1484_v23  ;;  %v5106_v34 = vpop.permute.xlu1 %2721 }
 0x7d8   : > { %3669 = vmatprep.mubr.msk.bf16.mxu1 %vm4256_vm1, %v6134_v7 }
 0x7d9   : > { %v5104_v32 = vpop.permute.xlu0 %2723 }
 0x7df   : > { %3670 = vmatmul.mubr.msk.bf16.gmra.mrb[36].mxu1 %vm504_vm0, %v1485_v41  ;;  %v5108_v41 = vpop.permute.xlu0 %2424 }
 0x7e0   : > { %3697 = vmatprep.mubr.msk.bf16.mxu1 %vm4256_vm1, %v6134_v7 }
 0x865   : > { %v5026_v56 = vpop.f32.mrb[20].mxu1 }
 0x866   : > { %v3635_v8 = vpop.f32.mrb[21].mxu1 }
 0x867   : > { %v5028_v61 = vpop.f32.mrb[22].mxu1  ;;  %v5110_v8 = vpop.permute.xlu1 %2422 }
 0x868   : > { %v3636_v58 = vpop.f32.mrb[23].mxu1 }
 0x869   : > { %v5112_v58 = vpop.permute.xlu0 %2502 }
 0x89a   : > { %v5046_v53 = vpop.f32.mrb[24].mxu1 }
 0x89b   : > { %v3647_v42 = vpop.f32.mrb[25].mxu1 }
 0x89c   : > { %v5048_v4 = vpop.f32.mrb[26].mxu1  ;;  %v5114_v42 = vpop.permute.xlu1 %2500 }
 0x89d   : > { %v3648_v44 = vpop.f32.mrb[27].mxu1 }
 0x89e   : > { %v5116_v44 = vpop.permute.xlu0 %2426 }
 0x8a2   : > { %v5056_v35 = vpop.f32.mrb[28].mxu1 }
 0x8a3   : > { %v3663_v21 = vpop.f32.mrb[29].mxu1  ;;  %v1575_v50 = vmul.f32 %v5056_v35, %v5056_v35 }
 0x8a4   : > { %v5062_v14 = vpop.f32.mrb[30].mxu1  ;;  %v5118_v21 = vpop.permute.xlu1 %2428 }
 0x8a5   : > { %2338 = vrot.lane.b32.xlu1 %v1575_v50, %s6171_s6  ;;  %1635 = vrot.lane.b32.xlu0 %v1575_v50, %s6170_s21  ;;  %v3664_v29 = vpop.f32.mrb[31].mxu1  ;;  %v5070_v10 = vpack.c.bf16 %v5062_v14, %v5056_v35  ;;  %v1576_v11 = vmul.f32 %v5062_v14, %v5062_v14 }
 0x8a6   : > { %v1581_v29 = vsel %vm658_vm2, %v1575_v50, 0.0 }
 0x8a7   : > { %6184 = vst [vmem:[#allocation19_spill] sm:$0xff] %v5070_v10 }
 0x8a9   : > { %2272 = vrot.lane.b32.xlu1 %v1575_v50, %s6172_s10  ;;  %1637 = vrot.lane.b32.xlu0 %v1576_v11, %s6170_s21 }
 0x8aa   : > { %v5078_v28 = vpop.f32.mrb[32].mxu1 }
 0x8ab   : > { %v3667_v13 = vpop.f32.mrb[33].mxu1  ;;  %v1577_v57 = vmul.f32 %v5078_v28, %v5078_v28 }
 0x8ac   : > { %v5082_v16 = vpop.f32.mrb[34].mxu1  ;;  %v5121_v13 = vpop.permute.xlu0 %2506 }
 0x8ad   : > { %2340 = vrot.lane.b32.xlu0 %v1576_v11, %s6171_s6  ;;  %v3668_v18 = vpop.f32.mrb[35].mxu1  ;;  %v5087_v3 = vpack.c.bf16 %v5082_v16, %v5078_v28 }
 0x8ae   : > { %v1584_v18 = vsel %vm658_vm2, %v1576_v11, 0.0 }
 0x8af   : > { %6185 = vst [vmem:[#allocation20_spill] sm:$0xff] %v5087_v3 }
 0x8b1   : > { %2274 = vrot.lane.b32.xlu0 %v1576_v11, %s6172_s10 }
 0x8b2   : > { %v5094_v20 = vpop.f32.mrb[36].mxu1 }
 0x8b3   : > { %v3671_v22 = vpop.f32.mrb[37].mxu1 }
 0x8b4   : > { %v5098_v23 = vpop.f32.mrb[38].mxu1  ;;  %v5124_v22 = vpop.permute.xlu1 %2504 }
 0x8b5   : > { %v3672_v25 = vpop.f32.mrb[39].mxu1  ;;  %v5102_v26 = vpack.c.bf16 %v5098_v23, %v5094_v20 }
 0x8b6   : > { %v5126_v25 = vpop.permute.xlu0 %1836 }
 0x8b7   : > { %6186 = vst [vmem:[#allocation21_spill] sm:$0xff] %v5102_v26  ;;  %6187 = vst [vmem:[#allocation22_spill] sm:$0xff] %v5126_v25 }
 0x8b8   : > { %v5128_v7 = vpop.permute.xlu1 %1838 }
 0x8b9   : > { %6188 = vst [vmem:[#allocation23_spill] sm:$0xff] %v5128_v7 }
 0x8ba   : > { %v5130_v59 = vpop.permute.xlu0 %1916 }
 0x8bb   : > { %6189 = vst [vmem:[#allocation24_spill] sm:$0xff] %v5130_v59 }
 0x8bc   : > { %v5134_v52 = vpop.permute.xlu1 %1914 }
 0x8bd   : > { %6190 = vst [vmem:[#allocation25_spill] sm:$0xff] %v5134_v52 }
 0x8be   : > { %v5137_v50 = vpop.permute.xlu0 %2432 }
 0x8bf   : > { %6191 = vst [vmem:[#allocation26_spill] sm:$0xff] %v5137_v50 }
 0x8c0   : > { %v5140_v11 = vpop.permute.xlu1 %2430 }
 0x8c1   : > { %6192 = vst [vmem:[#allocation27_spill] sm:$0xff] %v5140_v11 }
 0x8c4   : > { %v5148_v49 = vpop.permute.xlu1 %2508 }
 0x8c5   : > { %6194 = vst [vmem:[#allocation29_spill] sm:$0xff] %v5148_v49 }
 0x8c8   : > { %v5154_v27 = vpop.permute.xlu1 %1842 }
 0x8c9   : > { %6196 = vst [vmem:[#allocation31_spill] sm:$0xff] %v5154_v27 }
 0x8cc   : > { %v5158_v26 = vpop.permute.xlu1 %1918 }
 0x8cd   : > { %1582 = vadd.xlane.f32.xlu1 %v1581_v29  ;;  %v1578_v29 = vmul.f32 %v5082_v16, %v5082_v16  ;;  %6198 = vst [vmem:[#allocation33_spill] sm:$0xff] %v5158_v26 }
 0x8d0   : > { %1585 = vadd.xlane.f32.xlu0 %v1584_v18  ;;  %v5146_v18 = vpop.permute.xlu0 %2510  ;;  %v5162_v10 = vpop.permute.xlu1 %1844 }
 0x8d1   : > { %6193 = vst [vmem:[#allocation28_spill] sm:$0xff] %v5146_v18  ;;  %6200 = vst [vmem:[#allocation35_spill] sm:$0xff] %v5162_v10 }
 0x8d4   : > { %v5151_v48 = vpop.permute.xlu0 %1840  ;;  %v5166_v59 = vpop.permute.xlu1 %1922 }
 0x8d5   : > { %6195 = vst [vmem:[#allocation30_spill] sm:$0xff] %v5151_v48  ;;  %6202 = vst [vmem:[#allocation37_spill] sm:$0xff] %v5166_v59  ;;  %v1587_v48 = vsel %vm658_vm2, %v1577_v57, 0.0  ;;  %v1579_v59 = vmul.f32 %v5094_v20, %v5094_v20 }
 0x8d8   : > { %v5156_v39 = vpop.permute.xlu0 %1920  ;;  %v5170_v7 = vpop.permute.xlu1 %1707 }
 0x8d9   : > { %6197 = vst [vmem:[#allocation32_spill] sm:$0xff] %v5156_v39  ;;  %v1590_v39 = vsel %vm658_vm2, %v1578_v29, 0.0 }
 0x8dc   : > { %v5160_v3 = vpop.permute.xlu0 %1846  ;;  %v5176_v26 = vpop.permute.xlu1 %2611 }
 0x8dd   : > { %6199 = vst [vmem:[#allocation34_spill] sm:$0xff] %v5160_v3  ;;  %6205 = vst [vmem:[#allocation40_spill] sm:$0xff] %v5176_v26 }
 0x8de   : > { %1639 = vrot.lane.b32.xlu1 %v1577_v57, %s6170_s21 }
 0x8e0   : > { %v5164_v52 = vpop.permute.xlu0 %1924  ;;  %v5180_v10 = vpop.permute.xlu1 %2689 }
 0x8e1   : > { %6201 = vst [vmem:[#allocation36_spill] sm:$0xff] %v5164_v52  ;;  %6207 = vst [vmem:[#allocation42_spill] sm:$0xff] %v5180_v10 }
 0x8e2   : > { %2342 = vrot.lane.b32.xlu1 %v1577_v57, %s6171_s6 }
 0x8e4   : > { %v5168_v25 = vpop.permute.xlu0 %1709  ;;  %v5186_v18 = vpop.permute.xlu1 %1711 }
 0x8e5   : > { %6203 = vst [vmem:[#allocation38_spill] sm:$0xff] %v5168_v25  ;;  %6209 = vst [vmem:[#allocation44_spill] sm:$0xff] %v5186_v18 }
 0x8e6   : > { %2276 = vrot.lane.b32.xlu1 %v1577_v57, %s6172_s10  ;;  %1641 = vrot.lane.b32.xlu0 %v1578_v29, %s6170_s21 }
 0x8e8   : > { %v5173_v27 = vpop.permute.xlu0 %2613 }
 0x8e9   : > { %6204 = vst [vmem:[#allocation39_spill] sm:$0xff] %v5173_v27 }
 0x8ea   : > { %2344 = vrot.lane.b32.xlu0 %v1578_v29, %s6171_s6 }
 0x8ec   : > { %v5178_v3 = vpop.permute.xlu0 %2691 }
 0x8ed   : > { %6206 = vst [vmem:[#allocation41_spill] sm:$0xff] %v5178_v3 }
 0x8ee   : > { %2278 = vrot.lane.b32.xlu0 %v1578_v29, %s6172_s10  ;;  %v1580_v29 = vmul.f32 %v5098_v23, %v5098_v23 }
 0x8f0   : > { %v5182_v52 = vpop.permute.xlu0 %1713 }
 0x8f1   : > { %6208 = vst [vmem:[#allocation43_spill] sm:$0xff] %v5182_v52 }
 0x90a   : > { %1588 = vadd.xlane.f32.xlu1 %v1587_v48  ;;  %v5189_v48 = vpop.permute.xlu0 %2617 }
 0x90b   : > { %6210 = vst [vmem:[#allocation45_spill] sm:$0xff] %v5189_v48 }
 0x90d   : > { %1591 = vadd.xlane.f32.xlu0 %v1590_v39  ;;  %v5192_v39 = vpop.permute.xlu1 %2615 }
 0x90e   : > { %6211 = vst [vmem:[#allocation46_spill] sm:$0xff] %v5192_v39  ;;  %v5194_v57 = vpop.permute.xlu0 %2695 }
 0x90f   : > { %6212 = vst [vmem:[#allocation47_spill] sm:$0xff] %v5194_v57 }
 0x911   : > { %v5199_v52 = vpop.permute.xlu1 %2693 }
 0x912   : > { %6213 = vst [vmem:[#allocation48_spill] sm:$0xff] %v5199_v52  ;;  %v5202_v18 = vpop.permute.xlu0 %1717 }
 0x913   : > { %6214 = vst [vmem:[#allocation49_spill] sm:$0xff] %v5202_v18 }
 0x915   : > { %v5206_v48 = vpop.permute.xlu1 %1715 }
 0x916   : > { %6215 = vst [vmem:[#allocation50_spill] sm:$0xff] %v5206_v48  ;;  %v5208_v10 = vpop.permute.xlu0 %2621  ;;  %v1593_v48 = vsel %vm658_vm2, %v1579_v59, 0.0 }
 0x917   : > { %6216 = vst [vmem:[#allocation51_spill] sm:$0xff] %v5208_v10 }
 0x919   : > { %v5212_v57 = vpop.permute.xlu1 %2619 }
 0x91a   : > { %6217 = vst [vmem:[#allocation52_spill] sm:$0xff] %v5212_v57  ;;  %v5215_v39 = vpop.permute.xlu0 %2699 }
 0x91b   : > { %1643 = vrot.lane.b32.xlu1 %v1579_v59, %s6170_s21  ;;  %6218 = vst [vmem:[#allocation53_spill] sm:$0xff] %v5215_v39  ;;  %v1596_v39 = vsel %vm658_vm2, %v1580_v29, 0.0 }
 0x91d   : > { %v5217_v52 = vpop.permute.xlu1 %2697 }
 0x91e   : > { %6219 = vst [vmem:[#allocation54_spill] sm:$0xff] %v5217_v52  ;;  %v5219_v3 = vpop.permute.xlu0 %2400 }
 0x91f   : > { %2346 = vrot.lane.b32.xlu1 %v1579_v59, %s6171_s6  ;;  %6220 = vst [vmem:[#allocation55_spill] sm:$0xff] %v5219_v3 }
 0x921   : > { %v5221_v18 = vpop.permute.xlu1 %2398 }
 0x922   : > { %6221 = vst [vmem:[#allocation56_spill] sm:$0xff] %v5221_v18  ;;  %v5223_v26 = vpop.permute.xlu0 %2478 }
 0x923   : > { %2280 = vrot.lane.b32.xlu0 %v1579_v59, %s6172_s10  ;;  %6222 = vst [vmem:[#allocation57_spill] sm:$0xff] %v5223_v26 }
 0x925   : > { %v5226_v10 = vpop.permute.xlu1 %2476 }
 0x926   : > { %6223 = vst [vmem:[#allocation58_spill] sm:$0xff] %v5226_v10  ;;  %v1636_v27 = vpop.permute.xlu0 %1635 }
 0x927   : > { %1645 = vrot.lane.b32.xlu0 %v1580_v29, %s6170_s21 }
 0x929   : > { %v5228_v50 = vpop.permute.xlu1 %2402 }
 0x92a   : > { %6224 = vst [vmem:[#allocation59_spill] sm:$0xff] %v5228_v50  ;;  %v1638_v57 = vpop.permute.xlu0 %1637 }
 0x92b   : > { %2404 = vrot.lane.b32.xlu0 %v4911_v1, %s6167_s27  ;;  %v1656_v10 = vsel %vm658_vm2, %v1638_v57, 0.0 }
 0x92d   : > { %v2339_v49 = vpop.permute.xlu1 %2338 }
 0x92e   : > { %v2341_v52 = vpop.permute.xlu0 %2340  ;;  %v2356_v18 = vsel %vm658_vm2, %v2339_v49, 0.0 }
 0x92f   : > { %2482 = vrot.lane.b32.xlu0 %v4911_v1, %s6168_s26  ;;  %v2359_v57 = vsel %vm658_vm2, %v2341_v52, 0.0 }
 0x931   : > { %v2273_v26 = vpop.permute.xlu1 %2272 }
 0x932   : > { %v2275_v59 = vpop.permute.xlu0 %2274 }
 0x933   : > { %2348 = vrot.lane.b32.xlu0 %v1580_v29, %s6171_s6 }
 0x943   : > { %1594 = vadd.xlane.f32.xlu1 %v1593_v48  ;;  %v2290_v48 = vsel %vm658_vm2, %v2273_v26, 0.0  ;;  %v1653_v26 = vsel %vm658_vm2, %v1636_v27, 0.0 }
 0x952   : > { %1597 = vadd.xlane.f32.xlu0 %v1596_v39 }
 0x954   : > { %2480 = vrot.lane.b32.xlu1 %v4954_v45, %s6168_s26 }
 0x956   : > { %2357 = vadd.xlane.f32.xlu0 %v2356_v18 }
 0x958   : > { %2282 = vrot.lane.b32.xlu1 %v1580_v29, %s6172_s10 }
 0x95a   : > { %2291 = vadd.xlane.f32.xlu0 %v2290_v48  ;;  %v5242_v11 = vpop.xlane.xlu1 %1582  ;;  %v2293_v48 = vsel %vm658_vm2, %v2275_v59, 0.0 }
 0x95d   : > { %v5236_v50 = vpop.xlane.xlu0 %1585 }
 0x95e   : > { %1657 = vadd.xlane.f32.xlu0 %v1656_v10  ;;  %v1640_v10 = vpop.permute.xlu1 %1639 }
 0x961   : > { %v1642_v39 = vpop.permute.xlu0 %1641 }
 0x962   : > { %v1662_v3 = vsel %vm658_vm2, %v1642_v39, 0.0 }
 0x963   : > { %1663 = vadd.xlane.f32.xlu0 %v1662_v3  ;;  %v2343_v3 = vpop.permute.xlu1 %2342 }
 0x964   : > { %v2362_v39 = vsel %vm658_vm2, %v2343_v3, 0.0 }
 0x965   : > { %v2345_v1 = vpop.permute.xlu0 %2344 }
 0x966   : > { %v2365_v49 = vsel %vm658_vm2, %v2345_v1, 0.0  ;;  %v1659_v1 = vsel %vm658_vm2, %v1640_v10, 0.0 }
 0x967   : > { %2366 = vadd.xlane.f32.xlu0 %v2365_v49  ;;  %v2277_v49 = vpop.permute.xlu1 %2276 }
 0x969   : > { %v2279_v18 = vpop.permute.xlu0 %2278 }
 0x96a   : > { %v2299_v29 = vsel %vm658_vm2, %v2279_v18, 0.0  ;;  %v2296_v18 = vsel %vm658_vm2, %v2277_v49, 0.0 }
 0x96b   : > { %2300 = vadd.xlane.f32.xlu0 %v2299_v29 }
 0x97c   : > { %1654 = vadd.xlane.f32.xlu1 %v1653_v26 }
 0x980   : > { %2360 = vadd.xlane.f32.xlu1 %v2359_v57 }
 0x984   : > { %2294 = vadd.xlane.f32.xlu1 %v2293_v48 }
 0x988   : > { %1660 = vadd.xlane.f32.xlu1 %v1659_v1 }
 0x98c   : > { %2363 = vadd.xlane.f32.xlu1 %v2362_v39 }
 0x990   : > { %2297 = vadd.xlane.f32.xlu1 %v2296_v18 }
 0x997   : > { %v5250_v27 = vpop.xlane.xlu1 %1588 }
 0x998   : > { %6225 = vst [vmem:[#allocation60_spill] sm:$0xff] %v5250_v27 }
 0x99a   : > { %v5252_v29 = vpop.xlane.xlu0 %1591 }
 0x99b   : > { %6226 = vst [vmem:[#allocation61_spill] sm:$0xff] %v5252_v29  ;;  %v1644_v52 = vpop.permute.xlu1 %1643 }
 0x99c   : > { %v1665_v26 = vsel %vm658_vm2, %v1644_v52, 0.0 }
 0x99d   : > { %1666 = vadd.xlane.f32.xlu0 %v1665_v26  ;;  %v4018_v26 = vld [vmem:[%s6099_s7] sm:$0xff]  }
 0x99e   : > { %v2281_v59 = vpop.permute.xlu0 %2280  ;;  %3650 = vmatpush3.bf16.msra.mxu0 %v4018_v26 }
 0x99f   : > { %v2347_v57 = vpop.permute.xlu1 %2346  ;;  %v2302_v3 = vsel %vm658_vm2, %v2281_v59, 0.0  ;;  %v6229_v59 = vpack.i.bf16 %v5048_v4, %v5046_v53 }
 0x9a0   : > { %v2368_v10 = vsel %vm658_vm2, %v2347_v57, 0.0  ;;  %v6230_v57 = vmov 0.0  }
 0x9a1   : > { %2369 = vadd.xlane.f32.xlu1 %v2368_v10  ;;  %3651 = vmatprep.subr.bf16.mxu0 %v6230_v57  ;;  %v4019_v10 = vld [vmem:[%s6099_s7 + $0x8] sm:$0xff]  }
 0x9a2   : > { %v1646_v48 = vpop.permute.xlu0 %1645  ;;  %3652 = vmatpush3.bf16.msra.mxu0 %v4019_v10 }
 0x9a3   : > { %v1668_v39 = vsel %vm658_vm2, %v1646_v48, 0.0  ;;  %3673 = vmatprep.subr.bf16.mxu0 %v6230_v57 }
 0x9a5   : > { %2303 = vadd.xlane.f32.xlu1 %v2302_v3 }
 0x9a6   : > { %v5257_v1 = vpop.permute.xlu0 %2404 }
 0x9a7   : > { %6227 = vst [vmem:[#allocation62_spill] sm:$0xff] %v5257_v1 }
 0x9a9   : > { %1669 = vadd.xlane.f32.xlu1 %v1668_v39 }
 0x9aa   : > { %v5260_v49 = vpop.permute.xlu0 %2482 }
 0x9ab   : > { %6228 = vst [vmem:[#allocation63_spill] sm:$0xff] %v5260_v49 }
 0x9ae   : > { %v2349_v18 = vpop.permute.xlu0 %2348 }
 0x9af   : > { %v2371_v52 = vsel %vm658_vm2, %v2349_v18, 0.0 }
 0x9b0   : > { %2372 = vadd.xlane.f32.xlu0 %v2371_v52 }
 0x9ba   : > { %3898 = vrot.lane.b32.xlu1 %v6229_v59, %s6167_s27 }
 0x9d0   : > { %v5275_v48 = vpop.xlane.xlu1 %1594 }
 0x9d1   : > { %6231 = vst [vmem:[#allocation64_spill] sm:$0xff] %v5275_v48 }
 0x9d4   : > { %v5277_v3 = vpop.permute.xlu1 %2480 }
 0x9d5   : > { %6232 = vst [vmem:[#allocation65_spill] sm:$0xff] %v5277_v3 }
 0x9d8   : > { %v2283_v39 = vpop.permute.xlu1 %2282 }
 0x9d9   : > { %v2305_v18 = vsel %vm658_vm2, %v2283_v39, 0.0 }
 0x9da   : > { %2306 = vadd.xlane.f32.xlu0 %v2305_v18 }
 0x9df   : > { %v5280_v53 = vpop.xlane.xlu0 %1597 }
 0x9e0   : > { %6233 = vst [vmem:[#allocation66_spill] sm:$0xff] %v5280_v53 }
 0x9e3   : > { %v2358_v4 = vpop.xlane.xlu0 %2357 }
 0x9e4   : > { %v2374_v18 = vmul.f32 0.0625, %v2358_v4 }
 0x9e7   : > { %v2292_v52 = vpop.xlane.xlu0 %2291 }
 0x9eb   : > { %v1658_v26 = vpop.xlane.xlu0 %1657 }
 0x9ec   : > { %v1672_v59 = vmul.f32 0.0625, %v1658_v26 }
 0x9ee   : > { %v1678_v49 = vadd.f32 1.1920929e-07, %v1672_v59  ;;  %v2380_v59 = vadd.f32 1.1920929e-07, %v2374_v18 }
 0x9f0   : > { %4074 = vrsqrt.f32 %v1678_v49  ;;  %v2308_v49 = vmul.f32 0.0625, %v2292_v52 }
 0x9f2   : > { %v2314_v45 = vadd.f32 1.1920929e-07, %v2308_v49 }
 0x9fa   : > { %v4075_v1 = vpop.eup %4074 }
 0x9fb   : > { %v5283_v10 = vmul.f32 %v4075_v1, %v5062_v14 }
 0x9fd   : > { %v1879_v48 = vmul.f32 %v4835_v30, %v5283_v10  ;;  %v1957_v39 = vmul.f32 %v5032_v24, %v5283_v10  ;;  %v1664_v30 = vpop.xlane.xlu0 %1663 }
 0x9fe   : > { %v1674_v24 = vmul.f32 0.0625, %v1664_v30 }
 0x9ff   : > { %1892 = vrot.lane.b32.xlu0 %v1879_v48, %s6234_s24 }
 0xa00   : > { %v1680_v52 = vadd.f32 1.1920929e-07, %v1674_v24 }
 0xa01   : > { %v2367_v4 = vpop.xlane.xlu0 %2366 }
 0xa03   : > { %1970 = vrot.lane.b32.xlu0 %v1957_v39, %s6169_s0 }
 0xa05   : > { %v2301_v49 = vpop.xlane.xlu0 %2300 }
 0xa09   : > { %v1655_v3 = vpop.xlane.xlu1 %1654 }
 0xa0a   : > { %v1671_v53 = vmul.f32 0.0625, %v1655_v3 }
 0xa0c   : > { %v1677_v26 = vadd.f32 1.1920929e-07, %v1671_v53 }
 0xa0d   : > { %v2361_v29 = vpop.xlane.xlu1 %2360 }
 0xa0e   : > { %4076 = vrsqrt.f32 %v1677_v26  ;;  %v2375_v1 = vmul.f32 0.0625, %v2361_v29 }
 0xa0f   : > { %4078 = vrsqrt.f32 %v2380_v59 }
 0xa10   : > { %v2381_v27 = vadd.f32 1.1920929e-07, %v2375_v1 }
 0xa11   : > { %v2295_v25 = vpop.xlane.xlu1 %2294 }
 0xa12   : > { %4080 = vrsqrt.f32 %v2381_v27  ;;  %v2309_v48 = vmul.f32 0.0625, %v2295_v25 }
 0xa13   : > { %4082 = vrsqrt.f32 %v2314_v45 }
 0xa14   : > { %v2315_v43 = vadd.f32 1.1920929e-07, %v2309_v48 }
 0xa15   : > { %v1661_v39 = vpop.xlane.xlu1 %1660 }
 0xa16   : > { %4084 = vrsqrt.f32 %v2315_v43  ;;  %v1673_v18 = vmul.f32 0.0625, %v1661_v39  ;;  %v2377_v43 = vmul.f32 0.0625, %v2367_v4  ;;  %v2311_v39 = vmul.f32 0.0625, %v2301_v49 }
 0xa17   : > { %4086 = vrsqrt.f32 %v1680_v52 }
 0xa18   : > { %v4077_v3 = vpop.eup %4076  ;;  %v1679_v27 = vadd.f32 1.1920929e-07, %v1673_v18  ;;  %v2383_v4 = vadd.f32 1.1920929e-07, %v2377_v43 }
 0xa19   : > { %v5292_v53 = vmul.f32 %v4077_v3, %v5056_v35  ;;  %v4079_v29 = vpop.eup %4078  ;;  %v2364_v45 = vpop.xlane.xlu1 %2363 }
 0xa1a   : > { %v5301_v30 = vmul.f32 %v4079_v29, %v5056_v35  ;;  %4088 = vrsqrt.f32 %v1679_v27 }
 0xa1b   : > { %v1878_v26 = vmul.f32 %v5030_v17, %v5292_v53  ;;  %v1956_v48 = vmul.f32 %v4845_v31, %v5292_v53  ;;  %4090 = vrsqrt.f32 %v2383_v4 }
 0xa1c   : > { %v4081_v59 = vpop.eup %4080  ;;  %v2653_v31 = vmul.f32 %v5044_v38, %v5301_v30  ;;  %v2731_v27 = vmul.f32 %v5058_v15, %v5301_v30 }
 0xa1d   : > { %v5297_v25 = vmul.f32 %v4081_v59, %v5062_v14  ;;  %1890 = vrot.lane.b32.xlu1 %v1878_v26, %s6234_s24  ;;  %v4083_v1 = vpop.eup %4082  ;;  %v2376_v59 = vmul.f32 0.0625, %v2364_v45  ;;  %v2298_v29 = vpop.xlane.xlu1 %2297  ;;  %v2317_v26 = vadd.f32 1.1920929e-07, %v2311_v39 }
 0xa1e   : > { %v2326_v52 = vmul.f32 %v4083_v1, %v5056_v35  ;;  %v2310_v45 = vmul.f32 0.0625, %v2298_v29 }
 0xa1f   : > { %v2654_v17 = vmul.f32 %v5050_v5, %v5297_v25  ;;  %v2732_v5 = vmul.f32 %v5054_v9, %v5297_v25  ;;  %v2382_v49 = vadd.f32 1.1920929e-07, %v2376_v59  ;;  %4092 = vrsqrt.f32 %v2317_v26 }
 0xa20   : > { %v4085_v24 = vpop.eup %4084  ;;  %v5319_v43 = vmul.f32 0.25, %v2326_v52  ;;  %v2316_v9 = vadd.f32 1.1920929e-07, %v2310_v45 }
 0xa21   : > { %v2327_v3 = vmul.f32 %v4085_v24, %v5062_v14  ;;  %1968 = vrot.lane.b32.xlu1 %v1956_v48, %s6169_s0  ;;  %2667 = vrot.lane.b32.xlu0 %v2654_v17, %s6234_s24  ;;  %v4087_v38 = vpop.eup %4086  ;;  %4094 = vrsqrt.f32 %v2382_v49 }
 0xa22   : > { %v5328_v48 = vmul.f32 %v4087_v38, %v5082_v16  ;;  %v2440_v17 = vmul.f32 %v5110_v8, %v5319_v43  ;;  %4096 = vrsqrt.f32 %v2316_v9  ;;  %v2518_v59 = vmul.f32 %v5114_v42, %v5319_v43 }
 0xa23   : > { %v5311_v18 = vmul.f32 0.25, %v2327_v3 }
 0xa24   : > { %v4089_v24 = vpop.eup %4088  ;;  %v1881_v8 = vmul.f32 %v4851_v33, %v5328_v48  ;;  %v1959_v42 = vmul.f32 %v5036_v37, %v5328_v48 }
 0xa25   : > { %2665 = vrot.lane.b32.xlu1 %v2653_v31, %s6234_s24  ;;  %2745 = vrot.lane.b32.xlu0 %v2732_v5, %s6169_s0  ;;  %v2441_v1 = vmul.f32 %v5108_v41, %v5311_v18  ;;  %v2519_v15 = vmul.f32 %v5112_v58, %v5311_v18  ;;  %v5337_v39 = vmul.f32 %v4089_v24, %v5078_v28  ;;  %v4091_v4 = vpop.eup %4090 }
 0xa26   : > { %v5348_v5 = vmul.f32 %v4091_v4, %v5082_v16 }
 0xa27   : > { %v1880_v26 = vmul.f32 %v5034_v40, %v5337_v39  ;;  %v1958_v38 = vmul.f32 %v4861_v36, %v5337_v39 }
 0xa28   : > { %v2656_v40 = vmul.f32 %v5074_v12, %v5348_v5 }
 0xa29   : > { %2743 = vrot.lane.b32.xlu1 %v2731_v27, %s6169_s0  ;;  %2454 = vrot.lane.b32.xlu0 %v2441_v1, %s6234_s24  ;;  %v4093_v58 = vpop.eup %4092 }
 0xa2a   : > { %v1667_v3 = vpop.xlane.xlu0 %1666  ;;  %v2329_v33 = vmul.f32 %v4093_v58, %v5082_v16 }
 0xa2b   : > { %v1675_v52 = vmul.f32 0.0625, %v1667_v3  ;;  %v4095_v31 = vpop.eup %4094 }
 0xa2c   : > { %v5358_v49 = vmul.f32 %v4095_v31, %v5078_v28  ;;  %v4097_v9 = vpop.eup %4096 }
 0xa2d   : > { %2452 = vrot.lane.b32.xlu1 %v2440_v17, %s6234_s24  ;;  %2532 = vrot.lane.b32.xlu0 %v2519_v15, %s6169_s0  ;;  %v1681_v45 = vadd.f32 1.1920929e-07, %v1675_v52  ;;  %v2734_v17 = vmul.f32 %v5080_v62, %v5348_v5  ;;  %v5368_v15 = vmul.f32 0.25, %v2329_v33  ;;  %v1599_v52 = vmul.f32 0.0625, %v5242_v11 }
 0xa2e   : > { %v2370_v41 = vpop.xlane.xlu1 %2369  ;;  %v2655_v36 = vmul.f32 %v5066_v60, %v5358_v49  ;;  %v2733_v31 = vmul.f32 %v5089_v47, %v5358_v49 }
 0xa2f   : > { %4098 = vrsqrt.f32 %v1681_v45  ;;  %v2378_v24 = vmul.f32 0.0625, %v2370_v41  ;;  %v2521_v47 = vmul.f32 %v5121_v13, %v5368_v15 }
 0xa31   : > { %2530 = vrot.lane.b32.xlu1 %v2518_v59, %s6169_s0  ;;  %1896 = vrot.lane.b32.xlu0 %v1881_v8, %s6234_s24  ;;  %v2328_v59 = vmul.f32 %v4097_v9, %v5078_v28  ;;  %v2384_v62 = vadd.f32 1.1920929e-07, %v2378_v24 }
 0xa32   : > { %v5345_v29 = vpop.xlane.xlu1 %2303 }
 0xa33   : > { %v5380_v60 = vmul.f32 0.25, %v2328_v59 }
 0xa35   : > { %1894 = vrot.lane.b32.xlu1 %v1880_v26, %s6234_s24  ;;  %1974 = vrot.lane.b32.xlu0 %v1959_v42, %s6169_s0  ;;  %v2443_v26 = vmul.f32 %v5118_v21, %v5368_v15 }
 0xa36   : > { %v1670_v27 = vpop.xlane.xlu1 %1669 }
 0xa37   : > { %v1676_v1 = vmul.f32 0.0625, %v1670_v27 }
 0xa39   : > { %v1682_v37 = vadd.f32 1.1920929e-07, %v1676_v1  ;;  %1972 = vrot.lane.b32.xlu1 %v1958_v38, %s6169_s0  ;;  %2671 = vrot.lane.b32.xlu0 %v2656_v40, %s6234_s24  ;;  %v4099_v11 = vpop.eup %4098  ;;  %v1600_v1 = vmul.f32 0.0625, %v5236_v50 }
 0xa3a   : > { %v3899_v3 = vpop.permute.xlu1 %3898  ;;  %v5401_v45 = vmul.f32 %v4099_v11, %v5094_v20  ;;  %v6239_v11 = vld [vmem:[#allocation17_spill] sm:$0xff] }
 0xa3b   : > { %4100 = vrsqrt.f32 %v1682_v37  ;;  %v3901_v12 = vunpack.i.h.bf16 %v3899_v3  ;;  %v3900_v8 = vunpack.i.l.bf16 %v3899_v3 }
 0xa3c   : > { %4102 = vrsqrt.f32 %v2384_v62  ;;  %v1882_v40 = vmul.f32 %v5038_v54, %v5401_v45  ;;  %v1960_v50 = vmul.f32 %v5042_v0, %v5401_v45  ;;  %v2312_v54 = vmul.f32 0.0625, %v5345_v29  ;;  %v4174_v62 = vld [vmem:[%s6105_s13] sm:$0xff] }
 0xa3d   : > { %v1375_v4 = vsel %vm658_vm2, %v5028_v61, %v3901_v12  ;;  %v1374_v58 = vsel %vm658_vm2, %v5026_v56, %v3900_v8  ;;  %2669 = vrot.lane.b32.xlu1 %v2655_v36, %s6234_s24  ;;  %2749 = vrot.lane.b32.xlu0 %v2734_v17, %s6169_s0  ;;  %v1605_v56 = vadd.f32 1.1920929e-07, %v1599_v52  ;;  %v2442_v61 = vmul.f32 %v5116_v44, %v5380_v60  ;;  %v2373_v42 = vpop.xlane.xlu0 %2372  ;;  %v6235_v8 = vld [vmem:[#allocation16_spill] sm:$0xff]  ;;  %v4175_v52 = vld [vmem:[%s6105_s13 + $0x8] sm:$0xff] }
 0xa3e   : > { %v1376_v41 = vpack.c.bf16 %v1375_v4, %v1374_v58  ;;  %v2379_v27 = vmul.f32 0.0625, %v2373_v42  ;;  %v2520_v44 = vmul.f32 %v5124_v22, %v5380_v60  ;;  %v1606_v22 = vadd.f32 1.1920929e-07, %v1600_v1  ;;  %v6236_v4 = vld [vmem:[#allocation38_spill] sm:$0xff]  ;;  %v6240_v42 = vld [vmem:[#allocation29_spill] sm:$0xff] }
 0xa3f   : > { %4104 = vrsqrt.f32 %v1605_v56  ;;  %v2318_v0 = vadd.f32 1.1920929e-07, %v2312_v54  ;;  %v6237_v56 = vld [vmem:[#allocation18_spill] sm:$0xff] }
 0xa40   : > { %3654 = vmatmul.mubr.msk.bf16.vlgmr.msra.gmra.mrb[12].mxu0 %vm504_vm0, %v1376_v41  ;;  %v2385_v38 = vadd.f32 1.1920929e-07, %v2379_v27  ;;  %v6241_v1 = vld [vmem:[#allocation26_spill] sm:$0xff] }
 0xa41   : > { %2747 = vrot.lane.b32.xlu1 %v2733_v31, %s6169_s0  ;;  %2458 = vrot.lane.b32.xlu0 %v2443_v26, %s6234_s24 }
 0xa42   : > { %3679 = vmatprep.mubr.msk.bf16.mxu0 %vm4256_vm1, %v6230_v57  ;;  %4106 = vrsqrt.f32 %v2385_v38 }
 0xa43   : > { %4108 = vrsqrt.f32 %v1606_v22  ;;  %v6243_v22 = vld [vmem:[#allocation23_spill] sm:$0xff] }
 0xa44   : > { %4110 = vrsqrt.f32 %v2318_v0  ;;  %v6245_v0 = vld [vmem:[#allocation60_spill] sm:$0xff] }
 0xa45   : > { %v4101_v21 = vpop.eup %4100  ;;  %2456 = vrot.lane.b32.xlu1 %v2442_v61, %s6234_s24  ;;  %2536 = vrot.lane.b32.xlu0 %v2521_v47, %s6169_s0  ;;  %v6238_v61 = vld [vmem:[#allocation27_spill] sm:$0xff] }
 0xa46   : > { %v5398_v33 = vmul.f32 %v4101_v21, %v5098_v23  ;;  %v4103_v9 = vpop.eup %4102 }
 0xa48   : > { %v1883_v13 = vmul.f32 %v4917_v2, %v5398_v33  ;;  %v1961_v37 = vmul.f32 %v5040_v63, %v5398_v33  ;;  %v5417_v2 = vmul.f32 %v4103_v9, %v5094_v20 }
 0xa49   : > { %2534 = vrot.lane.b32.xlu1 %v2520_v44, %s6169_s0  ;;  %v4105_v17 = vpop.eup %4104 }
 0xa4a   : > { %1900 = vrot.lane.b32.xlu0 %v1883_v13, %s6234_s24  ;;  %v2657_v63 = vmul.f32 %v5096_v51, %v5417_v2  ;;  %v1617_v24 = vmul.f32 %v4105_v17, %v5056_v35  ;;  %v2735_v3 = vmul.f32 %v5106_v34, %v5417_v2  ;;  %v6244_v17 = vld [vmem:[#allocation22_spill] sm:$0xff] }
 0xa4b   : > { %v1854_v54 = vmul.f32 %v6244_v17, %v5292_v53 }
 0xa4c   : > { %v5433_v36 = vmul.f32 0.25, %v1617_v24  ;;  %v4107_v59 = vpop.eup %4106 }
 0xa4d   : > { %1898 = vrot.lane.b32.xlu1 %v1882_v40, %s6234_s24  ;;  %v4109_v51 = vpop.eup %4108  ;;  %v5439_v35 = vmul.f32 %v4107_v59, %v5098_v23  ;;  %v6242_v40 = vld [vmem:[#allocation28_spill] sm:$0xff] }
 0xa4e   : > { %1978 = vrot.lane.b32.xlu0 %v1961_v37, %s6169_s0  ;;  %v1618_v34 = vmul.f32 %v4109_v51, %v5062_v14  ;;  %v4111_v12 = vpop.eup %4110  ;;  %v1791_v41 = vmul.f32 %v4174_v62, %v5433_v36 }
 0xa4f   : > { %v2658_v29 = vmul.f32 %v5092_v19, %v5439_v35  ;;  %v2330_v58 = vmul.f32 %v4111_v12, %v5094_v20 }
 0xa51   : > { %1976 = vrot.lane.b32.xlu1 %v1960_v50, %s6169_s0  ;;  %v5472_v26 = vmul.f32 0.25, %v2330_v58  ;;  %v1855_v50 = vmul.f32 %v6243_v22, %v5283_v10 }
 0xa52   : > { %2406 = vrot.lane.b32.xlu0 %v4963_v6, %s6167_s27 }
 0xa53   : > { %v2444_v47 = vmul.f32 %v6238_v61, %v5472_v26  ;;  %v2522_v21 = vmul.f32 %v6240_v42, %v5472_v26 }
 0xa55   : > { %2673 = vrot.lane.b32.xlu1 %v2657_v63, %s6234_s24 }
 0xa56   : > { %2484 = vrot.lane.b32.xlu0 %v4963_v6, %s6168_s26  ;;  %v1725_v6 = vmul.f32 %v5170_v7, %v5433_v36  ;;  %v2736_v7 = vmul.f32 %v5104_v32, %v5439_v35 }
 0xa59   : > { %2751 = vrot.lane.b32.xlu1 %v2735_v3, %s6169_s0  ;;  %v1601_v3 = vmul.f32 0.0625, %v6245_v0 }
 0xa5a   : > { %1767 = vrot.lane.b32.xlu0 %v4887_v46, %s6169_s0  ;;  %v5452_v46 = vmul.f32 0.25, %v1618_v34 }
 0xa5c   : > { %v1726_v19 = vmul.f32 %v6236_v4, %v5452_v46  ;;  %v1792_v31 = vmul.f32 %v4175_v52, %v5452_v46  ;;  %v1607_v4 = vadd.f32 1.1920929e-07, %v1601_v3 }
 0xa5d   : > { %2408 = vrot.lane.b32.xlu1 %v4972_v55, %s6167_s27 }
 0xa5e   : > { %1737 = vrot.lane.b32.xlu0 %v1725_v6, %s6234_s24  ;;  %v6246_v6 = vld [vmem:[#allocation24_spill] sm:$0xff] }
 0xa5f   : > { %v1933_v34 = vmul.f32 %v6246_v6, %v5283_v10 }
 0xa61   : > { %2486 = vrot.lane.b32.xlu1 %v4972_v55, %s6168_s26 }
 0xa62   : > { %2675 = vrot.lane.b32.xlu0 %v2658_v29, %s6234_s24 }
 0xa65   : > { %1769 = vrot.lane.b32.xlu1 %v6235_v8, %s6169_s0 }
 0xa66   : > { %2753 = vrot.lane.b32.xlu0 %v2736_v7, %s6169_s0  ;;  %v6247_v7 = vld [vmem:[#allocation25_spill] sm:$0xff] }
 0xa67   : > { %v2307_v14 = vpop.xlane.xlu0 %2306  ;;  %v1932_v12 = vmul.f32 %v6247_v7, %v5292_v53 }
 0xa68   : > { %v2313_v55 = vmul.f32 0.0625, %v2307_v14 }
 0xa69   : > { %1739 = vrot.lane.b32.xlu1 %v1726_v19, %s6234_s24 }
 0xa6a   : > { %v2319_v32 = vadd.f32 1.1920929e-07, %v2313_v55  ;;  %1803 = vrot.lane.b32.xlu0 %v1791_v41, %s6169_s0  ;;  %v6248_v55 = vld [vmem:[#allocation61_spill] sm:$0xff] }
 0xa6b   : > { %v1602_v62 = vmul.f32 0.0625, %v6248_v55 }
 0xa6c   : > { %4112 = vrsqrt.f32 %v2319_v32  ;;  %v6249_v32 = vld [vmem:[#allocation39_spill] sm:$0xff] }
 0xa6d   : > { %1805 = vrot.lane.b32.xlu1 %v1792_v31, %s6169_s0  ;;  %v2630_v52 = vmul.f32 %v6249_v32, %v5297_v25  ;;  %v6250_v31 = vld [vmem:[#allocation40_spill] sm:$0xff]  ;;  %4114 = vrsqrt.f32 %v1607_v4 }
 0xa6e   : > { %1771 = vrot.lane.b32.xlu0 %v6237_v56, %s6169_s0  ;;  %v2629_v10 = vmul.f32 %v6250_v31, %v5301_v30 }
 0xa71   : > { %1773 = vrot.lane.b32.xlu1 %v6239_v11, %s6169_s0  ;;  %v1893_v37 = vpop.permute.xlu0 %1892  ;;  %v1608_v11 = vadd.f32 1.1920929e-07, %v1602_v62  ;;  %v6258_v62 = vld [vmem:[#allocation30_spill] sm:$0xff] }
 0xa72   : > { %2460 = vrot.lane.b32.xlu0 %v2444_v47, %s6234_s24  ;;  %v1909_v59 = vadd.f32 %v1893_v37, %v1855_v50  ;;  %v6253_v50 = vld [vmem:[#allocation55_spill] sm:$0xff] }
 0xa73   : > { %4116 = vrsqrt.f32 %v1608_v11  ;;  %v2417_v17 = vmul.f32 %v6253_v50, %v5311_v18 }
 0xa75   : > { %v1971_v63 = vpop.permute.xlu0 %1970 }
 0xa76   : > { %v4113_v27 = vpop.eup %4112  ;;  %2538 = vrot.lane.b32.xlu0 %v2522_v21, %s6169_s0  ;;  %v1987_v19 = vsub.f32 %v1933_v34, %v1971_v63  ;;  %v6251_v21 = vld [vmem:[#allocation41_spill] sm:$0xff]  ;;  %v6256_v34 = vld [vmem:[#allocation58_spill] sm:$0xff] }
 0xa77   : > { %v2331_v44 = vmul.f32 %v4113_v27, %v5098_v23  ;;  %v2708_v27 = vmul.f32 %v6251_v21, %v5297_v25 }
 0xa79   : > { %v5486_v13 = vmul.f32 0.25, %v2331_v44  ;;  %v6252_v44 = vld [vmem:[#allocation42_spill] sm:$0xff] }
 0xa7b   : > { %v2445_v38 = vmul.f32 %v6241_v1, %v5486_v13  ;;  %v2523_v9 = vmul.f32 %v6242_v40, %v5486_v13  ;;  %v2707_v1 = vmul.f32 %v6252_v44, %v5301_v30  ;;  %v4115_v30 = vpop.eup %4114 }
 0xa7c   : > { %v1619_v4 = vmul.f32 %v4115_v30, %v5078_v28  ;;  %v6259_v28 = vld [vmem:[#allocation32_spill] sm:$0xff] }
 0xa7d   : > { %2462 = vrot.lane.b32.xlu1 %v2445_v38, %s6234_s24  ;;  %v4117_v32 = vpop.eup %4116  ;;  %v6265_v30 = vld [vmem:[#allocation48_spill] sm:$0xff] }
 0xa81   : > { %2540 = vrot.lane.b32.xlu1 %v2523_v9, %s6169_s0 }
 0xa8f   : > { %v1891_v24 = vpop.permute.xlu1 %1890 }
 0xa90   : > { %v1908_v51 = vadd.f32 %v1891_v24, %v1854_v54  ;;  %v6254_v54 = vld [vmem:[#allocation56_spill] sm:$0xff] }
 0xa91   : > { %v2416_v63 = vmul.f32 %v6254_v54, %v5319_v43 }
 0xa92   : > { %v3902_v29 = vpack.i.bf16 %v1909_v59, %v1908_v51  ;;  %v6255_v51 = vld [vmem:[#allocation57_spill] sm:$0xff] }
 0xa93   : > { %v1969_v8 = vpop.permute.xlu1 %1968  ;;  %v2668_v14 = vpop.permute.xlu0 %2667  ;;  %v2495_v6 = vmul.f32 %v6255_v51, %v5311_v18  ;;  %v2709_v51 = vmul.f32 %v6265_v30, %v5358_v49 }
 0xa94   : > { %v1986_v58 = vsub.f32 %v1932_v12, %v1969_v8  ;;  %3903 = vrot.lane.b32.xlu1 %v3902_v29, %s6170_s21  ;;  %v2684_v53 = vadd.f32 %v2668_v14, %v2630_v52  ;;  %v2494_v29 = vmul.f32 %v6256_v34, %v5319_v43  ;;  %v5537_v43 = vmul.f32 0.25, %v1619_v4 }
 0xa96   : > { %v3907_v41 = vpack.i.bf16 %v1987_v19, %v1986_v58  ;;  %v6257_v58 = vld [vmem:[#allocation31_spill] sm:$0xff] }
 0xa97   : > { %v2666_v56 = vpop.permute.xlu1 %2665  ;;  %v2746_v61 = vpop.permute.xlu0 %2745  ;;  %v1857_v55 = vmul.f32 %v6257_v58, %v5328_v48 }
 0xa98   : > { %v2683_v47 = vadd.f32 %v2666_v56, %v2629_v10  ;;  %3908 = vrot.lane.b32.xlu0 %v3907_v41, %s6170_s21  ;;  %v2762_v9 = vsub.f32 %v2708_v27, %v2746_v61  ;;  %v1856_v41 = vmul.f32 %v6258_v62, %v5337_v39  ;;  %v1620_v56 = vmul.f32 %v4117_v32, %v5082_v16  ;;  %v6262_v16 = vld [vmem:[#allocation45_spill] sm:$0xff] }
 0xa9a   : > { %v3912_v42 = vpack.i.bf16 %v2684_v53, %v2683_v47  ;;  %v1935_v53 = vmul.f32 %v6259_v28, %v5328_v48  ;;  %v6260_v47 = vld [vmem:[#allocation33_spill] sm:$0xff]  ;;  %v6263_v48 = vld [vmem:[#allocation46_spill] sm:$0xff]  ;;  %v6271_v28 = vld [vmem:[#allocation63_spill] sm:$0xff] }
 0xa9b   : > { %v2744_v38 = vpop.permute.xlu1 %2743  ;;  %v2455_v40 = vpop.permute.xlu0 %2454  ;;  %v1934_v11 = vmul.f32 %v6260_v47, %v5337_v39  ;;  %v6272_v47 = vld [vmem:[#allocation65_spill] sm:$0xff] }
 0xa9c   : > { %v2761_v37 = vsub.f32 %v2707_v1, %v2744_v38  ;;  %3913 = vrot.lane.b32.xlu0 %v3912_v42, %s6171_s6  ;;  %v5519_v25 = vadd.f32 %v2455_v40, %v2417_v17  ;;  %v6261_v1 = vld [vmem:[#allocation44_spill] sm:$0xff]  ;;  %v5547_v40 = vmul.f32 0.25, %v1620_v56 }
 0xa9d   : > { %v1727_v38 = vmul.f32 %v6261_v1, %v5537_v43 }
 0xa9e   : > { %v3917_v22 = vpack.i.bf16 %v2762_v9, %v2761_v37  ;;  %v2632_v37 = vmul.f32 %v6262_v16, %v5348_v5 }
 0xa9f   : > { %v2453_v24 = vpop.permute.xlu1 %2452  ;;  %v2533_v0 = vpop.permute.xlu0 %2532 }
 0xaa0   : > { %v5521_v3 = vadd.f32 %v2453_v24, %v2416_v63  ;;  %3918 = vrot.lane.b32.xlu1 %v3917_v22, %s6171_s6  ;;  %v2549_v8 = vsub.f32 %v2495_v6, %v2533_v0  ;;  %v2631_v22 = vmul.f32 %v6263_v48, %v5358_v49  ;;  %v6264_v24 = vld [vmem:[#allocation47_spill] sm:$0xff] }
 0xaa1   : > { %v2710_v0 = vmul.f32 %v6264_v24, %v5348_v5  ;;  %v6266_v6 = vld [vmem:[#allocation43_spill] sm:$0xff]  ;;  %v6276_v24 = vld [vmem:[#allocation37_spill] sm:$0xff] }
 0xaa2   : > { %v3962_v59 = vpack.i.bf16 %v5519_v25, %v5521_v3  ;;  %v1728_v34 = vmul.f32 %v6266_v6, %v5547_v40  ;;  %v6269_v5 = vld [vmem:[#allocation59_spill] sm:$0xff] }
 0xaa3   : > { %v2531_v7 = vpop.permute.xlu1 %2530  ;;  %v1897_v12 = vpop.permute.xlu0 %1896 }
 0xaa4   : > { %v2548_v14 = vsub.f32 %v2494_v29, %v2531_v7  ;;  %v1911_v31 = vadd.f32 %v1897_v12, %v1857_v55  ;;  %v6268_v55 = vld [vmem:[#allocation62_spill] sm:$0xff] }
 0xaa5   : > { %v2419_v62 = vmul.f32 %v6268_v55, %v5368_v15 }
 0xaa6   : > { %v5531_v19 = vpack.i.bf16 %v2549_v8, %v2548_v14  ;;  %v6267_v14 = vld [vmem:[#allocation64_spill] sm:$0xff] }
 0xaa7   : > { %v1895_v52 = vpop.permute.xlu1 %1894  ;;  %v1975_v18 = vpop.permute.xlu0 %1974  ;;  %v1603_v4 = vmul.f32 0.0625, %v6267_v14 }
 0xaa8   : > { %v1910_v10 = vadd.f32 %v1895_v52, %v1856_v41  ;;  %v1989_v27 = vsub.f32 %v1935_v53, %v1975_v18  ;;  %v2418_v41 = vmul.f32 %v6269_v5, %v5380_v60  ;;  %v2497_v53 = vmul.f32 %v6271_v28, %v5368_v15 }
 0xaaa   : > { %v3922_v61 = vpack.i.bf16 %v1911_v31, %v1910_v10  ;;  %v1609_v31 = vadd.f32 1.1920929e-07, %v1603_v4  ;;  %v6270_v10 = vld [vmem:[#allocation66_spill] sm:$0xff]  ;;  %v4177_v4 = vld [vmem:[%s6105_s13 + $0x18] sm:$0xff] }
 0xaab   : > { %v1973_v42 = vpop.permute.xlu1 %1972  ;;  %v2672_v21 = vpop.permute.xlu0 %2671  ;;  %v1604_v56 = vmul.f32 0.0625, %v6270_v10  ;;  %v1794_v55 = vmul.f32 %v4177_v4, %v5547_v40 }
 0xaac   : > { %v1988_v44 = vsub.f32 %v1934_v11, %v1973_v42  ;;  %3923 = vrot.lane.b32.xlu0 %v3922_v61, %s6170_s21  ;;  %v2686_v17 = vadd.f32 %v2672_v21, %v2632_v37  ;;  %v2496_v11 = vmul.f32 %v6272_v47, %v5380_v60  ;;  %4118 = vrsqrt.f32 %v1609_v31  ;;  %v6274_v37 = vld [vmem:[#allocation35_spill] sm:$0xff] }
 0xaad   : > { %v1610_v1 = vadd.f32 1.1920929e-07, %v1604_v56  ;;  %v1858_v48 = vmul.f32 %v6274_v37, %v5401_v45  ;;  %v6277_v56 = vld [vmem:[#allocation50_spill] sm:$0xff] }
 0xaae   : > { %v3927_v9 = vpack.i.bf16 %v1989_v27, %v1988_v44 }
 0xaaf   : > { %v2670_v50 = vpop.permute.xlu1 %2669  ;;  %v2750_v39 = vpop.permute.xlu0 %2749  ;;  %4120 = vrsqrt.f32 %v1610_v1  ;;  %v4180_v1 = vld [vmem:[%s6105_s13 + $0x20] sm:$0xff] }
 0xab0   : > { %v2685_v54 = vadd.f32 %v2670_v50, %v2631_v22  ;;  %1741 = vrot.lane.b32.xlu0 %v1727_v38, %s6234_s24  ;;  %3928 = vrot.lane.b32.xlu1 %v3927_v9, %s6170_s21  ;;  %v2764_v12 = vsub.f32 %v2710_v0, %v2750_v39  ;;  %v6273_v9 = vld [vmem:[#allocation34_spill] sm:$0xff]  ;;  %v1936_v0 = vmul.f32 %v6276_v24, %v5401_v45 }
 0xab1   : > { %v1859_v16 = vmul.f32 %v6273_v9, %v5398_v33 }
 0xab2   : > { %v3942_v63 = vpack.i.bf16 %v2686_v17, %v2685_v54  ;;  %v6275_v17 = vld [vmem:[#allocation36_spill] sm:$0xff] }
 0xab3   : > { %v2748_v29 = vpop.permute.xlu1 %2747  ;;  %v2459_v7 = vpop.permute.xlu0 %2458  ;;  %v1937_v54 = vmul.f32 %v6275_v17, %v5398_v33 }
 0xab4   : > { %v2763_v8 = vsub.f32 %v2709_v51, %v2748_v29  ;;  %1743 = vrot.lane.b32.xlu1 %v1728_v34, %s6234_s24  ;;  %v5567_v52 = vadd.f32 %v2459_v7, %v2419_v62  ;;  %v4176_v7 = vld [vmem:[%s6105_s13 + $0x10] sm:$0xff] }
 0xab6   : > { %v3947_v58 = vpack.i.bf16 %v2764_v12, %v2763_v8  ;;  %v1793_v12 = vmul.f32 %v4176_v7, %v5537_v43  ;;  %v4119_v8 = vpop.eup %4118 }
 0xab7   : > { %v2457_v32 = vpop.permute.xlu1 %2456  ;;  %v2537_v49 = vpop.permute.xlu0 %2536  ;;  %v1621_v45 = vmul.f32 %v4119_v8, %v5094_v20  ;;  %v5612_v20 = vld [vmem:[%s6104_s12 + $0x20] sm:$0xff] }
 0xab8   : > { %v5569_v18 = vadd.f32 %v2457_v32, %v2418_v41  ;;  %v2551_v21 = vsub.f32 %v2497_v53, %v2537_v49  ;;  %v6278_v53 = vld [vmem:[#allocation52_spill] sm:$0xff] }
 0xab9   : > { %v4121_v62 = vpop.eup %4120  ;;  %v5606_v32 = vmul.f32 0.25, %v1621_v45  ;;  %v4183_v45 = vld [vmem:[%s6104_s12 + $0x8] sm:$0xff] }
 0xaba   : > { %v3972_v61 = vpack.i.bf16 %v5567_v52, %v5569_v18  ;;  %v1622_v49 = vmul.f32 %v4121_v62, %v5098_v23  ;;  %v2633_v23 = vmul.f32 %v6278_v53, %v5417_v2  ;;  %v1696_v4 = vmul.f32 %v4183_v45, %v5452_v46 }
 0xabb   : > { %v2535_v42 = vpop.permute.xlu1 %2534  ;;  %v1729_v28 = vmul.f32 %v6277_v56, %v5606_v32  ;;  %v1795_v9 = vmul.f32 %v4180_v1, %v5606_v32 }
 0xabc   : > { %v2550_v27 = vsub.f32 %v2496_v11, %v2535_v42  ;;  %v1901_v44 = vpop.permute.xlu0 %1900  ;;  %v6279_v11 = vld [vmem:[#allocation51_spill] sm:$0xff] }
 0xabd   : > { %v1913_v50 = vadd.f32 %v1901_v44, %v1859_v16  ;;  %v2634_v42 = vmul.f32 %v6279_v11, %v5439_v35  ;;  %v6280_v16 = vld [vmem:[#allocation49_spill] sm:$0xff] }
 0xabe   : > { %v5578_v38 = vpack.i.bf16 %v2551_v21, %v2550_v27  ;;  %v5629_v21 = vld [vmem:[%s6104_s12 + $0x28] sm:$0xff] }
 0xabf   : > { %v1899_v22 = vpop.permute.xlu1 %1898 }
 0xac0   : > { %v1912_v15 = vadd.f32 %v1899_v22, %v1858_v48  ;;  %v1979_v39 = vpop.permute.xlu0 %1978  ;;  %v6281_v48 = vld [vmem:[#allocation54_spill] sm:$0xff] }
 0xac1   : > { %v1991_v51 = vsub.f32 %v1937_v54, %v1979_v39  ;;  %v2711_v22 = vmul.f32 %v6281_v48, %v5417_v2  ;;  %v6282_v39 = vld [vmem:[#allocation53_spill] sm:$0xff] }
 0xac2   : > { %v3932_v60 = vpack.i.bf16 %v1913_v50, %v1912_v15 }
 0xac3   : > { %v1977_v30 = vpop.permute.xlu1 %1976 }
 0xac4   : > { %v1990_v6 = vsub.f32 %v1936_v0, %v1977_v30  ;;  %3933 = vrot.lane.b32.xlu0 %v3932_v60, %s6170_s21  ;;  %v5589_v34 = vpop.permute.xlu0 %2406  ;;  %v2712_v60 = vmul.f32 %v6282_v39, %v5439_v35  ;;  %v4181_v0 = vld [vmem:[%s6105_s13 + $0x28] sm:$0xff] }
 0xac6   : > { %v3937_v29 = vpack.i.bf16 %v1991_v51, %v1990_v6  ;;  %v4182_v51 = vld [vmem:[%s6104_s12] sm:$0xff] }
 0xac7   : > { %v2674_v14 = vpop.permute.xlu1 %2673  ;;  %v1695_v35 = vmul.f32 %v4182_v51, %v5433_v36 }
 0xac8   : > { %1807 = vrot.lane.b32.xlu0 %v1793_v12, %s6169_s0  ;;  %3938 = vrot.lane.b32.xlu1 %v3937_v29, %s6170_s21  ;;  %v5597_v33 = vpop.permute.xlu0 %2484  ;;  %v2687_v27 = vadd.f32 %v2674_v14, %v2633_v23 }
 0xac9   : > { %v2498_v52 = vmul.f32 %v5597_v33, %v5472_v26 }
 0xacb   : > { %v2752_v5 = vpop.permute.xlu1 %2751 }
 0xacc   : > { %3943 = vrot.lane.b32.xlu0 %v3942_v63, %s6171_s6  ;;  %1809 = vrot.lane.b32.xlu1 %v1794_v55, %s6169_s0  ;;  %v1768_v41 = vpop.permute.xlu0 %1767  ;;  %v5617_v63 = vmul.f32 0.25, %v1622_v49  ;;  %v2765_v54 = vsub.f32 %v2711_v22, %v2752_v5 }
 0xacd   : > { %v1785_v2 = vmul.f32 %v1768_v41, %v5433_v36 }
 0xace   : > { %v1730_v37 = vmul.f32 %v6280_v16, %v5617_v63  ;;  %v1796_v30 = vmul.f32 %v4181_v0, %v5617_v63 }
 0xacf   : > { %v2409_v31 = vpop.permute.xlu1 %2408 }
 0xad0   : > { %1775 = vrot.lane.b32.xlu0 %v5612_v20, %s6169_s0  ;;  %3948 = vrot.lane.b32.xlu1 %v3947_v58, %s6171_s6  ;;  %v1738_v10 = vpop.permute.xlu0 %1737 }
 0xad1   : > { %v1755_v12 = vadd.f32 %v1738_v10, %v1695_v35  ;;  %v2421_v10 = vmul.f32 %v2409_v31, %v5486_v13 }
 0xad3   : > { %v2487_v47 = vpop.permute.xlu1 %2486 }
 0xad4   : > { %1745 = vrot.lane.b32.xlu0 %v1729_v28, %s6234_s24  ;;  %1777 = vrot.lane.b32.xlu1 %v5629_v21, %s6169_s0  ;;  %v2676_v58 = vpop.permute.xlu0 %2675 }
 0xad5   : > { %v2688_v44 = vadd.f32 %v2676_v58, %v2634_v42 }
 0xad7   : > { %v3952_v50 = vpack.i.bf16 %v2688_v44, %v2687_v27  ;;  %v1770_v15 = vpop.permute.xlu1 %1769 }
 0xad8   : > { %1811 = vrot.lane.b32.xlu0 %v1795_v9, %s6169_s0  ;;  %1747 = vrot.lane.b32.xlu1 %v1730_v37, %s6234_s24  ;;  %v2754_v17 = vpop.permute.xlu0 %2753  ;;  %v1786_v14 = vmul.f32 %v1770_v15, %v5452_v46  ;;  %s6041_s24 = scalar_lea.hbm %s6106_s14, %s3812_s28 }
 0xad9   : > { %v2766_v24 = vsub.f32 %v2712_v60, %v2754_v17 }
 0xadb   : > { %v3957_v6 = vpack.i.bf16 %v2766_v24, %v2765_v54  ;;  %v1740_v29 = vpop.permute.xlu1 %1739 }
 0xadc   : > { %1813 = vrot.lane.b32.xlu1 %v1796_v30, %s6169_s0  ;;  %3953 = vrot.lane.b32.xlu0 %v3952_v50, %s6171_s6  ;;  %v1804_v7 = vpop.permute.xlu0 %1803  ;;  %v1756_v62 = vadd.f32 %v1740_v29, %v1696_v4 }
 0xadd   : > { %v1821_v8 = vsub.f32 %v1785_v2, %v1804_v7 }
 0xadf   : > { %v5662_v55 = vsel %vm872_vm3, %v1755_v12, %v1821_v8  ;;  %v1806_v36 = vpop.permute.xlu1 %1805 }
 0xae0   : > { %v1822_v5 = vsub.f32 %v1786_v14, %v1806_v36  ;;  %3963 = vrot.lane.b32.xlu0 %v3962_v59, %s6172_s10  ;;  %3958 = vrot.lane.b32.xlu1 %v3957_v6, %s6171_s6  ;;  %v1772_v46 = vpop.permute.xlu0 %1771  ;;  %v2420_v59 = vmul.f32 %v5589_v34, %v5472_v26  ;;  %s4269_s6 = smov [#allocation2]  }
 0xae1   : > { %v1787_v7 = vmul.f32 %v1772_v46, %v5537_v43 }
 0xae2   : > { %v5670_v41 = vsel %vm872_vm3, %v1756_v62, %v1822_v5 }
 0xae3   : > { %v1833_v49 = vpack.c.bf16 %v5670_v41, %v5662_v55  ;;  %v1774_v25 = vpop.permute.xlu1 %1773 }
 0xae4   : > { %3973 = vrot.lane.b32.xlu0 %v3972_v61, %s6172_s10  ;;  %3968 = vrot.lane.b32.xlu1 %v5531_v19, %s6172_s10  ;;  %v2461_v3 = vpop.permute.xlu0 %2460  ;;  %v2499_v19 = vmul.f32 %v2487_v47, %v5486_v13  ;;  %v1788_v62 = vmul.f32 %v1774_v25, %v5547_v40 }
 0xae5   : > { %v2474_v28 = vadd.f32 %v2461_v3, %v2420_v59  ;;  %v4184_v3 = vld [vmem:[%s6104_s12 + $0x10] sm:$0xff] }
 0xae6   : > { %v1697_v59 = vmul.f32 %v4184_v3, %v5537_v43 }
 0xae8   : > { %3978 = vrot.lane.b32.xlu1 %v5578_v38, %s6172_s10  ;;  %v2539_v23 = vpop.permute.xlu0 %2538 }
 0xae9   : > { %v2552_v11 = vsub.f32 %v2498_v52, %v2539_v23 }
 0xaef   : > { %v2463_v56 = vpop.permute.xlu1 %2462 }
 0xaf0   : > { %v2475_v53 = vadd.f32 %v2463_v56, %v2421_v10  ;;  %v4185_v10 = vld [vmem:[%s6104_s12 + $0x18] sm:$0xff] }
 0xaf1   : > { %v1698_v46 = vmul.f32 %v4185_v10, %v5547_v40 }
 0xaf2   : > { %v3982_v18 = vpack.i.bf16 %v2475_v53, %v2474_v28 }
 0xaf3   : > { %v2541_v61 = vpop.permute.xlu1 %2540 }
 0xaf4   : > { %v2553_v38 = vsub.f32 %v2499_v19, %v2541_v61  ;;  %3983 = vrot.lane.b32.xlu0 %v3982_v18, %s6172_s10 }
 0xaf6   : > { %v3987_v42 = vpack.i.bf16 %v2553_v38, %v2552_v11 }
 0xaf8   : > { %3988 = vrot.lane.b32.xlu1 %v3987_v42, %s6172_s10 }
 0xb06   : > { %v3904_v34 = vpop.permute.xlu1 %3903 }
 0xb07   : > { %v3906_v58 = vunpack.i.h.bf16 %v3904_v34  ;;  %v3905_v27 = vunpack.i.l.bf16 %v3904_v34 }
 0xb0a   : > { %v3909_v31 = vpop.permute.xlu0 %3908 }
 0xb0b   : > { %v3911_v44 = vunpack.i.h.bf16 %v3909_v31  ;;  %v3910_v1 = vunpack.i.l.bf16 %v3909_v31 }
 0xb0d   : > { %v2041_v9 = vsel %vm872_vm3, %v3906_v58, %v3911_v44  ;;  %v2040_v26 = vsel %vm872_vm3, %v3905_v27, %v3910_v1 }
 0xb0e   : > { %v2046_v13 = vpack.c.bf16 %v2041_v9, %v2040_v26  ;;  %v3914_v22 = vpop.permute.xlu0 %3913 }
 0xb0f   : > { %v3916_v25 = vunpack.i.h.bf16 %v3914_v22  ;;  %v3915_v61 = vunpack.i.l.bf16 %v3914_v22 }
 0xb10   : > { %v2059_v33 = vsel %vm658_vm2, %v2046_v13, 0 }
 0xb11   : > { %3674 = vmatpush3.bf16.xpose.msra.mxu0 %v2059_v33 }
 0xb12   : > { %3675 = vmatprep.subr.bf16.mxu0 %v6230_v57  ;;  %v3919_v50 = vpop.permute.xlu1 %3918 }
 0xb13   : > { %v5694_v47 = vpop.f32.mrb[12].mxu0  ;;  %v3921_v5 = vunpack.i.h.bf16 %v3919_v50  ;;  %v3920_v56 = vunpack.i.l.bf16 %v3919_v50 }
 0xb14   : > { %v3655_v16 = vpop.f32.mrb[13].mxu0 }
 0xb15   : > { %v5696_v37 = vpop.f32.mrb[14].mxu0  ;;  %v2815_v34 = vsel %vm872_vm3, %v3915_v61, %v3920_v56  ;;  %v2816_v40 = vsel %vm872_vm3, %v3916_v25, %v3921_v5 }
 0xb16   : > { %v3656_v48 = vpop.f32.mrb[15].mxu0  ;;  %v2821_v9 = vpack.c.bf16 %v2816_v40, %v2815_v34 }
 0xb18   : > { %v2834_v50 = vsel %vm658_vm2, %v2821_v9, 0 }
 0xb1e   : > { %v3924_v15 = vpop.permute.xlu0 %3923 }
 0xb1f   : > { %v3926_v60 = vunpack.i.h.bf16 %v3924_v15  ;;  %v3925_v17 = vunpack.i.l.bf16 %v3924_v15 }
 0xb22   : > { %v3929_v39 = vpop.permute.xlu1 %3928  ;;  %v1742_v35 = vpop.permute.xlu0 %1741 }
 0xb23   : > { %v3931_v54 = vunpack.i.h.bf16 %v3929_v39  ;;  %v3930_v24 = vunpack.i.l.bf16 %v3929_v39  ;;  %v1757_v11 = vadd.f32 %v1742_v35, %v1697_v59 }
 0xb25   : > { %v2042_v0 = vsel %vm872_vm3, %v3925_v17, %v3930_v24  ;;  %v2043_v30 = vsel %vm872_vm3, %v3926_v60, %v3931_v54 }
 0xb26   : > { %v2047_v2 = vpack.c.bf16 %v2043_v30, %v2042_v0  ;;  %v1744_v6 = vpop.permute.xlu1 %1743 }
 0xb27   : > { %v1758_v38 = vadd.f32 %v1744_v6, %v1698_v46 }
 0xb28   : > { %v2062_v51 = vsel %vm658_vm2, %v2047_v2, 0  ;;  %v1699_v2 = vmul.f32 %v5612_v20, %v5606_v32 }
 0xb29   : > { %3676 = vmatpush3.bf16.xpose.msra.mxu0 %v2062_v51 }
 0xb2a   : > { %3677 = vmatprep.subr.bf16.mxu0 %v6230_v57 }
 0xb36   : > { %v3934_v29 = vpop.permute.xlu0 %3933 }
 0xb37   : > { %v3936_v14 = vunpack.i.h.bf16 %v3934_v29  ;;  %v3935_v45 = vunpack.i.l.bf16 %v3934_v29 }
 0xb3a   : > { %v3939_v12 = vpop.permute.xlu1 %3938  ;;  %v1808_v8 = vpop.permute.xlu0 %1807 }
 0xb3b   : > { %v3941_v4 = vunpack.i.h.bf16 %v3939_v12  ;;  %v3940_v36 = vunpack.i.l.bf16 %v3939_v12  ;;  %v1823_v23 = vsub.f32 %v1787_v7, %v1808_v8 }
 0xb3d   : > { %v2044_v28 = vsel %vm872_vm3, %v3935_v45, %v3940_v36  ;;  %v2045_v53 = vsel %vm872_vm3, %v3936_v14, %v3941_v4  ;;  %v1829_v31 = vsel %vm872_vm3, %v1757_v11, %v1823_v23 }
 0xb3e   : > { %v1810_v52 = vpop.permute.xlu1 %1809  ;;  %v3944_v19 = vpop.permute.xlu0 %3943  ;;  %v2048_v18 = vpack.c.bf16 %v2045_v53, %v2044_v28 }
 0xb3f   : > { %v1824_v43 = vsub.f32 %v1788_v62, %v1810_v52  ;;  %v3946_v48 = vunpack.i.h.bf16 %v3944_v19  ;;  %v3945_v22 = vunpack.i.l.bf16 %v3944_v19 }
 0xb40   : > { %v2065_v42 = vsel %vm658_vm2, %v2048_v18, 0 }
 0xb41   : > { %v1830_v58 = vsel %vm872_vm3, %v1758_v38, %v1824_v43  ;;  %3678 = vmatpush3.bf16.xpose.msra.mxu0 %v2065_v42 }
 0xb42   : > { %v1834_v27 = vpack.c.bf16 %v1830_v58, %v1829_v31  ;;  %v3949_v44 = vpop.permute.xlu1 %3948  ;;  %v1776_v1 = vpop.permute.xlu0 %1775  ;;  %3709 = vmatprep.subr.bf16.mxu0 %v6230_v57 }
 0xb43   : > { %v3951_v26 = vunpack.i.h.bf16 %v3949_v44  ;;  %v3950_v13 = vunpack.i.l.bf16 %v3949_v44  ;;  %v1789_v41 = vmul.f32 %v1776_v1, %v5606_v32 }
 0xb45   : > { %v2817_v15 = vsel %vm872_vm3, %v3945_v22, %v3950_v13  ;;  %v2818_v39 = vsel %vm872_vm3, %v3946_v48, %v3951_v26  ;;  %v480_v13 = vld [vmem:[%s6095_s3] sm:$0xff] }
 0xb46   : > { %v1778_v33 = vpop.permute.xlu1 %1777  ;;  %v1746_v16 = vpop.permute.xlu0 %1745  ;;  %v2822_v54 = vpack.c.bf16 %v2818_v39, %v2817_v15 }
 0xb47   : > { %v1790_v24 = vmul.f32 %v1778_v33, %v5617_v63  ;;  %v1759_v29 = vadd.f32 %v1746_v16, %v1699_v2  ;;  %v481_v16 = vld [vmem:[%s6095_s3 + $0x8] sm:$0xff] }
 0xb48   : > { %3680 = vmatmul.mubr.msk.bf16.vlgmr.msra.gmra.mrb[16].mxu0 %vm658_vm2, %v1833_v49  ;;  %v1700_v49 = vmul.f32 %v5629_v21, %v5617_v63  ;;  %v2837_v51 = vsel %vm658_vm2, %v2822_v54, 0  ;;  %v482_v54 = vld [vmem:[%s6095_s3 + $0x10] sm:$0xff] }
 0xb49   : > { %3710 = vmatpush3.bf16.xpose.msra.mxu0 %v2834_v50  ;;  %3683 = vmatprep.mubr.msk.bf16.mxu0 %vm4256_vm1, %v6230_v57 }
 0xb4a   : > { %v1748_v60 = vpop.permute.xlu1 %1747  ;;  %v1812_v17 = vpop.permute.xlu0 %1811  ;;  %3711 = vmatprep.subr.bf16.mxu0 %v6230_v57 }
 0xb4b   : > { %v1760_v35 = vadd.f32 %v1748_v60, %v1700_v49  ;;  %v1825_v6 = vsub.f32 %v1789_v41, %v1812_v17 }
 0xb4d   : > { %v1831_v20 = vsel %vm872_vm3, %v1759_v29, %v1825_v6 }
 0xb4e   : > { %v1814_v55 = vpop.permute.xlu1 %1813  ;;  %v3954_v30 = vpop.permute.xlu0 %3953 }
 0xb4f   : > { %v1826_v0 = vsub.f32 %v1790_v24, %v1814_v55  ;;  %v3956_v7 = vunpack.i.h.bf16 %v3954_v30  ;;  %v3955_v21 = vunpack.i.l.bf16 %v3954_v30  ;;  %v483_v55 = vld [vmem:[%s6095_s3 + $0x18] sm:$0xff] }
 0xb50   : > { %3684 = vmatmul.mubr.msk.bf16.gmra.mrb[20].mxu0 %vm658_vm2, %v1834_v27 }
 0xb51   : > { %3712 = vmatpush3.bf16.xpose.msra.mxu0 %v2837_v51  ;;  %3687 = vmatprep.mubr.msk.bf16.mxu0 %vm4256_vm1, %v6230_v57  ;;  %v1832_v63 = vsel %vm872_vm3, %v1760_v35, %v1826_v0  ;;  %v484_v35 = vld [vmem:[%s6095_s3 + $0x20] sm:$0xff] }
 0xb52   : > { %v3959_v12 = vpop.permute.xlu1 %3958  ;;  %3713 = vmatprep.subr.bf16.mxu0 %v6230_v57  ;;  %v1835_v4 = vpack.c.bf16 %v1832_v63, %v1831_v20  ;;  %v3964_v36 = vpop.permute.xlu0 %3963 }
 0xb53   : > { %v3961_v8 = vunpack.i.h.bf16 %v3959_v12  ;;  %v3960_v32 = vunpack.i.l.bf16 %v3959_v12  ;;  %v3966_v46 = vunpack.i.h.bf16 %v3964_v36  ;;  %v3965_v56 = vunpack.i.l.bf16 %v3964_v36 }
 0xb55   : > { %v2819_v14 = vsel %vm872_vm3, %v3955_v21, %v3960_v32  ;;  %v2820_v45 = vsel %vm872_vm3, %v3956_v7, %v3961_v8 }
 0xb56   : > { %v3969_v62 = vpop.permute.xlu1 %3968  ;;  %v2823_v5 = vpack.c.bf16 %v2820_v45, %v2819_v14  ;;  %v3974_v52 = vpop.permute.xlu0 %3973 }
 0xb57   : > { %v3971_v3 = vunpack.i.h.bf16 %v3969_v62  ;;  %v3970_v59 = vunpack.i.l.bf16 %v3969_v62  ;;  %v3976_v61 = vunpack.i.h.bf16 %v3974_v52  ;;  %v3975_v11 = vunpack.i.l.bf16 %v3974_v52  ;;  %v485_v52 = vld [vmem:[%s6095_s3 + $0x28] sm:$0xff] }
 0xb58   : > { %3688 = vmatmul.mubr.msk.bf16.gmra.mrb[24].mxu0 %vm658_vm2, %v1835_v4  ;;  %v2840_v10 = vsel %vm658_vm2, %v2823_v5, 0 }
 0xb59   : > { %3714 = vmatpush3.bf16.xpose.msra.mxu0 %v2840_v10  ;;  %3715 = vmatprep.mubr.msk.bf16.mxu0 %vm4256_vm1, %v6230_v57  ;;  %v2602_v28 = vsel %vm872_vm3, %v3965_v56, %v3970_v59  ;;  %v2603_v53 = vsel %vm872_vm3, %v3966_v46, %v3971_v3  ;;  %v6283_v46 = vld [vmem:[#allocation19_spill] sm:$0xff]  ;;  %v6284_v56 = vld [vmem:[#allocation20_spill] sm:$0xff] }
 0xb5a   : > { %3745 = vmatprep.subr.bf16.mxu0 %v6230_v57  ;;  %v3979_v23 = vpop.permute.xlu1 %3978  ;;  %v2608_v25 = vpack.c.bf16 %v2603_v53, %v2602_v28 }
 0xb5b   : > { %v3981_v19 = vunpack.i.h.bf16 %v3979_v23  ;;  %v3980_v18 = vunpack.i.l.bf16 %v3979_v23 }
 0xb5d   : > { %v2604_v38 = vsel %vm872_vm3, %v3975_v11, %v3980_v18  ;;  %v2605_v43 = vsel %vm872_vm3, %v3976_v61, %v3981_v19 }
 0xb5e   : > { %v2609_v42 = vpack.c.bf16 %v2605_v43, %v2604_v38 }
 0xb60   : > { %3716 = vmatmul.mubr.msk.bf16.vlgmr.msra.gmra.mrb[28].mxu0 %vm658_vm2, %v2608_v25 }
 0xb61   : > { %3719 = vmatprep.mubr.msk.bf16.mxu0 %vm4256_vm1, %v6230_v57 }
 0xb66   : > { %v3984_v34 = vpop.permute.xlu0 %3983 }
 0xb67   : > { %v3986_v31 = vunpack.i.h.bf16 %v3984_v34  ;;  %v3985_v58 = vunpack.i.l.bf16 %v3984_v34 }
 0xb68   : > { %3720 = vmatmul.mubr.msk.bf16.gmra.mrb[32].mxu0 %vm658_vm2, %v2609_v42 }
 0xb69   : > { %3723 = vmatprep.mubr.msk.bf16.mxu0 %vm4256_vm1, %v6230_v57 }
 0xb6a   : > { %v3989_v40 = vpop.permute.xlu1 %3988 }
 0xb6b   : > { %v3991_v27 = vunpack.i.h.bf16 %v3989_v40  ;;  %v3990_v44 = vunpack.i.l.bf16 %v3989_v40 }
 0xb6d   : > { %v2606_v1 = vsel %vm872_vm3, %v3985_v58, %v3990_v44  ;;  %v2607_v9 = vsel %vm872_vm3, %v3986_v31, %v3991_v27  ;;  %v6285_v27 = vld [vmem:[#allocation21_spill] sm:$0xff]  ;;  %v4186_v44 = vld [vmem:[%s4398_s18] sm:$0xff] }
 0xb6e   : > { %v2610_v26 = vpack.c.bf16 %v2607_v9, %v2606_v1  ;;  %v5841_v1 = vadd.f32 %v4186_v44, %v5694_v47  ;;  %v4187_v9 = vld [vmem:[%s4398_s18 + $0x8] sm:$0xff] }
 0xb70   : > { %3724 = vmatmul.mubr.msk.bf16.gmra.mrb[36].mxu0 %vm658_vm2, %v2610_v26  ;;  %v5845_v26 = vadd.f32 %v4187_v9, %v5696_v37 }
 0xb71   : > { %3749 = vmatprep.mubr.msk.bf16.mxu0 %vm4256_vm1, %v6230_v57 }
 0xc1b   : > { %v2101_v33 = vpop.f32.mrb[16].mxu0 }
 0xc1c   : > { %v5771_v48 = vadd.f32 %v2101_v33, %v480_v13  ;;  %v3681_v22 = vpop.f32.mrb[17].mxu0  ;;  %v3161_v33 = vmul.f32 %v5845_v26, %v5845_v26 }
 0xc1d   : > { %v2104_v50 = vpop.f32.mrb[18].mxu0 }
 0xc1e   : > { %v5773_v15 = vadd.f32 %v2104_v50, %v481_v16  ;;  %v3682_v39 = vpop.f32.mrb[19].mxu0  ;;  %v2125_v60 = vsel %vm2124_vm4, %v5771_v48, -inf }
 0xc1f   : > { %2126 = vmax.xlane.f32.xlu0 %v2125_v60 }
 0xc20   : > { %v2128_v17 = vsel %vm2124_vm4, %v5773_v15, -inf }
 0xc21   : > { %2129 = vmax.xlane.f32.xlu1 %v2128_v17 }
 0xc23   : > { %v2109_v24 = vpop.f32.mrb[20].mxu0 }
 0xc24   : > { %v5785_v41 = vadd.f32 %v2109_v24, %v482_v54  ;;  %v3685_v49 = vpop.f32.mrb[21].mxu0 }
 0xc25   : > { %v2112_v0 = vpop.f32.mrb[22].mxu0 }
 0xc26   : > { %v5787_v30 = vadd.f32 %v2112_v0, %v483_v55  ;;  %v3686_v2 = vpop.f32.mrb[23].mxu0  ;;  %v2131_v51 = vsel %vm2124_vm4, %v5785_v41, -inf }
 0xc27   : > { %2132 = vmax.xlane.f32.xlu0 %v2131_v51 }
 0xc28   : > { %v2134_v6 = vsel %vm2124_vm4, %v5787_v30, -inf }
 0xc2b   : > { %2135 = vmax.xlane.f32.xlu0 %v2134_v6  ;;  %v2117_v29 = vpop.f32.mrb[24].mxu0 }
 0xc2c   : > { %v5796_v7 = vadd.f32 %v2117_v29, %v484_v35  ;;  %v3689_v12 = vpop.f32.mrb[25].mxu0 }
 0xc2d   : > { %v2120_v63 = vpop.f32.mrb[26].mxu0 }
 0xc2e   : > { %v3690_v21 = vpop.f32.mrb[27].mxu0  ;;  %v2137_v8 = vsel %vm2124_vm4, %v5796_v7, -inf  ;;  %v5813_v19 = vadd.f32 %v2120_v63, %v485_v52 }
 0xc2f   : > { %2138 = vmax.xlane.f32.xlu1 %v2137_v8 }
 0xc30   : > { %v2140_v18 = vsel %vm2124_vm4, %v5813_v19, -inf }
 0xc33   : > { %v2876_v32 = vpop.f32.mrb[28].mxu0 }
 0xc34   : > { %v5800_v20 = vadd.f32 %v2876_v32, %v480_v13  ;;  %v3717_v14 = vpop.f32.mrb[29].mxu0  ;;  %v3160_v13 = vmul.f32 %v5841_v1, %v5841_v1 }
 0xc35   : > { %v2879_v45 = vpop.f32.mrb[30].mxu0 }
 0xc36   : > { %v5802_v4 = vadd.f32 %v2879_v45, %v481_v16  ;;  %v3718_v36 = vpop.f32.mrb[31].mxu0  ;;  %v2899_v11 = vsel %vm2124_vm4, %v5800_v20, -inf  ;;  %v3165_v16 = vsel %vm504_vm0, %v3161_v33, 0.0  ;;  %v3162_v22 = vsel %vm504_vm0, %v3160_v13, 0.0 }
 0xc38   : > { %v2902_v38 = vsel %vm2124_vm4, %v5802_v4, -inf }
 0xc3b   : > { %v2884_v62 = vpop.f32.mrb[32].mxu0 }
 0xc3c   : > { %v5804_v5 = vadd.f32 %v2884_v62, %v482_v54  ;;  %v3721_v3 = vpop.f32.mrb[33].mxu0 }
 0xc3d   : > { %v2887_v59 = vpop.f32.mrb[34].mxu0 }
 0xc3e   : > { %v3722_v10 = vpop.f32.mrb[35].mxu0  ;;  %v5817_v61 = vadd.f32 %v2887_v59, %v483_v55  ;;  %v2905_v34 = vsel %vm2124_vm4, %v5804_v5, -inf }
 0xc40   : > { %2197 = vrot.lane.b32.xlu1 %v6283_v46, %s4268_s19  ;;  %v2908_v40 = vsel %vm2124_vm4, %v5817_v61, -inf }
 0xc41   : > { %2199 = vrot.lane.b32.xlu0 %v6284_v56, %s4268_s19 }
 0xc43   : > { %v2892_v28 = vpop.f32.mrb[36].mxu0 }
 0xc44   : > { %v3725_v53 = vpop.f32.mrb[37].mxu0  ;;  %v5823_v43 = vadd.f32 %v2892_v28, %v484_v35 }
 0xc45   : > { %v2895_v23 = vpop.f32.mrb[38].mxu0 }
 0xc46   : > { %v3726_v25 = vpop.f32.mrb[39].mxu0  ;;  %v5825_v42 = vadd.f32 %v2895_v23, %v485_v52  ;;  %v2911_v31 = vsel %vm2124_vm4, %v5823_v43, -inf }
 0xc48   : > { %v2914_v58 = vsel %vm2124_vm4, %v5825_v42, -inf }
 0xc60   : > { %2141 = vmax.xlane.f32.xlu0 %v2140_v18 }
 0xc64   : > { %2900 = vmax.xlane.f32.xlu1 %v2899_v11  ;;  %2903 = vmax.xlane.f32.xlu0 %v2902_v38 }
 0xc68   : > { %2906 = vmax.xlane.f32.xlu1 %v2905_v34  ;;  %2909 = vmax.xlane.f32.xlu0 %v2908_v40 }
 0xc6c   : > { %2912 = vmax.xlane.f32.xlu1 %v2911_v31  ;;  %2915 = vmax.xlane.f32.xlu0 %v2914_v58 }
 0xc7d   : > { %2201 = vrot.lane.b32.xlu1 %v6285_v27, %s4268_s19  ;;  %s459_s19 = sand.u32 1, %s4245_s30  }
 0xc7e   : > { %s3811_s15 = smul.u32 48, %s459_s19  ;;  %s6050_s17 = scalar_lea.sflag [#allocation3], %s459_s19 }
 0xc80   : > { %s461_s2 = scalar_lea.vmem [#allocation2], %s3811_s15 }
 0xc81   : > { %s3385_s20 = sshll.u32 %s461_s2, 4  ;;  %s6045_s20 = int_to_ptr.vmem [resolvable:$true] %s3385_s20 }
 0xc82   : > { %2968 = vrot.lane.b32.xlu0 %v6283_v46, %s6165_s25  ;;  %s4191_s26 = scalar_lea.vmem %s6045_s20, 768 }
 0xc83   : > { %p4192_p11 = scmp.ne.s32.totalorder %s6045_s20, %s4191_s26 }
 0xc85   : > { %p4193_p12 = pnand %p4192_p11, %p4384_p5 }
 0xc87   : > { %p4194_p13 = pneg %p4193_p12 }
 0xca1   : > { %3166 = vadd.xlane.f32.xlu0 %v3165_v16  ;;  %3163 = vadd.xlane.f32.xlu1 %v3162_v22 }
 0xcac   : > { %v2127_v50 = vpop.xlane.xlu0 %2126 }
 0xcad   : > { %v2143_v47 = vsub.f32 %v5771_v48, %v2127_v50 }
 0xcae   : > { %v2130_v39 = vpop.xlane.xlu1 %2129 }
 0xcaf   : > { %v2149_v60 = vmul.f32 1.442695, %v2143_v47  ;;  %v2144_v37 = vsub.f32 %v5773_v15, %v2130_v39 }
 0xcb1   : > { %4122 = vpow2.f32 %v2149_v60  ;;  %v2151_v17 = vmul.f32 1.442695, %v2144_v37 }
 0xcb3   : > { %4124 = vpow2.f32 %v2151_v17 }
 0xcb4   : > { %v2133_v54 = vpop.xlane.xlu0 %2132 }
 0xcb5   : > { %v2145_v24 = vsub.f32 %v5785_v41, %v2133_v54 }
 0xcb7   : > { %v2153_v55 = vmul.f32 1.442695, %v2145_v24 }
 0xcb8   : > { %v2136_v49 = vpop.xlane.xlu0 %2135 }
 0xcb9   : > { %4126 = vpow2.f32 %v2153_v55  ;;  %v2146_v0 = vsub.f32 %v5787_v30, %v2136_v49 }
 0xcbb   : > { %v5857_v2 = vpop.eup %4122  ;;  %v2155_v51 = vmul.f32 1.442695, %v2146_v0 }
 0xcbc   : > { %v2139_v35 = vpop.xlane.xlu1 %2138  ;;  %v2161_v48 = vsel %vm2124_vm4, %v5857_v2, 0.0  ;;  %v2200_v63 = vpop.permute.xlu0 %2199 }
 0xcbd   : > { %v5861_v6 = vpop.eup %4124  ;;  %4128 = vpow2.f32 %v2155_v51  ;;  %v2147_v15 = vsub.f32 %v5796_v7, %v2139_v35  ;;  %2162 = vadd.xlane.f32.xlu1 %v2161_v48 }
 0xcbe   : > { %v2164_v41 = vsel %vm2124_vm4, %v5861_v6, 0.0 }
 0xcbf   : > { %v2157_v29 = vmul.f32 1.442695, %v2147_v15  ;;  %2165 = vadd.xlane.f32.xlu0 %v2164_v41 }
 0xcc0   : > { %v2198_v12 = vpop.permute.xlu1 %2197 }
 0xcc1   : > { %4130 = vpow2.f32 %v2157_v29  ;;  %3692 = vmatpush3.bf16.msra.mxu1 %v2198_v12 }
 0xcc2   : > { %3693 = vmatprep.subr.bf16.mxu1 %v6230_v57 }
 0xcc3   : > { %v5867_v30 = vpop.eup %4126 }
 0xcc4   : > { %v2167_v21 = vsel %vm2124_vm4, %v5867_v30, 0.0 }
 0xcc5   : > { %3694 = vmatpush3.bf16.msra.mxu1 %v2200_v63  ;;  %2168 = vadd.xlane.f32.xlu1 %v2167_v21 }
 0xcc6   : > { %3695 = vmatprep.subr.bf16.mxu1 %v6230_v57 }
 0xcc7   : > { %v5872_v7 = vpop.eup %4128 }
 0xcc8   : > { %v2170_v8 = vsel %vm2124_vm4, %v5872_v7, 0.0 }
 0xcc9   : > { %2171 = vadd.xlane.f32.xlu0 %v2170_v8 }
 0xccb   : > { %v5876_v32 = vpop.eup %4130 }
 0xccc   : > { %v2173_v14 = vsel %vm2124_vm4, %v5876_v32, 0.0 }
 0xccd   : > { %2174 = vadd.xlane.f32.xlu1 %v2173_v14 }
 0xced   : > { %v2142_v45 = vpop.xlane.xlu0 %2141 }
 0xcee   : > { %v2148_v36 = vsub.f32 %v5813_v19, %v2142_v45 }
 0xcf0   : > { %v2159_v62 = vmul.f32 1.442695, %v2148_v36 }
 0xcf1   : > { %v2901_v3 = vpop.xlane.xlu1 %2900  ;;  %v2904_v59 = vpop.xlane.xlu0 %2903 }
 0xcf2   : > { %4132 = vpow2.f32 %v2159_v62  ;;  %v2917_v10 = vsub.f32 %v5800_v20, %v2901_v3  ;;  %v2918_v46 = vsub.f32 %v5802_v4, %v2904_v59 }
 0xcf4   : > { %v2923_v28 = vmul.f32 1.442695, %v2917_v10  ;;  %v2925_v53 = vmul.f32 1.442695, %v2918_v46 }
 0xcf5   : > { %v2907_v23 = vpop.xlane.xlu1 %2906  ;;  %v2910_v25 = vpop.xlane.xlu0 %2909 }
 0xcf6   : > { %4134 = vpow2.f32 %v2923_v28  ;;  %v2919_v52 = vsub.f32 %v5804_v5, %v2907_v23  ;;  %v2920_v18 = vsub.f32 %v5817_v61, %v2910_v25 }
 0xcf7   : > { %4136 = vpow2.f32 %v2925_v53 }
 0xcf8   : > { %v2927_v11 = vmul.f32 1.442695, %v2919_v52  ;;  %v2929_v19 = vmul.f32 1.442695, %v2920_v18 }
 0xcf9   : > { %v2913_v38 = vpop.xlane.xlu1 %2912  ;;  %v2916_v40 = vpop.xlane.xlu0 %2915 }
 0xcfa   : > { %4138 = vpow2.f32 %v2927_v11  ;;  %v2921_v34 = vsub.f32 %v5823_v43, %v2913_v38  ;;  %v2922_v31 = vsub.f32 %v5825_v42, %v2916_v40 }
 0xcfb   : > { %4140 = vpow2.f32 %v2929_v19 }
 0xcfc   : > { %v5886_v20 = vpop.eup %4132  ;;  %v2931_v4 = vmul.f32 1.442695, %v2921_v34  ;;  %v2933_v43 = vmul.f32 1.442695, %v2922_v31 }
 0xcfd   : > { %v2202_v58 = vpop.permute.xlu1 %2201  ;;  %v2176_v5 = vsel %vm2124_vm4, %v5886_v20, 0.0  ;;  %v2969_v37 = vpop.permute.xlu0 %2968 }
 0xcfe   : > { %2177 = vadd.xlane.f32.xlu0 %v2176_v5  ;;  %3696 = vmatpush3.bf16.msra.mxu1 %v2202_v58  ;;  %4142 = vpow2.f32 %v2931_v4  ;;  %v4021_v5 = vld [vmem:[%s6096_s4 + $0x18] sm:$0xff]  }
 0xcff   : > { %3727 = vmatprep.subr.bf16.mxu1 %v6230_v57  ;;  %4144 = vpow2.f32 %v2933_v43 }
 0xd00   : > { %v5892_v61 = vpop.eup %4134 }
 0xd01   : > { %v5894_v44 = vpop.eup %4136  ;;  %v2935_v9 = vsel %vm2124_vm4, %v5892_v61, 0.0 }
 0xd02   : > { %v2938_v42 = vsel %vm2124_vm4, %v5894_v44, 0.0  ;;  %2936 = vadd.xlane.f32.xlu1 %v2935_v9 }
 0xd03   : > { %2939 = vadd.xlane.f32.xlu0 %v2938_v42 }
 0xd04   : > { %v5900_v13 = vpop.eup %4138 }
 0xd05   : > { %v2941_v33 = vsel %vm2124_vm4, %v5900_v13, 0.0  ;;  %v5904_v16 = vpop.eup %4140 }
 0xd06   : > { %v2944_v22 = vsel %vm2124_vm4, %v5904_v16, 0.0 }
 0xd07   : > { %2942 = vadd.xlane.f32.xlu0 %v2941_v33 }
 0xd08   : > { %v5908_v50 = vpop.eup %4142 }
 0xd09   : > { %v2947_v47 = vsel %vm2124_vm4, %v5908_v50, 0.0  ;;  %v5912_v39 = vpop.eup %4144 }
 0xd0a   : > { %v2950_v60 = vsel %vm2124_vm4, %v5912_v39, 0.0 }
 0xd0b   : > { %2945 = vadd.xlane.f32.xlu0 %v2944_v22 }
 0xd0f   : > { %2948 = vadd.xlane.f32.xlu0 %v2947_v47  ;;  %v4024_v47 = vld [vmem:[%s6101_s9] sm:$0xff]  }
 0xd10   : > { %3746 = vmatpush3.bf16.msra.mxu0 %v4024_v47 }
 0xd11   : > { %3747 = vmatprep.subr.bf16.mxu0 %v6230_v57 }
 0xd13   : > { %2951 = vadd.xlane.f32.xlu0 %v2950_v60  ;;  %2970 = vrot.lane.b32.xlu1 %v6284_v56, %s6165_s25 }
 0xd29   : > { %2972 = vrot.lane.b32.xlu0 %v6285_v27, %s6165_s25 }
 0xd2e   : > { %v3167_v17 = vpop.xlane.xlu0 %3166  ;;  %v3164_v54 = vpop.xlane.xlu1 %3163 }
 0xd2f   : > { %v3169_v24 = vmul.f32 0.03125, %v3167_v17  ;;  %v3168_v55 = vmul.f32 0.03125, %v3164_v54 }
 0xd31   : > { %v3171_v49 = vadd.f32 1.1920929e-07, %v3169_v24  ;;  %v3170_v0 = vadd.f32 1.1920929e-07, %v3168_v55 }
 0xd33   : > { %4146 = vrsqrt.f32 %v3171_v49 }
 0xd34   : > { %4148 = vrsqrt.f32 %v3170_v0 }
 0xd3d   : > { %v4147_v51 = vpop.eup %4146 }
 0xd3e   : > { %v4149_v35 = vpop.eup %4148  ;;  %v5921_v48 = vmul.f32 %v4147_v51, %v5845_v26 }
 0xd3f   : > { %v5924_v15 = vmul.f32 %v4149_v35, %v5841_v1 }
 0xd41   : > { %v3176_v56 = vpack.c.bf16 %v5921_v48, %v5924_v15  ;;  %v4025_v15 = vld [vmem:[%s6101_s9 + $0x8] sm:$0xff]  }
 0xd42   : > { %3748 = vmatpush3.bf16.msra.mxu0 %v4025_v15  ;;  %v6290_v15 = vld [vmem:[#allocation14_spill] sm:$0xff] }
 0xd43   : > { %3777 = vmatprep.subr.bf16.mxu0 %v6230_v57 }
 0xd4a   : > { %v2163_v27 = vpop.xlane.xlu1 %2162 }
 0xd4b   : > { %4150 = vrcp.f32 %v2163_v27 }
 0xd4c   : > { %v2166_v41 = vpop.xlane.xlu0 %2165 }
 0xd4d   : > { %4152 = vrcp.f32 %v2166_v41 }
 0xd52   : > { %v2169_v29 = vpop.xlane.xlu1 %2168 }
 0xd53   : > { %4154 = vrcp.f32 %v2169_v29 }
 0xd55   : > { %v4151_v12 = vpop.eup %4150 }
 0xd56   : > { %v2172_v63 = vpop.xlane.xlu0 %2171  ;;  %v2185_v8 = vmul.f32 %v4151_v12, %v5857_v2 }
 0xd57   : > { %v4153_v21 = vpop.eup %4152  ;;  %4156 = vrcp.f32 %v2172_v63 }
 0xd58   : > { %v2186_v26 = vmul.f32 %v4153_v21, %v5861_v6 }
 0xd5a   : > { %v2191_v14 = vpack.c.bf16 %v2186_v26, %v2185_v8  ;;  %v2175_v2 = vpop.xlane.xlu1 %2174 }
 0xd5b   : > { %4158 = vrcp.f32 %v2175_v2 }
 0xd5c   : > { %3698 = vmatmul.mubr.msk.bf16.vlgmr.msra.gmra.mrb[40].mxu1 %vm2124_vm4, %v2191_v14 }
 0xd5d   : > { %3728 = vmatpush3.bf16.msra.mxu1 %v2969_v37  ;;  %3701 = vmatprep.mubr.msk.bf16.mxu1 %vm4256_vm1, %v6230_v57  ;;  %v4155_v1 = vpop.eup %4154 }
 0xd5e   : > { %3729 = vmatprep.subr.bf16.mxu1 %v6230_v57  ;;  %v2187_v36 = vmul.f32 %v4155_v1, %v5867_v30 }
 0xd61   : > { %v4157_v45 = vpop.eup %4156 }
 0xd62   : > { %v2188_v62 = vmul.f32 %v4157_v45, %v5872_v7 }
 0xd64   : > { %v2192_v3 = vpack.c.bf16 %v2188_v62, %v2187_v36 }
 0xd65   : > { %v4159_v28 = vpop.eup %4158 }
 0xd66   : > { %3702 = vmatmul.mubr.msk.bf16.gmra.mrb[44].mxu1 %vm2124_vm4, %v2192_v3  ;;  %v2189_v7 = vmul.f32 %v4159_v28, %v5876_v32 }
 0xd67   : > { %3705 = vmatprep.mubr.msk.bf16.mxu1 %vm4256_vm1, %v6230_v57 }
 0xd8b   : > { %v2178_v6 = vpop.xlane.xlu0 %2177 }
 0xd8c   : > { %4160 = vrcp.f32 %v2178_v6 }
 0xd8f   : > { %v2937_v59 = vpop.xlane.xlu1 %2936 }
 0xd90   : > { %v2940_v10 = vpop.xlane.xlu0 %2939  ;;  %4162 = vrcp.f32 %v2937_v59 }
 0xd91   : > { %4164 = vrcp.f32 %v2940_v10 }
 0xd93   : > { %v2971_v46 = vpop.permute.xlu1 %2970 }
 0xd94   : > { %v2943_v53 = vpop.xlane.xlu0 %2942  ;;  %3730 = vmatpush3.bf16.msra.mxu1 %v2971_v46 }
 0xd95   : > { %3731 = vmatprep.subr.bf16.mxu1 %v6230_v57 }
 0xd96   : > { %v4161_v30 = vpop.eup %4160 }
 0xd97   : > { %v2190_v23 = vmul.f32 %v4161_v30, %v5886_v20  ;;  %v4020_v20 = vld [vmem:[%s6096_s4 + $0x10] sm:$0xff]  }
 0xd98   : > { %v2946_v25 = vpop.xlane.xlu0 %2945 }
 0xd99   : > { %v2193_v52 = vpack.c.bf16 %v2190_v23, %v2189_v7  ;;  %4166 = vrcp.f32 %v2946_v25 }
 0xd9a   : > { %v4163_v11 = vpop.eup %4162  ;;  %4168 = vrcp.f32 %v2943_v53 }
 0xd9b   : > { %3706 = vmatmul.mubr.msk.bf16.gmra.mrb[48].mxu1 %vm2124_vm4, %v2193_v52  ;;  %v4165_v19 = vpop.eup %4164  ;;  %v2959_v40 = vmul.f32 %v4163_v11, %v5892_v61 }
 0xd9c   : > { %v2949_v18 = vpop.xlane.xlu0 %2948  ;;  %3733 = vmatprep.mubr.msk.bf16.mxu1 %vm4256_vm1, %v6230_v57  ;;  %v2960_v34 = vmul.f32 %v4165_v19, %v5894_v44 }
 0xd9e   : > { %v2965_v4 = vpack.c.bf16 %v2960_v34, %v2959_v40 }
 0xda0   : > { %v2952_v38 = vpop.xlane.xlu0 %2951 }
 0xda1   : > { %4170 = vrcp.f32 %v2952_v38 }
 0xda2   : > { %4172 = vrcp.f32 %v2949_v18 }
 0xda3   : > { %v4167_v31 = vpop.eup %4166 }
 0xda4   : > { %v2973_v32 = vpop.permute.xlu0 %2972  ;;  %v4169_v58 = vpop.eup %4168  ;;  %v2962_v61 = vmul.f32 %v4167_v31, %v5904_v16 }
 0xda5   : > { %3732 = vmatpush3.bf16.msra.mxu1 %v2973_v32  ;;  %v2961_v44 = vmul.f32 %v4169_v58, %v5900_v13  ;;  %v4022_v13 = vld [vmem:[%s6097_s5 + $0x10] sm:$0xff]  }
 0xda6   : > { %3761 = vmatprep.subr.bf16.mxu1 %v6230_v57 }
 0xda7   : > { %v2966_v43 = vpack.c.bf16 %v2962_v61, %v2961_v44 }
 0xda8   : > { %3734 = vmatmul.mubr.msk.bf16.vlgmr.msra.gmra.mrb[52].mxu1 %vm2124_vm4, %v2965_v4 }
 0xda9   : > { %3737 = vmatprep.mubr.msk.bf16.mxu1 %vm4256_vm1, %v6230_v57  ;;  %3762 = vmatpush3.bf16.msra.mxu1 %v4020_v20 }
 0xdaa   : > { %3763 = vmatprep.subr.bf16.mxu1 %v6230_v57 }
 0xdab   : > { %v4171_v9 = vpop.eup %4170 }
 0xdac   : > { %v4173_v42 = vpop.eup %4172  ;;  %v2964_v33 = vmul.f32 %v4171_v9, %v5912_v39 }
 0xdad   : > { %3764 = vmatpush3.bf16.msra.mxu1 %v4021_v5  ;;  %v2963_v22 = vmul.f32 %v4173_v42, %v5908_v50  ;;  %v4023_v50 = vld [vmem:[%s6097_s5 + $0x18] sm:$0xff]   ;;  %v4188_v42 = vld [vmem:[%s6093_s1] sm:$0xff]  }
 0xdae   : > { %3769 = vmatprep.subr.bf16.mxu1 %v6230_v57 }
 0xdaf   : > { %v2967_v16 = vpack.c.bf16 %v2964_v33, %v2963_v22  ;;  %v4189_v33 = vld [vmem:[%s6093_s1 + $0x8] sm:$0xff]   ;;  %v4190_v22 = vld [vmem:[%s6093_s1 + $0x10] sm:$0xff]  }
 0xdb0   : > { %3738 = vmatmul.mubr.msk.bf16.gmra.mrb[56].mxu1 %vm2124_vm4, %v2966_v43 }
 0xdb1   : > { %3741 = vmatprep.mubr.msk.bf16.mxu1 %vm4256_vm1, %v6230_v57 }
 0xdb8   : > { %3742 = vmatmul.mubr.msk.bf16.gmra.mrb[60].mxu1 %vm2124_vm4, %v2967_v16 }
 0xdb9   : > { %3765 = vmatprep.mubr.msk.bf16.mxu1 %vm4256_vm1, %v6230_v57 }
 0xdc0   : > { %3766 = vmatmul.mubr.msk.bf16.vlgmr.msra.gmra.mrb[64].mxu1 %vm504_vm0, %v3176_v56 }
 0xdc1   : > { %3773 = vmatprep.mubr.msk.bf16.mxu1 %vm4256_vm1, %v6230_v57  ;;  %3770 = vmatpush3.bf16.msra.mxu1 %v4022_v13  ;;  %v6286_v13 = vld [vmem:[#allocation12_spill] sm:$0xff] }
 0xdc2   : > { %3771 = vmatprep.subr.bf16.mxu1 %v6230_v57 }
 0xdc5   : > { %3772 = vmatpush3.bf16.msra.mxu1 %v4023_v50 }
 0xe2f   : > { %v2249_v39 = vpop.f32.mrb[40].mxu1 }
 0xe30   : > { %v3699_v60 = vpop.f32.mrb[41].mxu1 }
 0xe31   : > { %v2252_v37 = vpop.f32.mrb[42].mxu1  ;;  %v6287_v60 = vld [vmem:[#allocation10_spill] sm:$0xff] }
 0xe32   : > { %v3700_v17 = vpop.f32.mrb[43].mxu1 }
 0xe39   : > { %v2257_v54 = vpop.f32.mrb[44].mxu1 }
 0xe3a   : > { %v3703_v24 = vpop.f32.mrb[45].mxu1 }
 0xe3b   : > { %v2260_v55 = vpop.f32.mrb[46].mxu1 }
 0xe3c   : > { %v3704_v49 = vpop.f32.mrb[47].mxu1 }
 0xe6e   : > { %v2265_v0 = vpop.f32.mrb[48].mxu1 }
 0xe6f   : > { %v3707_v51 = vpop.f32.mrb[49].mxu1 }
 0xe70   : > { %v2268_v35 = vpop.f32.mrb[50].mxu1 }
 0xe71   : > { %v3708_v48 = vpop.f32.mrb[51].mxu1 }
 0xe7b   : > { %v3020_v56 = vpop.f32.mrb[52].mxu1 }
 0xe7c   : > { %v3735_v27 = vpop.f32.mrb[53].mxu1 }
 0xe7d   : > { %v3023_v41 = vpop.f32.mrb[54].mxu1 }
 0xe7e   : > { %v3992_v29 = vpack.i.bf16 %v3023_v41, %v3020_v56  ;;  %v3736_v12 = vpop.f32.mrb[55].mxu1 }
 0xe80   : > { %3993 = vrot.lane.b32.xlu1 %v3992_v29, %s6167_s27  ;;  %v6291_v29 = vld [vmem:[#allocation15_spill] sm:$0xff] }
 0xe83   : > { %v3028_v63 = vpop.f32.mrb[56].mxu1 }
 0xe84   : > { %v3739_v21 = vpop.f32.mrb[57].mxu1 }
 0xe85   : > { %v3031_v8 = vpop.f32.mrb[58].mxu1 }
 0xe86   : > { %v3997_v26 = vpack.i.bf16 %v3031_v8, %v3028_v63  ;;  %v3740_v14 = vpop.f32.mrb[59].mxu1 }
 0xe88   : > { %3998 = vrot.lane.b32.xlu1 %v3997_v26, %s6167_s27 }
 0xe8b   : > { %v3036_v1 = vpop.f32.mrb[60].mxu1 }
 0xe8c   : > { %v3743_v45 = vpop.f32.mrb[61].mxu1 }
 0xe8d   : > { %v3039_v36 = vpop.f32.mrb[62].mxu1 }
 0xe8e   : > { %v4002_v62 = vpack.i.bf16 %v3039_v36, %v3036_v1  ;;  %v3744_v3 = vpop.f32.mrb[63].mxu1 }
 0xe90   : > { %4003 = vrot.lane.b32.xlu1 %v4002_v62, %s6167_s27  ;;  %s4195_s27 = sshll.u32 %s4269_s6, 4  ;;  %s4196_s27 = int_to_ptr.vmem [resolvable:$false] %s4195_s27 }
 0xe91   : > { %s4197_s10 = scalar_lea.vmem %s4196_s27, 1536  ;;  %p4198_p0 = scmp.lt.s32.totalorder %s6045_s20, %s4196_s27 }
 0xe92   : > { %p4199_p1 = scmp.lt.s32.totalorder %s4197_s10, %s4191_s26 }
 0xe93   : > { %v3236_v2 = vpop.f32.mrb[64].mxu1 }
 0xe94   : > { %v3767_v6 = vpop.f32.mrb[65].mxu1  ;;  %p4200_p2 = por %p4199_p1, %p4198_p0 }
 0xe95   : > { %v3239_v59 = vpop.f32.mrb[66].mxu1 }
 0xe96   : > { %v3243_v10 = vpack.c.bf16 %v3239_v59, %v3236_v2  ;;  %v3768_v46 = vpop.f32.mrb[67].mxu1  ;;  %p4201_p3 = pnand %p4200_p2, %p4194_p13 }
 0xe98   : > { %3774 = vmatmul.mubr.msk.bf16.vlgmr.msra.gmra.mrb[68].mxu1 %vm504_vm0, %v3243_v10 }
 0xef2   : > { %v3994_v28 = vpop.permute.xlu1 %3993 }
 0xef3   : > { %v3996_v53 = vunpack.i.h.bf16 %v3994_v28  ;;  %v3995_v30 = vunpack.i.l.bf16 %v3994_v28 }
 0xef5   : > { %v3068_v7 = vsel %vm658_vm2, %v2252_v37, %v3996_v53  ;;  %v3067_v23 = vsel %vm658_vm2, %v2249_v39, %v3995_v30 }
 0xef6   : > { %v3073_v25 = vpack.c.bf16 %v3068_v7, %v3067_v23 }
 0xef8   : > { %3750 = vmatmul.mubr.msk.bf16.vlgmr.msra.gmra.mrb[40].mxu0 %vm504_vm0, %v3073_v25 }
 0xef9   : > { %3753 = vmatprep.mubr.msk.bf16.mxu0 %vm4256_vm1, %v6230_v57 }
 0xefa   : > { %v3999_v52 = vpop.permute.xlu1 %3998 }
 0xefb   : > { %v4001_v18 = vunpack.i.h.bf16 %v3999_v52  ;;  %v4000_v11 = vunpack.i.l.bf16 %v3999_v52 }
 0xefd   : > { %v3070_v19 = vsel %vm658_vm2, %v2260_v55, %v4001_v18  ;;  %v3069_v38 = vsel %vm658_vm2, %v2257_v54, %v4000_v11  ;;  %v6288_v54 = vld [vmem:[#allocation13_spill] sm:$0xff] }
 0xefe   : > { %v3074_v34 = vpack.c.bf16 %v3070_v19, %v3069_v38 }
 0xf00   : > { %3754 = vmatmul.mubr.msk.bf16.gmra.mrb[44].mxu0 %vm504_vm0, %v3074_v34 }
 0xf01   : > { %3757 = vmatprep.mubr.msk.bf16.mxu0 %vm4256_vm1, %v6230_v57 }
 0xf02   : > { %v4004_v40 = vpop.permute.xlu1 %4003 }
 0xf03   : > { %v4006_v32 = vunpack.i.h.bf16 %v4004_v40  ;;  %v4005_v20 = vunpack.i.l.bf16 %v4004_v40 }
 0xf05   : > { %v3072_v4 = vsel %vm658_vm2, %v2268_v35, %v4006_v32  ;;  %v3071_v31 = vsel %vm658_vm2, %v2265_v0, %v4005_v20  ;;  %v6289_v0 = vld [vmem:[#allocation11_spill] sm:$0xff] }
 0xf06   : > { %v3075_v58 = vpack.c.bf16 %v3072_v4, %v3071_v31 }
 0xf08   : > { %3758 = vmatmul.mubr.msk.bf16.gmra.mrb[48].mxu0 %vm504_vm0, %v3075_v58 }
 0xf09   : > { %3779 = vmatprep.mubr.msk.bf16.mxu0 %vm4256_vm1, %v6230_v57 }
 0xf6b   : > { %v3293_v5 = vpop.f32.mrb[68].mxu1 }
 0xf6c   : > { %v3775_v61 = vpop.f32.mrb[69].mxu1 }
 0xf6d   : > { %v3296_v44 = vpop.f32.mrb[70].mxu1 }
 0xf6e   : > { %v3300_v43 = vpack.c.bf16 %v3296_v44, %v3293_v5  ;;  %v3776_v9 = vpop.f32.mrb[71].mxu1 }
 0xf70   : > { %3778 = vmatpush3.bf16.msra.mxu0 %v3300_v43 }
 0xf73   : > { %3780 = vmatmul.mubr.msk.bf16.vlgmr.msra.gmra.mrb[40].mxu0 %vm658_vm2, %v4188_v42 }
 0xf74   : > { %3783 = vmatprep.mubr.msk.bf16.mxu0 %vm4256_vm1, %v6230_v57 }
 0xf7b   : > { %3784 = vmatmul.mubr.msk.bf16.gmra.mrb[44].mxu0 %vm658_vm2, %v4189_v33 }
 0xf7c   : > { %3787 = vmatprep.mubr.msk.bf16.mxu0 %vm4256_vm1, %v6230_v57 }
 0xf83   : > { %3788 = vmatmul.mubr.msk.bf16.gmra.mrb[48].mxu0 %vm658_vm2, %v4190_v22 }
0x1046   : > { %v3335_v16 = vpop.f32.mrb[40].mxu0 }
0x1047   : > { %v3793_v50 = vadd.f32 %v3335_v16, %v6286_v13  ;;  %v3781_v47 = vpop.f32.mrb[41].mxu0 }
0x1048   : > { %v3338_v39 = vpop.f32.mrb[42].mxu0 }
0x1049   : > { %3364 = vst.msk [vmem:[%s461_s2] sm:$0xff] %vm504_vm0, %v3793_v50  ;;  %v3794_v57 = vadd.f32 %v3338_v39, %v6287_v60  ;;  %v3782_v37 = vpop.f32.mrb[43].mxu0 }
0x104b   : > { %3365 = vst.msk [vmem:[%s461_s2 + $0x8] sm:$0xff] %vm504_vm0, %v3794_v57 }
0x104e   : > { %v3343_v17 = vpop.f32.mrb[44].mxu0 }
0x104f   : > { %v3795_v24 = vadd.f32 %v3343_v17, %v6288_v54  ;;  %v3785_v55 = vpop.f32.mrb[45].mxu0 }
0x1050   : > { %v3346_v49 = vpop.f32.mrb[46].mxu0 }
0x1051   : > { %3366 = vst.msk [vmem:[%s461_s2 + $0x10] sm:$0xff] %vm504_vm0, %v3795_v24  ;;  %v3796_v51 = vadd.f32 %v3346_v49, %v6289_v0  ;;  %v3786_v35 = vpop.f32.mrb[47].mxu0 }
0x1053   : > { %3367 = vst.msk [vmem:[%s461_s2 + $0x18] sm:$0xff] %vm504_vm0, %v3796_v51 }
0x1056   : > { %v3351_v48 = vpop.f32.mrb[48].mxu0 }
0x1057   : > { %v3797_v56 = vadd.f32 %v3351_v48, %v6290_v15  ;;  %v3789_v27 = vpop.f32.mrb[49].mxu0 }
0x1058   : > { %v3354_v41 = vpop.f32.mrb[50].mxu0 }
0x1059   : > { %3368 = vst.msk [vmem:[%s461_s2 + $0x20] sm:$0xff] %vm504_vm0, %v3797_v56  ;;  %v3798_v12 = vadd.f32 %v3354_v41, %v6291_v29  ;;  %v3790_v63 = vpop.f32.mrb[51].mxu0 }
0x105b   : > { %3369 = vst.msk [vmem:[%s461_s2 + $0x28] sm:$0xff] %vm504_vm0, %v3798_v12 }
0x105c   : > { %4204 = shalt.err (!%p4201_p3)
}
0x105d   : > { %s4205_s22 = scalar_lea.hbm %s6041_s24, 768  ;;  %s4209_s25 = scalar_lea.hbm %s6106_s14, 1536 }
0x105e   : > { %p4206_p4 = scmp.ne.s32.totalorder %s6041_s24, %s4205_s22  ;;  %p4210_p9 = scmp.lt.u32.totalorder %s6041_s24, %s6106_s14 }
0x105f   : > { %p4211_p10 = scmp.lt.u32.totalorder %s4209_s25, %s4205_s22  ;;  %p4213_p12 = scmp.lt.u32.totalorder %s4205_s22, %s6041_s24 }
0x1060   : > { %p4207_p7 = pnand %p4206_p4, %p4384_p5 }
0x1061   : > { %p4212_p11 = por %p4211_p10, %p4210_p9 }
0x1062   : > { %p4208_p8 = pneg %p4207_p7 }
0x1063   : > { %p4214_p13 = por %p4213_p12, %p4212_p11 }
0x1065   : > { %p4215_p0 = pnand %p4214_p13, %p4208_p8 }
0x1067   : > { %4218 = shalt.err (!%p4215_p0)
}
0x1068   : > { %s4270_s2 = smov 128  }
0x1069   : > { %3813 = dma.vmem_to_hbm [thread:$0]  (%p4384_p5), %s6045_s20, 768, %s6041_s24, %s6050_s17, %s4270_s2, %s4270_s2, %s6169_s0  }
0x106a PF: > { %s6292_s28 = sld [smem:[#allocation5_spill]]  ;;  %p3819_p1 = scmp.ge.s32.totalorder %s4253_s16, 2 }
0x106c   : > { %p3816_p2 = pnand %p3819_p1, %p4388_p6 }
0x1070   : > { %s3400_s21 = sand.u32 1, %s6292_s28  }
0x1071   : > { %s3401_s26 = scalar_lea.sflag [#allocation3], %s3400_s21 }
0x1072   : > { %4236 = dma.done.wait (!%p3816_p2), %s3401_s26, 768  }
0x1073   : > { %4238 = vsyncadd (!%p3816_p2), %s3401_s26, 4294966528  ;;  %s6294_s16 = sld [smem:[#allocation7_spill]]  ;;  %s6295_s6 = sld [smem:[#allocation6_spill]] }
0x1074   : > { %s6296_s15 = sld [smem:[#allocation8_spill]]  ;;  %s6297_s29 = smov %s4245_s30 }
0x1079   : > { %p24_p3 = scmp.ge.s32.totalorder %s6294_s16, 4   ;;  %s6298_s30 = smov %s6295_s6 }
0x107b   :  { %26 = sbr.rel (!%p24_p3) target bundleno = 9 (0x9), region = 113 }
0x1082   :  { %3406 = vsyncpa [#allocation3], 1 }
0x1083   :  { %3408 = vsyncpa [#allocation3 + $0x1], 1 }

</bundles_post_ra>
